<compile_context>
chip_gen: v5e
topology: v5e:2x2
jax: 0.10.0
libtpu: 0.0.40
codegen_flags: <defaults>
</compile_context>

<pallas_src>
import functools

import jax
import jax.numpy as jnp
from jax import lax
from jax.experimental import pallas as pl
from jax.experimental.pallas import tpu as pltpu


def _round_up(x, m):
    return ((x + m - 1) // m) * m


def _dncnn_fused_kernel(x_ref, w_ref, shift_ref, o_ref, pa_ref, pb_ref,
                        *, depth, C, Cimg, H, W, Lc, Pbuf):
    """Whole DnCNN forward for one image (grid over batch).

    x_ref     : (Cimg, Pbuf)       pre-padded input, lane p = padded pixel p
    w_ref     : (depth, 9, C, C)   w[l, 3*dy+dx, co, ci] (BN scale folded in)
    shift_ref : (depth, C, 1)      folded BN shift (0 for plain conv layers)
    o_ref     : (Cimg, Lc)         residual x - noise in conv-output lane layout
    pa_ref/pb_ref : (C, Pbuf)      ping/pong zero-haloed activation buffers
    """
    Wp = W + 2
    L = (H - 1) * Wp + W          # conv output length incl. row-wrap junk lanes

    # ---- init activation buffers for this image --------------------------
    # Rows [0, Cimg): the pre-padded input, one contiguous lane-dense copy.
    pa_ref[0:Cimg, :] = x_ref[...]
    # Rows [Cimg, C): layer-0 weights for these channels are zero, but the
    # buffer must not hold garbage (0 * NaN != 0), so zero them once.
    if C > Cimg:
        pa_ref[Cimg:C, :] = jnp.zeros((C - Cimg, Pbuf), jnp.float32)
    # pb's interior window [Wp+1, Wp+1+Lc) is fully overwritten every layer;
    # only the halo strips outside it ever need zeroing.
    pb_ref[:, 0:Wp + 1] = jnp.zeros((C, Wp + 1), jnp.float32)
    pb_ref[:, Wp + 1 + Lc:Pbuf] = jnp.zeros((C, Pbuf - (Wp + 1 + Lc)),
                                            jnp.float32)

    # Lane-validity mask (hoisted out of the layer loop): lane p maps to
    # output pixel (p // Wp, p % Wp); row-wrap junk (p % Wp >= W) and the
    # padded tail (p >= L) must be stored as zero so they land exactly on
    # halo cells of the next padded buffer -> "same" padding stays correct.
    lane = lax.broadcasted_iota(jnp.int32, (1, Lc), 1)
    valid = (lane % Wp < W) & (lane < L)

    src, dst = pa_ref, pb_ref
    for l in range(depth):
        # 3x3 conv = 9 accumulated MXU matmuls (K = C each) reading shifted
        # lane windows of the padded buffer directly (no im2col scratch).
        acc = jnp.zeros((C, Lc), jnp.float32)
        for t in range(9):
            dy, dx = divmod(t, 3)
            start = dy * Wp + dx
            acc = acc + jnp.dot(w_ref[l, t], src[:, start:start + Lc],
                                preferred_element_type=jnp.float32)

        if 0 < l < depth - 1:
            acc = acc + shift_ref[l]          # folded-BN shift only

        if l < depth - 1:
            # ReLU, zero junk/tail lanes, and write the whole layer output as
            # one contiguous lane-slice into the next padded buffer.
            h = jnp.where(valid, jnp.maximum(acc, 0.0), 0.0)
            dst[:, Wp + 1:Wp + 1 + Lc] = h
            src, dst = dst, src
        else:
            # Last layer: acc is the predicted noise.  Residual o = x - noise,
            # emitted in lane layout; invalid lanes are discarded by wrapper.
            o_ref[...] = (x_ref[:, Wp + 1:Wp + 1 + Lc]
                          - acc[0:Cimg, :]).astype(o_ref.dtype)


@jax.jit
def dncnn_forward(x_nchw, w, shift):
    """DnCNN forward: returns x - noise, NCHW in / NCHW out."""
    N, Cimg, H, W = x_nchw.shape
    depth = w.shape[0]
    C = w.shape[2]
    Hp, Wp = H + 2, W + 2
    L = (H - 1) * Wp + W
    Lc = _round_up(L, 128)                              # lane-dense compute width
    Pbuf = _round_up(max(Hp * Wp, 2 * (Wp + 1) + Lc), 128)

    # Lane-dense input: "same" zero-halo pad + pad the flattened padded
    # spatial axis out to Pbuf lanes (cheap XLA ops in the wrapper).
    xp = jnp.pad(x_nchw.astype(jnp.float32), ((0, 0), (0, 0), (1, 1), (1, 1)))
    xp = xp.reshape(N, Cimg, Hp * Wp)
    xp = jnp.pad(xp, ((0, 0), (0, 0), (0, Pbuf - Hp * Wp)))

    kern = functools.partial(_dncnn_fused_kernel, depth=depth, C=C, Cimg=Cimg,
                             H=H, W=W, Lc=Lc, Pbuf=Pbuf)

    flops = 2 * N * depth * 9 * C * C * L
    bytes_accessed = (xp.size + w.size + shift.size + N * Cimg * Lc) * 4

    out_lanes = pl.pallas_call(
        kern,
        out_shape=jax.ShapeDtypeStruct((N, Cimg, Lc), jnp.float32),
        grid=(N,),
        in_specs=[
            pl.BlockSpec((None, Cimg, Pbuf), lambda n: (n, 0, 0)),
            pl.BlockSpec((depth, 9, C, C), lambda n: (0, 0, 0, 0)),
            pl.BlockSpec((depth, C, 1), lambda n: (0, 0, 0)),
        ],
        out_specs=pl.BlockSpec((None, Cimg, Lc), lambda n: (n, 0, 0)),
        scratch_shapes=[
            pltpu.VMEM((C, Pbuf), jnp.float32),   # padded activations (ping)
            pltpu.VMEM((C, Pbuf), jnp.float32),   # padded activations (pong)
        ],
        compiler_params=pltpu.CompilerParams(
            dimension_semantics=("parallel",)),    # batch across TCs (v7x)
        cost_estimate=pl.CostEstimate(flops=flops, transcendentals=0,
                                      bytes_accessed=bytes_accessed),
    )(xp, w, shift)

    # Un-pad in the wrapper: lane p -> pixel (p // Wp, p % Wp); valid pixels
    # have p % Wp < W and p < L.
    out = out_lanes[:, :, :L]
    out = jnp.pad(out, ((0, 0), (0, 0), (0, H * Wp - L)))
    out = out.reshape(N, Cimg, H, Wp)[:, :, :, :W]
    return out.astype(x_nchw.dtype)


def init_dncnn_params(key, depth=5, n_filters=16, img_channels=1, eps=1e-5):
    """Synthetic params. Returns (kernel params, pure-JAX reference layers)."""
    C = n_filters
    keys = jax.random.split(key, depth * 3)

    def he(k, cin, cout):
        std = (2.0 / (9.0 * cin)) ** 0.5
        return std * jax.random.normal(k, (3, 3, cin, cout), jnp.float32)  # HWIO

    def pack_w(w_hwio, cin, cout, scale):
        # zero-pad channels to C, fold BN scale into the weight, and reorder
        # to w[t, co, ci] with t = 3*dy + dx.
        wf = jnp.zeros((3, 3, C, C), jnp.float32).at[:, :, :cin, :cout].set(w_hwio)
        w9 = jnp.transpose(wf, (0, 1, 3, 2)).reshape(9, C, C)    # (t, co, ci)
        return w9 * scale[None, :, None]

    w_mats, shifts, ref_layers = [], [], []

    # layer 0: conv + relu
    w0 = he(keys[0], img_channels, C)
    ones_c = jnp.ones((C,), jnp.float32)
    w_mats.append(pack_w(w0, img_channels, C, ones_c))
    shifts.append(jnp.zeros((C,), jnp.float32))
    ref_layers.append(dict(w=w0, scale=ones_c, shift=jnp.zeros((C,), jnp.float32),
                           relu=True))

    # middle layers: conv + BN (inference mode, folded) + relu
    for i in range(depth - 2):
        kw, kg, kb = keys[3 * i + 1], keys[3 * i + 2], keys[3 * i + 3]
        wl = he(kw, C, C)
        gamma = 1.0 + 0.1 * jax.random.normal(kg, (C,), jnp.float32)
        beta = 0.1 * jax.random.normal(kb, (C,), jnp.float32)
        mean = jnp.zeros((C,), jnp.float32)
        var = jnp.ones((C,), jnp.float32)
        sc = gamma / jnp.sqrt(var + eps)
        sh = beta - mean * sc
        w_mats.append(pack_w(wl, C, C, sc))      # BN scale folded into weights
        shifts.append(sh)
        ref_layers.append(dict(w=wl, scale=sc, shift=sh, relu=True))

    # last layer: conv only
    wl = he(keys[-1], C, img_channels)
    w_mats.append(pack_w(wl, C, img_channels, ones_c))
    shifts.append(jnp.zeros((C,), jnp.float32))
    ref_layers.append(dict(w=wl, scale=jnp.ones((img_channels,), jnp.float32),
                           shift=jnp.zeros((img_channels,), jnp.float32),
                           relu=False))

    w = jnp.stack(w_mats)                     # (depth, 9, C, C)
    shift = jnp.stack(shifts)[..., None]      # (depth, C, 1)
    return (w, shift), ref_layers


# ------------------------- pure-JAX reference --------------------------------
def dncnn_ref(x_nchw, ref_layers):
    h = jnp.transpose(x_nchw, (0, 2, 3, 1))
    for lyr in ref_layers:
        h = lax.conv_general_dilated(
            h, lyr["w"], window_strides=(1, 1), padding="SAME",
            dimension_numbers=("NHWC", "HWIO", "NHWC"))
        h = h * lyr["scale"] + lyr["shift"]
        if lyr["relu"]:
            h = jnp.maximum(h, 0.0)
    return x_nchw - jnp.transpose(h, (0, 3, 1, 2))


if __name__ == "__main__":
    key = jax.random.PRNGKey(0)
    k_param, k_x = jax.random.split(key)

    depth, n_filters, img_channels = 5, 16, 1
    N, H, W = 2, 16, 16

    (w, shift), ref_layers = init_dncnn_params(
        k_param, depth=depth, n_filters=n_filters, img_channels=img_channels)
    x = jax.random.normal(k_x, (N, img_channels, H, W), jnp.float32)

    out = jax.block_until_ready(dncnn_forward(x, w, shift))
    ref = jax.block_until_ready(dncnn_ref(x, ref_layers))

    assert out.shape == x.shape and out.dtype == x.dtype
    assert jnp.allclose(out, ref, rtol=1e-3, atol=1e-3), "mismatch vs reference"
    print("KERNEL_OK")
</pallas_src>

<mosaic_0001>
module attributes {stable_mosaic.version = 11 : i64} {
  func.func @_dncnn_fused_kernel(%arg0: i32, %arg1: memref<1x1x512xf32, #tpu.memory_space<vmem>>, %arg2: memref<5x9x16x16xf32, #tpu.memory_space<vmem>>, %arg3: memref<5x16x1xf32, #tpu.memory_space<vmem>>, %arg4: memref<1x1x384xf32, #tpu.memory_space<vmem>>, %arg5: memref<16x512xf32, #tpu.memory_space<vmem>>, %arg6: memref<16x512xf32, #tpu.memory_space<vmem>>) attributes {dimension_semantics = [#tpu.dimension_semantics<parallel>], iteration_bounds = array<i64: 2>, scalar_prefetch = 0 : i64, scratch_operands = 2 : i64, tpu.core_type = #tpu.core_type<tc>, window_params = [{transform_indices = @transform_0, window_bounds = array<i64: 1, 1, 512>}, {pipeline_mode = #tpu.pipeline_mode<synchronous>, transform_indices = @transform_1, window_bounds = array<i64: 5, 9, 16, 16>}, {pipeline_mode = #tpu.pipeline_mode<synchronous>, transform_indices = @transform_2, window_bounds = array<i64: 5, 16, 1>}, {transform_indices = @transform_3, window_bounds = array<i64: 1, 1, 384>}]} {
    %c0 = arith.constant 0 : index
    %c0_0 = arith.constant 0 : index
    %c0_1 = arith.constant 0 : index
    %0 = vector.load %arg1[%c0, %c0_0, %c0_1] : memref<1x1x512xf32, #tpu.memory_space<vmem>>, vector<1x1x512xf32>
    %1 = vector.shape_cast %0 : vector<1x1x512xf32> to vector<1x512xf32>
    %c0_2 = arith.constant 0 : index
    %c0_3 = arith.constant 0 : index
    %2 = vector.load %arg5[%c0_2, %c0_3] : memref<16x512xf32, #tpu.memory_space<vmem>>, vector<1x512xf32>
    tpu.vector_store %arg5[%c0_2, %c0_3], %1 {strides = array<i32>} : memref<16x512xf32, #tpu.memory_space<vmem>>, vector<1x512xf32>,
    %cst = arith.constant 0.000000e+00 : f32
    %3 = vector.broadcast %cst : f32 to vector<15x512xf32>
    %c1 = arith.constant 1 : index
    %c0_4 = arith.constant 0 : index
    %4 = vector.load %arg5[%c1, %c0_4] : memref<16x512xf32, #tpu.memory_space<vmem>>, vector<15x512xf32>
    tpu.vector_store %arg5[%c1, %c0_4], %3 {strides = array<i32>} : memref<16x512xf32, #tpu.memory_space<vmem>>, vector<15x512xf32>,
    %cst_5 = arith.constant 0.000000e+00 : f32
    %5 = vector.broadcast %cst_5 : f32 to vector<16x19xf32>
    %c0_6 = arith.constant 0 : index
    %c0_7 = arith.constant 0 : index
    %6 = vector.load %arg6[%c0_6, %c0_7] : memref<16x512xf32, #tpu.memory_space<vmem>>, vector<16x19xf32>
    tpu.vector_store %arg6[%c0_6, %c0_7], %5 {strides = array<i32>} : memref<16x512xf32, #tpu.memory_space<vmem>>, vector<16x19xf32>,
    %cst_8 = arith.constant 0.000000e+00 : f32
    %7 = vector.broadcast %cst_8 : f32 to vector<16x109xf32>
    %c0_9 = arith.constant 0 : index
    %c403 = arith.constant 403 : index
    %8 = vector.load %arg6[%c0_9, %c403] : memref<16x512xf32, #tpu.memory_space<vmem>>, vector<16x109xf32>
    tpu.vector_store %arg6[%c0_9, %c403], %7 {strides = array<i32>} : memref<16x512xf32, #tpu.memory_space<vmem>>, vector<16x109xf32>,
    %9 = tpu.iota {dimensions = array<i32: 1>} : vector<1x384xi32>
    %c18_i32 = arith.constant 18 : i32
    %c0_i32 = arith.constant 0 : i32
    %10 = arith.cmpi eq, %c18_i32, %c0_i32 : i32
    %c1_i32 = arith.constant 1 : i32
    %11 = arith.select %10, %c1_i32, %c18_i32 : i32
    %12 = vector.broadcast %11 : i32 to vector<1x384xi32>
    %13 = arith.remsi %9, %12 : vector<1x384xi32>
    %c0_i32_10 = arith.constant 0 : i32
    %14 = vector.broadcast %c0_i32_10 : i32 to vector<1x384xi32>
    %15 = arith.cmpi ne, %13, %14 : vector<1x384xi32>
    %c0_i32_11 = arith.constant 0 : i32
    %16 = vector.broadcast %c0_i32_11 : i32 to vector<1x384xi32>
    %17 = arith.cmpi slt, %13, %16 : vector<1x384xi32>
    %c0_i32_12 = arith.constant 0 : i32
    %18 = arith.cmpi slt, %11, %c0_i32_12 : i32
    %19 = vector.broadcast %18 : i1 to vector<1x384xi1>
    %20 = vector.broadcast %19 : vector<1x384xi1> to vector<1x384xi1>
    %21 = arith.xori %17, %20 : vector<1x384xi1>
    %22 = arith.andi %21, %15 : vector<1x384xi1>
    %23 = vector.broadcast %11 : i32 to vector<1x384xi32>
    %24 = arith.addi %13, %23 : vector<1x384xi32>
    %25 = arith.select %22, %24, %13 : vector<1x384xi1>, vector<1x384xi32>
    %c16_i32 = arith.constant 16 : i32
    %26 = vector.broadcast %c16_i32 : i32 to vector<1x384xi32>
    %27 = arith.cmpi slt, %25, %26 : vector<1x384xi32>
    %c286_i32 = arith.constant 286 : i32
    %28 = vector.broadcast %c286_i32 : i32 to vector<1x384xi32>
    %29 = arith.cmpi slt, %9, %28 : vector<1x384xi32>
    %30 = arith.andi %27, %29 : vector<1x384xi1>
    %cst_13 = arith.constant 0.000000e+00 : f32
    %31 = vector.broadcast %cst_13 : f32 to vector<16x384xf32>
    %c0_14 = arith.constant 0 : index
    %c0_15 = arith.constant 0 : index
    %c0_16 = arith.constant 0 : index
    %c0_17 = arith.constant 0 : index
    %32 = vector.load %arg2[%c0_14, %c0_15, %c0_16, %c0_17] : memref<5x9x16x16xf32, #tpu.memory_space<vmem>>, vector<1x1x16x16xf32>
    %33 = vector.shape_cast %32 : vector<1x1x16x16xf32> to vector<16x16xf32>
    %c0_18 = arith.constant 0 : index
    %c0_19 = arith.constant 0 : index
    %34 = vector.load %arg5[%c0_18, %c0_19] : memref<16x512xf32, #tpu.memory_space<vmem>>, vector<16x384xf32>
    %cst_20 = arith.constant dense<0.000000e+00> : vector<16x384xf32>
    %35 = tpu.matmul %33, %34, %cst_20 {dimension_numbers = #tpu.dot_dimension_numbers<[1], [0], [0], [1], [0, 0, 1, 1], [], []>} : vector<16x16xf32>, vector<16x384xf32>, vector<16x384xf32> -> vector<16x384xf32>
    %36 = arith.addf %31, %35 : vector<16x384xf32>
    %c0_21 = arith.constant 0 : index
    %c1_22 = arith.constant 1 : index
    %c0_23 = arith.constant 0 : index
    %c0_24 = arith.constant 0 : index
    %37 = vector.load %arg2[%c0_21, %c1_22, %c0_23, %c0_24] : memref<5x9x16x16xf32, #tpu.memory_space<vmem>>, vector<1x1x16x16xf32>
    %38 = vector.shape_cast %37 : vector<1x1x16x16xf32> to vector<16x16xf32>
    %c0_25 = arith.constant 0 : index
    %c1_26 = arith.constant 1 : index
    %39 = vector.load %arg5[%c0_25, %c1_26] : memref<16x512xf32, #tpu.memory_space<vmem>>, vector<16x384xf32>
    %cst_27 = arith.constant dense<0.000000e+00> : vector<16x384xf32>
    %40 = tpu.matmul %38, %39, %cst_27 {dimension_numbers = #tpu.dot_dimension_numbers<[1], [0], [0], [1], [0, 0, 1, 1], [], []>} : vector<16x16xf32>, vector<16x384xf32>, vector<16x384xf32> -> vector<16x384xf32>
    %41 = arith.addf %36, %40 : vector<16x384xf32>
    %c0_28 = arith.constant 0 : index
    %c2 = arith.constant 2 : index
    %c0_29 = arith.constant 0 : index
    %c0_30 = arith.constant 0 : index
    %42 = vector.load %arg2[%c0_28, %c2, %c0_29, %c0_30] : memref<5x9x16x16xf32, #tpu.memory_space<vmem>>, vector<1x1x16x16xf32>
    %43 = vector.shape_cast %42 : vector<1x1x16x16xf32> to vector<16x16xf32>
    %c0_31 = arith.constant 0 : index
    %c2_32 = arith.constant 2 : index
    %44 = vector.load %arg5[%c0_31, %c2_32] : memref<16x512xf32, #tpu.memory_space<vmem>>, vector<16x384xf32>
    %cst_33 = arith.constant dense<0.000000e+00> : vector<16x384xf32>
    %45 = tpu.matmul %43, %44, %cst_33 {dimension_numbers = #tpu.dot_dimension_numbers<[1], [0], [0], [1], [0, 0, 1, 1], [], []>} : vector<16x16xf32>, vector<16x384xf32>, vector<16x384xf32> -> vector<16x384xf32>
    %46 = arith.addf %41, %45 : vector<16x384xf32>
    %c0_34 = arith.constant 0 : index
    %c3 = arith.constant 3 : index
    %c0_35 = arith.constant 0 : index
    %c0_36 = arith.constant 0 : index
    %47 = vector.load %arg2[%c0_34, %c3, %c0_35, %c0_36] : memref<5x9x16x16xf32, #tpu.memory_space<vmem>>, vector<1x1x16x16xf32>
    %48 = vector.shape_cast %47 : vector<1x1x16x16xf32> to vector<16x16xf32>
    %c0_37 = arith.constant 0 : index
    %c18 = arith.constant 18 : index
    %49 = vector.load %arg5[%c0_37, %c18] : memref<16x512xf32, #tpu.memory_space<vmem>>, vector<16x384xf32>
    %cst_38 = arith.constant dense<0.000000e+00> : vector<16x384xf32>
    %50 = tpu.matmul %48, %49, %cst_38 {dimension_numbers = #tpu.dot_dimension_numbers<[1], [0], [0], [1], [0, 0, 1, 1], [], []>} : vector<16x16xf32>, vector<16x384xf32>, vector<16x384xf32> -> vector<16x384xf32>
    %51 = arith.addf %46, %50 : vector<16x384xf32>
    %c0_39 = arith.constant 0 : index
    %c4 = arith.constant 4 : index
    %c0_40 = arith.constant 0 : index
    %c0_41 = arith.constant 0 : index
    %52 = vector.load %arg2[%c0_39, %c4, %c0_40, %c0_41] : memref<5x9x16x16xf32, #tpu.memory_space<vmem>>, vector<1x1x16x16xf32>
    %53 = vector.shape_cast %52 : vector<1x1x16x16xf32> to vector<16x16xf32>
    %c0_42 = arith.constant 0 : index
    %c19 = arith.constant 19 : index
    %54 = vector.load %arg5[%c0_42, %c19] : memref<16x512xf32, #tpu.memory_space<vmem>>, vector<16x384xf32>
    %cst_43 = arith.constant dense<0.000000e+00> : vector<16x384xf32>
    %55 = tpu.matmul %53, %54, %cst_43 {dimension_numbers = #tpu.dot_dimension_numbers<[1], [0], [0], [1], [0, 0, 1, 1], [], []>} : vector<16x16xf32>, vector<16x384xf32>, vector<16x384xf32> -> vector<16x384xf32>
    %56 = arith.addf %51, %55 : vector<16x384xf32>
    %c0_44 = arith.constant 0 : index
    %c5 = arith.constant 5 : index
    %c0_45 = arith.constant 0 : index
    %c0_46 = arith.constant 0 : index
    %57 = vector.load %arg2[%c0_44, %c5, %c0_45, %c0_46] : memref<5x9x16x16xf32, #tpu.memory_space<vmem>>, vector<1x1x16x16xf32>
    %58 = vector.shape_cast %57 : vector<1x1x16x16xf32> to vector<16x16xf32>
    %c0_47 = arith.constant 0 : index
    %c20 = arith.constant 20 : index
    %59 = vector.load %arg5[%c0_47, %c20] : memref<16x512xf32, #tpu.memory_space<vmem>>, vector<16x384xf32>
    %cst_48 = arith.constant dense<0.000000e+00> : vector<16x384xf32>
    %60 = tpu.matmul %58, %59, %cst_48 {dimension_numbers = #tpu.dot_dimension_numbers<[1], [0], [0], [1], [0, 0, 1, 1], [], []>} : vector<16x16xf32>, vector<16x384xf32>, vector<16x384xf32> -> vector<16x384xf32>
    %61 = arith.addf %56, %60 : vector<16x384xf32>
    %c0_49 = arith.constant 0 : index
    %c6 = arith.constant 6 : index
    %c0_50 = arith.constant 0 : index
    %c0_51 = arith.constant 0 : index
    %62 = vector.load %arg2[%c0_49, %c6, %c0_50, %c0_51] : memref<5x9x16x16xf32, #tpu.memory_space<vmem>>, vector<1x1x16x16xf32>
    %63 = vector.shape_cast %62 : vector<1x1x16x16xf32> to vector<16x16xf32>
    %c0_52 = arith.constant 0 : index
    %c36 = arith.constant 36 : index
    %64 = vector.load %arg5[%c0_52, %c36] : memref<16x512xf32, #tpu.memory_space<vmem>>, vector<16x384xf32>
    %cst_53 = arith.constant dense<0.000000e+00> : vector<16x384xf32>
    %65 = tpu.matmul %63, %64, %cst_53 {dimension_numbers = #tpu.dot_dimension_numbers<[1], [0], [0], [1], [0, 0, 1, 1], [], []>} : vector<16x16xf32>, vector<16x384xf32>, vector<16x384xf32> -> vector<16x384xf32>
    %66 = arith.addf %61, %65 : vector<16x384xf32>
    %c0_54 = arith.constant 0 : index
    %c7 = arith.constant 7 : index
    %c0_55 = arith.constant 0 : index
    %c0_56 = arith.constant 0 : index
    %67 = vector.load %arg2[%c0_54, %c7, %c0_55, %c0_56] : memref<5x9x16x16xf32, #tpu.memory_space<vmem>>, vector<1x1x16x16xf32>
    %68 = vector.shape_cast %67 : vector<1x1x16x16xf32> to vector<16x16xf32>
    %c0_57 = arith.constant 0 : index
    %c37 = arith.constant 37 : index
    %69 = vector.load %arg5[%c0_57, %c37] : memref<16x512xf32, #tpu.memory_space<vmem>>, vector<16x384xf32>
    %cst_58 = arith.constant dense<0.000000e+00> : vector<16x384xf32>
    %70 = tpu.matmul %68, %69, %cst_58 {dimension_numbers = #tpu.dot_dimension_numbers<[1], [0], [0], [1], [0, 0, 1, 1], [], []>} : vector<16x16xf32>, vector<16x384xf32>, vector<16x384xf32> -> vector<16x384xf32>
    %71 = arith.addf %66, %70 : vector<16x384xf32>
    %c0_59 = arith.constant 0 : index
    %c8 = arith.constant 8 : index
    %c0_60 = arith.constant 0 : index
    %c0_61 = arith.constant 0 : index
    %72 = vector.load %arg2[%c0_59, %c8, %c0_60, %c0_61] : memref<5x9x16x16xf32, #tpu.memory_space<vmem>>, vector<1x1x16x16xf32>
    %73 = vector.shape_cast %72 : vector<1x1x16x16xf32> to vector<16x16xf32>
    %c0_62 = arith.constant 0 : index
    %c38 = arith.constant 38 : index
    %74 = vector.load %arg5[%c0_62, %c38] : memref<16x512xf32, #tpu.memory_space<vmem>>, vector<16x384xf32>
    %cst_63 = arith.constant dense<0.000000e+00> : vector<16x384xf32>
    %75 = tpu.matmul %73, %74, %cst_63 {dimension_numbers = #tpu.dot_dimension_numbers<[1], [0], [0], [1], [0, 0, 1, 1], [], []>} : vector<16x16xf32>, vector<16x384xf32>, vector<16x384xf32> -> vector<16x384xf32>
    %76 = arith.addf %71, %75 : vector<16x384xf32>
    %cst_64 = arith.constant 0.000000e+00 : f32
    %77 = vector.broadcast %cst_64 : f32 to vector<16x384xf32>
    %78 = arith.maximumf %76, %77 : vector<16x384xf32>
    %cst_65 = arith.constant 0.000000e+00 : f32
    %79 = vector.shape_cast %30 : vector<1x384xi1> to vector<1x384xi1>
    %80 = vector.broadcast %79 : vector<1x384xi1> to vector<16x384xi1>
    %81 = vector.broadcast %cst_65 : f32 to vector<16x384xf32>
    %82 = arith.select %80, %78, %81 : vector<16x384xi1>, vector<16x384xf32>
    %c0_66 = arith.constant 0 : index
    %c19_67 = arith.constant 19 : index
    %83 = vector.load %arg6[%c0_66, %c19_67] : memref<16x512xf32, #tpu.memory_space<vmem>>, vector<16x384xf32>
    tpu.vector_store %arg6[%c0_66, %c19_67], %82 {strides = array<i32>} : memref<16x512xf32, #tpu.memory_space<vmem>>, vector<16x384xf32>,
    %cst_68 = arith.constant 0.000000e+00 : f32
    %84 = vector.broadcast %cst_68 : f32 to vector<16x384xf32>
    %c1_69 = arith.constant 1 : index
    %c0_70 = arith.constant 0 : index
    %c0_71 = arith.constant 0 : index
    %c0_72 = arith.constant 0 : index
    %85 = vector.load %arg2[%c1_69, %c0_70, %c0_71, %c0_72] : memref<5x9x16x16xf32, #tpu.memory_space<vmem>>, vector<1x1x16x16xf32>
    %86 = vector.shape_cast %85 : vector<1x1x16x16xf32> to vector<16x16xf32>
    %c0_73 = arith.constant 0 : index
    %c0_74 = arith.constant 0 : index
    %87 = vector.load %arg6[%c0_73, %c0_74] : memref<16x512xf32, #tpu.memory_space<vmem>>, vector<16x384xf32>
    %cst_75 = arith.constant dense<0.000000e+00> : vector<16x384xf32>
    %88 = tpu.matmul %86, %87, %cst_75 {dimension_numbers = #tpu.dot_dimension_numbers<[1], [0], [0], [1], [0, 0, 1, 1], [], []>} : vector<16x16xf32>, vector<16x384xf32>, vector<16x384xf32> -> vector<16x384xf32>
    %89 = arith.addf %84, %88 : vector<16x384xf32>
    %c1_76 = arith.constant 1 : index
    %c1_77 = arith.constant 1 : index
    %c0_78 = arith.constant 0 : index
    %c0_79 = arith.constant 0 : index
    %90 = vector.load %arg2[%c1_76, %c1_77, %c0_78, %c0_79] : memref<5x9x16x16xf32, #tpu.memory_space<vmem>>, vector<1x1x16x16xf32>
    %91 = vector.shape_cast %90 : vector<1x1x16x16xf32> to vector<16x16xf32>
    %c0_80 = arith.constant 0 : index
    %c1_81 = arith.constant 1 : index
    %92 = vector.load %arg6[%c0_80, %c1_81] : memref<16x512xf32, #tpu.memory_space<vmem>>, vector<16x384xf32>
    %cst_82 = arith.constant dense<0.000000e+00> : vector<16x384xf32>
    %93 = tpu.matmul %91, %92, %cst_82 {dimension_numbers = #tpu.dot_dimension_numbers<[1], [0], [0], [1], [0, 0, 1, 1], [], []>} : vector<16x16xf32>, vector<16x384xf32>, vector<16x384xf32> -> vector<16x384xf32>
    %94 = arith.addf %89, %93 : vector<16x384xf32>
    %c1_83 = arith.constant 1 : index
    %c2_84 = arith.constant 2 : index
    %c0_85 = arith.constant 0 : index
    %c0_86 = arith.constant 0 : index
    %95 = vector.load %arg2[%c1_83, %c2_84, %c0_85, %c0_86] : memref<5x9x16x16xf32, #tpu.memory_space<vmem>>, vector<1x1x16x16xf32>
    %96 = vector.shape_cast %95 : vector<1x1x16x16xf32> to vector<16x16xf32>
    %c0_87 = arith.constant 0 : index
    %c2_88 = arith.constant 2 : index
    %97 = vector.load %arg6[%c0_87, %c2_88] : memref<16x512xf32, #tpu.memory_space<vmem>>, vector<16x384xf32>
    %cst_89 = arith.constant dense<0.000000e+00> : vector<16x384xf32>
    %98 = tpu.matmul %96, %97, %cst_89 {dimension_numbers = #tpu.dot_dimension_numbers<[1], [0], [0], [1], [0, 0, 1, 1], [], []>} : vector<16x16xf32>, vector<16x384xf32>, vector<16x384xf32> -> vector<16x384xf32>
    %99 = arith.addf %94, %98 : vector<16x384xf32>
    %c1_90 = arith.constant 1 : index
    %c3_91 = arith.constant 3 : index
    %c0_92 = arith.constant 0 : index
    %c0_93 = arith.constant 0 : index
    %100 = vector.load %arg2[%c1_90, %c3_91, %c0_92, %c0_93] : memref<5x9x16x16xf32, #tpu.memory_space<vmem>>, vector<1x1x16x16xf32>
    %101 = vector.shape_cast %100 : vector<1x1x16x16xf32> to vector<16x16xf32>
    %c0_94 = arith.constant 0 : index
    %c18_95 = arith.constant 18 : index
    %102 = vector.load %arg6[%c0_94, %c18_95] : memref<16x512xf32, #tpu.memory_space<vmem>>, vector<16x384xf32>
    %cst_96 = arith.constant dense<0.000000e+00> : vector<16x384xf32>
    %103 = tpu.matmul %101, %102, %cst_96 {dimension_numbers = #tpu.dot_dimension_numbers<[1], [0], [0], [1], [0, 0, 1, 1], [], []>} : vector<16x16xf32>, vector<16x384xf32>, vector<16x384xf32> -> vector<16x384xf32>
    %104 = arith.addf %99, %103 : vector<16x384xf32>
    %c1_97 = arith.constant 1 : index
    %c4_98 = arith.constant 4 : index
    %c0_99 = arith.constant 0 : index
    %c0_100 = arith.constant 0 : index
    %105 = vector.load %arg2[%c1_97, %c4_98, %c0_99, %c0_100] : memref<5x9x16x16xf32, #tpu.memory_space<vmem>>, vector<1x1x16x16xf32>
    %106 = vector.shape_cast %105 : vector<1x1x16x16xf32> to vector<16x16xf32>
    %c0_101 = arith.constant 0 : index
    %c19_102 = arith.constant 19 : index
    %107 = vector.load %arg6[%c0_101, %c19_102] : memref<16x512xf32, #tpu.memory_space<vmem>>, vector<16x384xf32>
    %cst_103 = arith.constant dense<0.000000e+00> : vector<16x384xf32>
    %108 = tpu.matmul %106, %107, %cst_103 {dimension_numbers = #tpu.dot_dimension_numbers<[1], [0], [0], [1], [0, 0, 1, 1], [], []>} : vector<16x16xf32>, vector<16x384xf32>, vector<16x384xf32> -> vector<16x384xf32>
    %109 = arith.addf %104, %108 : vector<16x384xf32>
    %c1_104 = arith.constant 1 : index
    %c5_105 = arith.constant 5 : index
    %c0_106 = arith.constant 0 : index
    %c0_107 = arith.constant 0 : index
    %110 = vector.load %arg2[%c1_104, %c5_105, %c0_106, %c0_107] : memref<5x9x16x16xf32, #tpu.memory_space<vmem>>, vector<1x1x16x16xf32>
    %111 = vector.shape_cast %110 : vector<1x1x16x16xf32> to vector<16x16xf32>
    %c0_108 = arith.constant 0 : index
    %c20_109 = arith.constant 20 : index
    %112 = vector.load %arg6[%c0_108, %c20_109] : memref<16x512xf32, #tpu.memory_space<vmem>>, vector<16x384xf32>
    %cst_110 = arith.constant dense<0.000000e+00> : vector<16x384xf32>
    %113 = tpu.matmul %111, %112, %cst_110 {dimension_numbers = #tpu.dot_dimension_numbers<[1], [0], [0], [1], [0, 0, 1, 1], [], []>} : vector<16x16xf32>, vector<16x384xf32>, vector<16x384xf32> -> vector<16x384xf32>
    %114 = arith.addf %109, %113 : vector<16x384xf32>
    %c1_111 = arith.constant 1 : index
    %c6_112 = arith.constant 6 : index
    %c0_113 = arith.constant 0 : index
    %c0_114 = arith.constant 0 : index
    %115 = vector.load %arg2[%c1_111, %c6_112, %c0_113, %c0_114] : memref<5x9x16x16xf32, #tpu.memory_space<vmem>>, vector<1x1x16x16xf32>
    %116 = vector.shape_cast %115 : vector<1x1x16x16xf32> to vector<16x16xf32>
    %c0_115 = arith.constant 0 : index
    %c36_116 = arith.constant 36 : index
    %117 = vector.load %arg6[%c0_115, %c36_116] : memref<16x512xf32, #tpu.memory_space<vmem>>, vector<16x384xf32>
    %cst_117 = arith.constant dense<0.000000e+00> : vector<16x384xf32>
    %118 = tpu.matmul %116, %117, %cst_117 {dimension_numbers = #tpu.dot_dimension_numbers<[1], [0], [0], [1], [0, 0, 1, 1], [], []>} : vector<16x16xf32>, vector<16x384xf32>, vector<16x384xf32> -> vector<16x384xf32>
    %119 = arith.addf %114, %118 : vector<16x384xf32>
    %c1_118 = arith.constant 1 : index
    %c7_119 = arith.constant 7 : index
    %c0_120 = arith.constant 0 : index
    %c0_121 = arith.constant 0 : index
    %120 = vector.load %arg2[%c1_118, %c7_119, %c0_120, %c0_121] : memref<5x9x16x16xf32, #tpu.memory_space<vmem>>, vector<1x1x16x16xf32>
    %121 = vector.shape_cast %120 : vector<1x1x16x16xf32> to vector<16x16xf32>
    %c0_122 = arith.constant 0 : index
    %c37_123 = arith.constant 37 : index
    %122 = vector.load %arg6[%c0_122, %c37_123] : memref<16x512xf32, #tpu.memory_space<vmem>>, vector<16x384xf32>
    %cst_124 = arith.constant dense<0.000000e+00> : vector<16x384xf32>
    %123 = tpu.matmul %121, %122, %cst_124 {dimension_numbers = #tpu.dot_dimension_numbers<[1], [0], [0], [1], [0, 0, 1, 1], [], []>} : vector<16x16xf32>, vector<16x384xf32>, vector<16x384xf32> -> vector<16x384xf32>
    %124 = arith.addf %119, %123 : vector<16x384xf32>
    %c1_125 = arith.constant 1 : index
    %c8_126 = arith.constant 8 : index
    %c0_127 = arith.constant 0 : index
    %c0_128 = arith.constant 0 : index
    %125 = vector.load %arg2[%c1_125, %c8_126, %c0_127, %c0_128] : memref<5x9x16x16xf32, #tpu.memory_space<vmem>>, vector<1x1x16x16xf32>
    %126 = vector.shape_cast %125 : vector<1x1x16x16xf32> to vector<16x16xf32>
    %c0_129 = arith.constant 0 : index
    %c38_130 = arith.constant 38 : index
    %127 = vector.load %arg6[%c0_129, %c38_130] : memref<16x512xf32, #tpu.memory_space<vmem>>, vector<16x384xf32>
    %cst_131 = arith.constant dense<0.000000e+00> : vector<16x384xf32>
    %128 = tpu.matmul %126, %127, %cst_131 {dimension_numbers = #tpu.dot_dimension_numbers<[1], [0], [0], [1], [0, 0, 1, 1], [], []>} : vector<16x16xf32>, vector<16x384xf32>, vector<16x384xf32> -> vector<16x384xf32>
    %129 = arith.addf %124, %128 : vector<16x384xf32>
    %c1_132 = arith.constant 1 : index
    %c0_133 = arith.constant 0 : index
    %c0_134 = arith.constant 0 : index
    %130 = vector.load %arg3[%c1_132, %c0_133, %c0_134] : memref<5x16x1xf32, #tpu.memory_space<vmem>>, vector<1x16x1xf32>
    %131 = vector.shape_cast %130 : vector<1x16x1xf32> to vector<16x1xf32>
    %132 = vector.broadcast %131 : vector<16x1xf32> to vector<16x384xf32>
    %133 = arith.addf %129, %132 : vector<16x384xf32>
    %cst_135 = arith.constant 0.000000e+00 : f32
    %134 = vector.broadcast %cst_135 : f32 to vector<16x384xf32>
    %135 = arith.maximumf %133, %134 : vector<16x384xf32>
    %cst_136 = arith.constant 0.000000e+00 : f32
    %136 = vector.shape_cast %30 : vector<1x384xi1> to vector<1x384xi1>
    %137 = vector.broadcast %136 : vector<1x384xi1> to vector<16x384xi1>
    %138 = vector.broadcast %cst_136 : f32 to vector<16x384xf32>
    %139 = arith.select %137, %135, %138 : vector<16x384xi1>, vector<16x384xf32>
    %c0_137 = arith.constant 0 : index
    %c19_138 = arith.constant 19 : index
    %140 = vector.load %arg5[%c0_137, %c19_138] : memref<16x512xf32, #tpu.memory_space<vmem>>, vector<16x384xf32>
    tpu.vector_store %arg5[%c0_137, %c19_138], %139 {strides = array<i32>} : memref<16x512xf32, #tpu.memory_space<vmem>>, vector<16x384xf32>,
    %cst_139 = arith.constant 0.000000e+00 : f32
    %141 = vector.broadcast %cst_139 : f32 to vector<16x384xf32>
    %c2_140 = arith.constant 2 : index
    %c0_141 = arith.constant 0 : index
    %c0_142 = arith.constant 0 : index
    %c0_143 = arith.constant 0 : index
    %142 = vector.load %arg2[%c2_140, %c0_141, %c0_142, %c0_143] : memref<5x9x16x16xf32, #tpu.memory_space<vmem>>, vector<1x1x16x16xf32>
    %143 = vector.shape_cast %142 : vector<1x1x16x16xf32> to vector<16x16xf32>
    %c0_144 = arith.constant 0 : index
    %c0_145 = arith.constant 0 : index
    %144 = vector.load %arg5[%c0_144, %c0_145] : memref<16x512xf32, #tpu.memory_space<vmem>>, vector<16x384xf32>
    %cst_146 = arith.constant dense<0.000000e+00> : vector<16x384xf32>
    %145 = tpu.matmul %143, %144, %cst_146 {dimension_numbers = #tpu.dot_dimension_numbers<[1], [0], [0], [1], [0, 0, 1, 1], [], []>} : vector<16x16xf32>, vector<16x384xf32>, vector<16x384xf32> -> vector<16x384xf32>
    %146 = arith.addf %141, %145 : vector<16x384xf32>
    %c2_147 = arith.constant 2 : index
    %c1_148 = arith.constant 1 : index
    %c0_149 = arith.constant 0 : index
    %c0_150 = arith.constant 0 : index
    %147 = vector.load %arg2[%c2_147, %c1_148, %c0_149, %c0_150] : memref<5x9x16x16xf32, #tpu.memory_space<vmem>>, vector<1x1x16x16xf32>
    %148 = vector.shape_cast %147 : vector<1x1x16x16xf32> to vector<16x16xf32>
    %c0_151 = arith.constant 0 : index
    %c1_152 = arith.constant 1 : index
    %149 = vector.load %arg5[%c0_151, %c1_152] : memref<16x512xf32, #tpu.memory_space<vmem>>, vector<16x384xf32>
    %cst_153 = arith.constant dense<0.000000e+00> : vector<16x384xf32>
    %150 = tpu.matmul %148, %149, %cst_153 {dimension_numbers = #tpu.dot_dimension_numbers<[1], [0], [0], [1], [0, 0, 1, 1], [], []>} : vector<16x16xf32>, vector<16x384xf32>, vector<16x384xf32> -> vector<16x384xf32>
    %151 = arith.addf %146, %150 : vector<16x384xf32>
    %c2_154 = arith.constant 2 : index
    %c2_155 = arith.constant 2 : index
    %c0_156 = arith.constant 0 : index
    %c0_157 = arith.constant 0 : index
    %152 = vector.load %arg2[%c2_154, %c2_155, %c0_156, %c0_157] : memref<5x9x16x16xf32, #tpu.memory_space<vmem>>, vector<1x1x16x16xf32>
    %153 = vector.shape_cast %152 : vector<1x1x16x16xf32> to vector<16x16xf32>
    %c0_158 = arith.constant 0 : index
    %c2_159 = arith.constant 2 : index
    %154 = vector.load %arg5[%c0_158, %c2_159] : memref<16x512xf32, #tpu.memory_space<vmem>>, vector<16x384xf32>
    %cst_160 = arith.constant dense<0.000000e+00> : vector<16x384xf32>
    %155 = tpu.matmul %153, %154, %cst_160 {dimension_numbers = #tpu.dot_dimension_numbers<[1], [0], [0], [1], [0, 0, 1, 1], [], []>} : vector<16x16xf32>, vector<16x384xf32>, vector<16x384xf32> -> vector<16x384xf32>
    %156 = arith.addf %151, %155 : vector<16x384xf32>
    %c2_161 = arith.constant 2 : index
    %c3_162 = arith.constant 3 : index
    %c0_163 = arith.constant 0 : index
    %c0_164 = arith.constant 0 : index
    %157 = vector.load %arg2[%c2_161, %c3_162, %c0_163, %c0_164] : memref<5x9x16x16xf32, #tpu.memory_space<vmem>>, vector<1x1x16x16xf32>
    %158 = vector.shape_cast %157 : vector<1x1x16x16xf32> to vector<16x16xf32>
    %c0_165 = arith.constant 0 : index
    %c18_166 = arith.constant 18 : index
    %159 = vector.load %arg5[%c0_165, %c18_166] : memref<16x512xf32, #tpu.memory_space<vmem>>, vector<16x384xf32>
    %cst_167 = arith.constant dense<0.000000e+00> : vector<16x384xf32>
    %160 = tpu.matmul %158, %159, %cst_167 {dimension_numbers = #tpu.dot_dimension_numbers<[1], [0], [0], [1], [0, 0, 1, 1], [], []>} : vector<16x16xf32>, vector<16x384xf32>, vector<16x384xf32> -> vector<16x384xf32>
    %161 = arith.addf %156, %160 : vector<16x384xf32>
    %c2_168 = arith.constant 2 : index
    %c4_169 = arith.constant 4 : index
    %c0_170 = arith.constant 0 : index
    %c0_171 = arith.constant 0 : index
    %162 = vector.load %arg2[%c2_168, %c4_169, %c0_170, %c0_171] : memref<5x9x16x16xf32, #tpu.memory_space<vmem>>, vector<1x1x16x16xf32>
    %163 = vector.shape_cast %162 : vector<1x1x16x16xf32> to vector<16x16xf32>
    %c0_172 = arith.constant 0 : index
    %c19_173 = arith.constant 19 : index
    %164 = vector.load %arg5[%c0_172, %c19_173] : memref<16x512xf32, #tpu.memory_space<vmem>>, vector<16x384xf32>
    %cst_174 = arith.constant dense<0.000000e+00> : vector<16x384xf32>
    %165 = tpu.matmul %163, %164, %cst_174 {dimension_numbers = #tpu.dot_dimension_numbers<[1], [0], [0], [1], [0, 0, 1, 1], [], []>} : vector<16x16xf32>, vector<16x384xf32>, vector<16x384xf32> -> vector<16x384xf32>
    %166 = arith.addf %161, %165 : vector<16x384xf32>
    %c2_175 = arith.constant 2 : index
    %c5_176 = arith.constant 5 : index
    %c0_177 = arith.constant 0 : index
    %c0_178 = arith.constant 0 : index
    %167 = vector.load %arg2[%c2_175, %c5_176, %c0_177, %c0_178] : memref<5x9x16x16xf32, #tpu.memory_space<vmem>>, vector<1x1x16x16xf32>
    %168 = vector.shape_cast %167 : vector<1x1x16x16xf32> to vector<16x16xf32>
    %c0_179 = arith.constant 0 : index
    %c20_180 = arith.constant 20 : index
    %169 = vector.load %arg5[%c0_179, %c20_180] : memref<16x512xf32, #tpu.memory_space<vmem>>, vector<16x384xf32>
    %cst_181 = arith.constant dense<0.000000e+00> : vector<16x384xf32>
    %170 = tpu.matmul %168, %169, %cst_181 {dimension_numbers = #tpu.dot_dimension_numbers<[1], [0], [0], [1], [0, 0, 1, 1], [], []>} : vector<16x16xf32>, vector<16x384xf32>, vector<16x384xf32> -> vector<16x384xf32>
    %171 = arith.addf %166, %170 : vector<16x384xf32>
    %c2_182 = arith.constant 2 : index
    %c6_183 = arith.constant 6 : index
    %c0_184 = arith.constant 0 : index
    %c0_185 = arith.constant 0 : index
    %172 = vector.load %arg2[%c2_182, %c6_183, %c0_184, %c0_185] : memref<5x9x16x16xf32, #tpu.memory_space<vmem>>, vector<1x1x16x16xf32>
    %173 = vector.shape_cast %172 : vector<1x1x16x16xf32> to vector<16x16xf32>
    %c0_186 = arith.constant 0 : index
    %c36_187 = arith.constant 36 : index
    %174 = vector.load %arg5[%c0_186, %c36_187] : memref<16x512xf32, #tpu.memory_space<vmem>>, vector<16x384xf32>
    %cst_188 = arith.constant dense<0.000000e+00> : vector<16x384xf32>
    %175 = tpu.matmul %173, %174, %cst_188 {dimension_numbers = #tpu.dot_dimension_numbers<[1], [0], [0], [1], [0, 0, 1, 1], [], []>} : vector<16x16xf32>, vector<16x384xf32>, vector<16x384xf32> -> vector<16x384xf32>
    %176 = arith.addf %171, %175 : vector<16x384xf32>
    %c2_189 = arith.constant 2 : index
    %c7_190 = arith.constant 7 : index
    %c0_191 = arith.constant 0 : index
    %c0_192 = arith.constant 0 : index
    %177 = vector.load %arg2[%c2_189, %c7_190, %c0_191, %c0_192] : memref<5x9x16x16xf32, #tpu.memory_space<vmem>>, vector<1x1x16x16xf32>
    %178 = vector.shape_cast %177 : vector<1x1x16x16xf32> to vector<16x16xf32>
    %c0_193 = arith.constant 0 : index
    %c37_194 = arith.constant 37 : index
    %179 = vector.load %arg5[%c0_193, %c37_194] : memref<16x512xf32, #tpu.memory_space<vmem>>, vector<16x384xf32>
    %cst_195 = arith.constant dense<0.000000e+00> : vector<16x384xf32>
    %180 = tpu.matmul %178, %179, %cst_195 {dimension_numbers = #tpu.dot_dimension_numbers<[1], [0], [0], [1], [0, 0, 1, 1], [], []>} : vector<16x16xf32>, vector<16x384xf32>, vector<16x384xf32> -> vector<16x384xf32>
    %181 = arith.addf %176, %180 : vector<16x384xf32>
    %c2_196 = arith.constant 2 : index
    %c8_197 = arith.constant 8 : index
    %c0_198 = arith.constant 0 : index
    %c0_199 = arith.constant 0 : index
    %182 = vector.load %arg2[%c2_196, %c8_197, %c0_198, %c0_199] : memref<5x9x16x16xf32, #tpu.memory_space<vmem>>, vector<1x1x16x16xf32>
    %183 = vector.shape_cast %182 : vector<1x1x16x16xf32> to vector<16x16xf32>
    %c0_200 = arith.constant 0 : index
    %c38_201 = arith.constant 38 : index
    %184 = vector.load %arg5[%c0_200, %c38_201] : memref<16x512xf32, #tpu.memory_space<vmem>>, vector<16x384xf32>
    %cst_202 = arith.constant dense<0.000000e+00> : vector<16x384xf32>
    %185 = tpu.matmul %183, %184, %cst_202 {dimension_numbers = #tpu.dot_dimension_numbers<[1], [0], [0], [1], [0, 0, 1, 1], [], []>} : vector<16x16xf32>, vector<16x384xf32>, vector<16x384xf32> -> vector<16x384xf32>
    %186 = arith.addf %181, %185 : vector<16x384xf32>
    %c2_203 = arith.constant 2 : index
    %c0_204 = arith.constant 0 : index
    %c0_205 = arith.constant 0 : index
    %187 = vector.load %arg3[%c2_203, %c0_204, %c0_205] : memref<5x16x1xf32, #tpu.memory_space<vmem>>, vector<1x16x1xf32>
    %188 = vector.shape_cast %187 : vector<1x16x1xf32> to vector<16x1xf32>
    %189 = vector.broadcast %188 : vector<16x1xf32> to vector<16x384xf32>
    %190 = arith.addf %186, %189 : vector<16x384xf32>
    %cst_206 = arith.constant 0.000000e+00 : f32
    %191 = vector.broadcast %cst_206 : f32 to vector<16x384xf32>
    %192 = arith.maximumf %190, %191 : vector<16x384xf32>
    %cst_207 = arith.constant 0.000000e+00 : f32
    %193 = vector.shape_cast %30 : vector<1x384xi1> to vector<1x384xi1>
    %194 = vector.broadcast %193 : vector<1x384xi1> to vector<16x384xi1>
    %195 = vector.broadcast %cst_207 : f32 to vector<16x384xf32>
    %196 = arith.select %194, %192, %195 : vector<16x384xi1>, vector<16x384xf32>
    %c0_208 = arith.constant 0 : index
    %c19_209 = arith.constant 19 : index
    %197 = vector.load %arg6[%c0_208, %c19_209] : memref<16x512xf32, #tpu.memory_space<vmem>>, vector<16x384xf32>
    tpu.vector_store %arg6[%c0_208, %c19_209], %196 {strides = array<i32>} : memref<16x512xf32, #tpu.memory_space<vmem>>, vector<16x384xf32>,
    %cst_210 = arith.constant 0.000000e+00 : f32
    %198 = vector.broadcast %cst_210 : f32 to vector<16x384xf32>
    %c3_211 = arith.constant 3 : index
    %c0_212 = arith.constant 0 : index
    %c0_213 = arith.constant 0 : index
    %c0_214 = arith.constant 0 : index
    %199 = vector.load %arg2[%c3_211, %c0_212, %c0_213, %c0_214] : memref<5x9x16x16xf32, #tpu.memory_space<vmem>>, vector<1x1x16x16xf32>
    %200 = vector.shape_cast %199 : vector<1x1x16x16xf32> to vector<16x16xf32>
    %c0_215 = arith.constant 0 : index
    %c0_216 = arith.constant 0 : index
    %201 = vector.load %arg6[%c0_215, %c0_216] : memref<16x512xf32, #tpu.memory_space<vmem>>, vector<16x384xf32>
    %cst_217 = arith.constant dense<0.000000e+00> : vector<16x384xf32>
    %202 = tpu.matmul %200, %201, %cst_217 {dimension_numbers = #tpu.dot_dimension_numbers<[1], [0], [0], [1], [0, 0, 1, 1], [], []>} : vector<16x16xf32>, vector<16x384xf32>, vector<16x384xf32> -> vector<16x384xf32>
    %203 = arith.addf %198, %202 : vector<16x384xf32>
    %c3_218 = arith.constant 3 : index
    %c1_219 = arith.constant 1 : index
    %c0_220 = arith.constant 0 : index
    %c0_221 = arith.constant 0 : index
    %204 = vector.load %arg2[%c3_218, %c1_219, %c0_220, %c0_221] : memref<5x9x16x16xf32, #tpu.memory_space<vmem>>, vector<1x1x16x16xf32>
    %205 = vector.shape_cast %204 : vector<1x1x16x16xf32> to vector<16x16xf32>
    %c0_222 = arith.constant 0 : index
    %c1_223 = arith.constant 1 : index
    %206 = vector.load %arg6[%c0_222, %c1_223] : memref<16x512xf32, #tpu.memory_space<vmem>>, vector<16x384xf32>
    %cst_224 = arith.constant dense<0.000000e+00> : vector<16x384xf32>
    %207 = tpu.matmul %205, %206, %cst_224 {dimension_numbers = #tpu.dot_dimension_numbers<[1], [0], [0], [1], [0, 0, 1, 1], [], []>} : vector<16x16xf32>, vector<16x384xf32>, vector<16x384xf32> -> vector<16x384xf32>
    %208 = arith.addf %203, %207 : vector<16x384xf32>
    %c3_225 = arith.constant 3 : index
    %c2_226 = arith.constant 2 : index
    %c0_227 = arith.constant 0 : index
    %c0_228 = arith.constant 0 : index
    %209 = vector.load %arg2[%c3_225, %c2_226, %c0_227, %c0_228] : memref<5x9x16x16xf32, #tpu.memory_space<vmem>>, vector<1x1x16x16xf32>
    %210 = vector.shape_cast %209 : vector<1x1x16x16xf32> to vector<16x16xf32>
    %c0_229 = arith.constant 0 : index
    %c2_230 = arith.constant 2 : index
    %211 = vector.load %arg6[%c0_229, %c2_230] : memref<16x512xf32, #tpu.memory_space<vmem>>, vector<16x384xf32>
    %cst_231 = arith.constant dense<0.000000e+00> : vector<16x384xf32>
    %212 = tpu.matmul %210, %211, %cst_231 {dimension_numbers = #tpu.dot_dimension_numbers<[1], [0], [0], [1], [0, 0, 1, 1], [], []>} : vector<16x16xf32>, vector<16x384xf32>, vector<16x384xf32> -> vector<16x384xf32>
    %213 = arith.addf %208, %212 : vector<16x384xf32>
    %c3_232 = arith.constant 3 : index
    %c3_233 = arith.constant 3 : index
    %c0_234 = arith.constant 0 : index
    %c0_235 = arith.constant 0 : index
    %214 = vector.load %arg2[%c3_232, %c3_233, %c0_234, %c0_235] : memref<5x9x16x16xf32, #tpu.memory_space<vmem>>, vector<1x1x16x16xf32>
    %215 = vector.shape_cast %214 : vector<1x1x16x16xf32> to vector<16x16xf32>
    %c0_236 = arith.constant 0 : index
    %c18_237 = arith.constant 18 : index
    %216 = vector.load %arg6[%c0_236, %c18_237] : memref<16x512xf32, #tpu.memory_space<vmem>>, vector<16x384xf32>
    %cst_238 = arith.constant dense<0.000000e+00> : vector<16x384xf32>
    %217 = tpu.matmul %215, %216, %cst_238 {dimension_numbers = #tpu.dot_dimension_numbers<[1], [0], [0], [1], [0, 0, 1, 1], [], []>} : vector<16x16xf32>, vector<16x384xf32>, vector<16x384xf32> -> vector<16x384xf32>
    %218 = arith.addf %213, %217 : vector<16x384xf32>
    %c3_239 = arith.constant 3 : index
    %c4_240 = arith.constant 4 : index
    %c0_241 = arith.constant 0 : index
    %c0_242 = arith.constant 0 : index
    %219 = vector.load %arg2[%c3_239, %c4_240, %c0_241, %c0_242] : memref<5x9x16x16xf32, #tpu.memory_space<vmem>>, vector<1x1x16x16xf32>
    %220 = vector.shape_cast %219 : vector<1x1x16x16xf32> to vector<16x16xf32>
    %c0_243 = arith.constant 0 : index
    %c19_244 = arith.constant 19 : index
    %221 = vector.load %arg6[%c0_243, %c19_244] : memref<16x512xf32, #tpu.memory_space<vmem>>, vector<16x384xf32>
    %cst_245 = arith.constant dense<0.000000e+00> : vector<16x384xf32>
    %222 = tpu.matmul %220, %221, %cst_245 {dimension_numbers = #tpu.dot_dimension_numbers<[1], [0], [0], [1], [0, 0, 1, 1], [], []>} : vector<16x16xf32>, vector<16x384xf32>, vector<16x384xf32> -> vector<16x384xf32>
    %223 = arith.addf %218, %222 : vector<16x384xf32>
    %c3_246 = arith.constant 3 : index
    %c5_247 = arith.constant 5 : index
    %c0_248 = arith.constant 0 : index
    %c0_249 = arith.constant 0 : index
    %224 = vector.load %arg2[%c3_246, %c5_247, %c0_248, %c0_249] : memref<5x9x16x16xf32, #tpu.memory_space<vmem>>, vector<1x1x16x16xf32>
    %225 = vector.shape_cast %224 : vector<1x1x16x16xf32> to vector<16x16xf32>
    %c0_250 = arith.constant 0 : index
    %c20_251 = arith.constant 20 : index
    %226 = vector.load %arg6[%c0_250, %c20_251] : memref<16x512xf32, #tpu.memory_space<vmem>>, vector<16x384xf32>
    %cst_252 = arith.constant dense<0.000000e+00> : vector<16x384xf32>
    %227 = tpu.matmul %225, %226, %cst_252 {dimension_numbers = #tpu.dot_dimension_numbers<[1], [0], [0], [1], [0, 0, 1, 1], [], []>} : vector<16x16xf32>, vector<16x384xf32>, vector<16x384xf32> -> vector<16x384xf32>
    %228 = arith.addf %223, %227 : vector<16x384xf32>
    %c3_253 = arith.constant 3 : index
    %c6_254 = arith.constant 6 : index
    %c0_255 = arith.constant 0 : index
    %c0_256 = arith.constant 0 : index
    %229 = vector.load %arg2[%c3_253, %c6_254, %c0_255, %c0_256] : memref<5x9x16x16xf32, #tpu.memory_space<vmem>>, vector<1x1x16x16xf32>
    %230 = vector.shape_cast %229 : vector<1x1x16x16xf32> to vector<16x16xf32>
    %c0_257 = arith.constant 0 : index
    %c36_258 = arith.constant 36 : index
    %231 = vector.load %arg6[%c0_257, %c36_258] : memref<16x512xf32, #tpu.memory_space<vmem>>, vector<16x384xf32>
    %cst_259 = arith.constant dense<0.000000e+00> : vector<16x384xf32>
    %232 = tpu.matmul %230, %231, %cst_259 {dimension_numbers = #tpu.dot_dimension_numbers<[1], [0], [0], [1], [0, 0, 1, 1], [], []>} : vector<16x16xf32>, vector<16x384xf32>, vector<16x384xf32> -> vector<16x384xf32>
    %233 = arith.addf %228, %232 : vector<16x384xf32>
    %c3_260 = arith.constant 3 : index
    %c7_261 = arith.constant 7 : index
    %c0_262 = arith.constant 0 : index
    %c0_263 = arith.constant 0 : index
    %234 = vector.load %arg2[%c3_260, %c7_261, %c0_262, %c0_263] : memref<5x9x16x16xf32, #tpu.memory_space<vmem>>, vector<1x1x16x16xf32>
    %235 = vector.shape_cast %234 : vector<1x1x16x16xf32> to vector<16x16xf32>
    %c0_264 = arith.constant 0 : index
    %c37_265 = arith.constant 37 : index
    %236 = vector.load %arg6[%c0_264, %c37_265] : memref<16x512xf32, #tpu.memory_space<vmem>>, vector<16x384xf32>
    %cst_266 = arith.constant dense<0.000000e+00> : vector<16x384xf32>
    %237 = tpu.matmul %235, %236, %cst_266 {dimension_numbers = #tpu.dot_dimension_numbers<[1], [0], [0], [1], [0, 0, 1, 1], [], []>} : vector<16x16xf32>, vector<16x384xf32>, vector<16x384xf32> -> vector<16x384xf32>
    %238 = arith.addf %233, %237 : vector<16x384xf32>
    %c3_267 = arith.constant 3 : index
    %c8_268 = arith.constant 8 : index
    %c0_269 = arith.constant 0 : index
    %c0_270 = arith.constant 0 : index
    %239 = vector.load %arg2[%c3_267, %c8_268, %c0_269, %c0_270] : memref<5x9x16x16xf32, #tpu.memory_space<vmem>>, vector<1x1x16x16xf32>
    %240 = vector.shape_cast %239 : vector<1x1x16x16xf32> to vector<16x16xf32>
    %c0_271 = arith.constant 0 : index
    %c38_272 = arith.constant 38 : index
    %241 = vector.load %arg6[%c0_271, %c38_272] : memref<16x512xf32, #tpu.memory_space<vmem>>, vector<16x384xf32>
    %cst_273 = arith.constant dense<0.000000e+00> : vector<16x384xf32>
    %242 = tpu.matmul %240, %241, %cst_273 {dimension_numbers = #tpu.dot_dimension_numbers<[1], [0], [0], [1], [0, 0, 1, 1], [], []>} : vector<16x16xf32>, vector<16x384xf32>, vector<16x384xf32> -> vector<16x384xf32>
    %243 = arith.addf %238, %242 : vector<16x384xf32>
    %c3_274 = arith.constant 3 : index
    %c0_275 = arith.constant 0 : index
    %c0_276 = arith.constant 0 : index
    %244 = vector.load %arg3[%c3_274, %c0_275, %c0_276] : memref<5x16x1xf32, #tpu.memory_space<vmem>>, vector<1x16x1xf32>
    %245 = vector.shape_cast %244 : vector<1x16x1xf32> to vector<16x1xf32>
    %246 = vector.broadcast %245 : vector<16x1xf32> to vector<16x384xf32>
    %247 = arith.addf %243, %246 : vector<16x384xf32>
    %cst_277 = arith.constant 0.000000e+00 : f32
    %248 = vector.broadcast %cst_277 : f32 to vector<16x384xf32>
    %249 = arith.maximumf %247, %248 : vector<16x384xf32>
    %cst_278 = arith.constant 0.000000e+00 : f32
    %250 = vector.shape_cast %30 : vector<1x384xi1> to vector<1x384xi1>
    %251 = vector.broadcast %250 : vector<1x384xi1> to vector<16x384xi1>
    %252 = vector.broadcast %cst_278 : f32 to vector<16x384xf32>
    %253 = arith.select %251, %249, %252 : vector<16x384xi1>, vector<16x384xf32>
    %c0_279 = arith.constant 0 : index
    %c19_280 = arith.constant 19 : index
    %254 = vector.load %arg5[%c0_279, %c19_280] : memref<16x512xf32, #tpu.memory_space<vmem>>, vector<16x384xf32>
    tpu.vector_store %arg5[%c0_279, %c19_280], %253 {strides = array<i32>} : memref<16x512xf32, #tpu.memory_space<vmem>>, vector<16x384xf32>,
    %cst_281 = arith.constant 0.000000e+00 : f32
    %255 = vector.broadcast %cst_281 : f32 to vector<16x384xf32>
    %c4_282 = arith.constant 4 : index
    %c0_283 = arith.constant 0 : index
    %c0_284 = arith.constant 0 : index
    %c0_285 = arith.constant 0 : index
    %256 = vector.load %arg2[%c4_282, %c0_283, %c0_284, %c0_285] : memref<5x9x16x16xf32, #tpu.memory_space<vmem>>, vector<1x1x16x16xf32>
    %257 = vector.shape_cast %256 : vector<1x1x16x16xf32> to vector<16x16xf32>
    %c0_286 = arith.constant 0 : index
    %c0_287 = arith.constant 0 : index
    %258 = vector.load %arg5[%c0_286, %c0_287] : memref<16x512xf32, #tpu.memory_space<vmem>>, vector<16x384xf32>
    %cst_288 = arith.constant dense<0.000000e+00> : vector<16x384xf32>
    %259 = tpu.matmul %257, %258, %cst_288 {dimension_numbers = #tpu.dot_dimension_numbers<[1], [0], [0], [1], [0, 0, 1, 1], [], []>} : vector<16x16xf32>, vector<16x384xf32>, vector<16x384xf32> -> vector<16x384xf32>
    %260 = arith.addf %255, %259 : vector<16x384xf32>
    %c4_289 = arith.constant 4 : index
    %c1_290 = arith.constant 1 : index
    %c0_291 = arith.constant 0 : index
    %c0_292 = arith.constant 0 : index
    %261 = vector.load %arg2[%c4_289, %c1_290, %c0_291, %c0_292] : memref<5x9x16x16xf32, #tpu.memory_space<vmem>>, vector<1x1x16x16xf32>
    %262 = vector.shape_cast %261 : vector<1x1x16x16xf32> to vector<16x16xf32>
    %c0_293 = arith.constant 0 : index
    %c1_294 = arith.constant 1 : index
    %263 = vector.load %arg5[%c0_293, %c1_294] : memref<16x512xf32, #tpu.memory_space<vmem>>, vector<16x384xf32>
    %cst_295 = arith.constant dense<0.000000e+00> : vector<16x384xf32>
    %264 = tpu.matmul %262, %263, %cst_295 {dimension_numbers = #tpu.dot_dimension_numbers<[1], [0], [0], [1], [0, 0, 1, 1], [], []>} : vector<16x16xf32>, vector<16x384xf32>, vector<16x384xf32> -> vector<16x384xf32>
    %265 = arith.addf %260, %264 : vector<16x384xf32>
    %c4_296 = arith.constant 4 : index
    %c2_297 = arith.constant 2 : index
    %c0_298 = arith.constant 0 : index
    %c0_299 = arith.constant 0 : index
    %266 = vector.load %arg2[%c4_296, %c2_297, %c0_298, %c0_299] : memref<5x9x16x16xf32, #tpu.memory_space<vmem>>, vector<1x1x16x16xf32>
    %267 = vector.shape_cast %266 : vector<1x1x16x16xf32> to vector<16x16xf32>
    %c0_300 = arith.constant 0 : index
    %c2_301 = arith.constant 2 : index
    %268 = vector.load %arg5[%c0_300, %c2_301] : memref<16x512xf32, #tpu.memory_space<vmem>>, vector<16x384xf32>
    %cst_302 = arith.constant dense<0.000000e+00> : vector<16x384xf32>
    %269 = tpu.matmul %267, %268, %cst_302 {dimension_numbers = #tpu.dot_dimension_numbers<[1], [0], [0], [1], [0, 0, 1, 1], [], []>} : vector<16x16xf32>, vector<16x384xf32>, vector<16x384xf32> -> vector<16x384xf32>
    %270 = arith.addf %265, %269 : vector<16x384xf32>
    %c4_303 = arith.constant 4 : index
    %c3_304 = arith.constant 3 : index
    %c0_305 = arith.constant 0 : index
    %c0_306 = arith.constant 0 : index
    %271 = vector.load %arg2[%c4_303, %c3_304, %c0_305, %c0_306] : memref<5x9x16x16xf32, #tpu.memory_space<vmem>>, vector<1x1x16x16xf32>
    %272 = vector.shape_cast %271 : vector<1x1x16x16xf32> to vector<16x16xf32>
    %c0_307 = arith.constant 0 : index
    %c18_308 = arith.constant 18 : index
    %273 = vector.load %arg5[%c0_307, %c18_308] : memref<16x512xf32, #tpu.memory_space<vmem>>, vector<16x384xf32>
    %cst_309 = arith.constant dense<0.000000e+00> : vector<16x384xf32>
    %274 = tpu.matmul %272, %273, %cst_309 {dimension_numbers = #tpu.dot_dimension_numbers<[1], [0], [0], [1], [0, 0, 1, 1], [], []>} : vector<16x16xf32>, vector<16x384xf32>, vector<16x384xf32> -> vector<16x384xf32>
    %275 = arith.addf %270, %274 : vector<16x384xf32>
    %c4_310 = arith.constant 4 : index
    %c4_311 = arith.constant 4 : index
    %c0_312 = arith.constant 0 : index
    %c0_313 = arith.constant 0 : index
    %276 = vector.load %arg2[%c4_310, %c4_311, %c0_312, %c0_313] : memref<5x9x16x16xf32, #tpu.memory_space<vmem>>, vector<1x1x16x16xf32>
    %277 = vector.shape_cast %276 : vector<1x1x16x16xf32> to vector<16x16xf32>
    %c0_314 = arith.constant 0 : index
    %c19_315 = arith.constant 19 : index
    %278 = vector.load %arg5[%c0_314, %c19_315] : memref<16x512xf32, #tpu.memory_space<vmem>>, vector<16x384xf32>
    %cst_316 = arith.constant dense<0.000000e+00> : vector<16x384xf32>
    %279 = tpu.matmul %277, %278, %cst_316 {dimension_numbers = #tpu.dot_dimension_numbers<[1], [0], [0], [1], [0, 0, 1, 1], [], []>} : vector<16x16xf32>, vector<16x384xf32>, vector<16x384xf32> -> vector<16x384xf32>
    %280 = arith.addf %275, %279 : vector<16x384xf32>
    %c4_317 = arith.constant 4 : index
    %c5_318 = arith.constant 5 : index
    %c0_319 = arith.constant 0 : index
    %c0_320 = arith.constant 0 : index
    %281 = vector.load %arg2[%c4_317, %c5_318, %c0_319, %c0_320] : memref<5x9x16x16xf32, #tpu.memory_space<vmem>>, vector<1x1x16x16xf32>
    %282 = vector.shape_cast %281 : vector<1x1x16x16xf32> to vector<16x16xf32>
    %c0_321 = arith.constant 0 : index
    %c20_322 = arith.constant 20 : index
    %283 = vector.load %arg5[%c0_321, %c20_322] : memref<16x512xf32, #tpu.memory_space<vmem>>, vector<16x384xf32>
    %cst_323 = arith.constant dense<0.000000e+00> : vector<16x384xf32>
    %284 = tpu.matmul %282, %283, %cst_323 {dimension_numbers = #tpu.dot_dimension_numbers<[1], [0], [0], [1], [0, 0, 1, 1], [], []>} : vector<16x16xf32>, vector<16x384xf32>, vector<16x384xf32> -> vector<16x384xf32>
    %285 = arith.addf %280, %284 : vector<16x384xf32>
    %c4_324 = arith.constant 4 : index
    %c6_325 = arith.constant 6 : index
    %c0_326 = arith.constant 0 : index
    %c0_327 = arith.constant 0 : index
    %286 = vector.load %arg2[%c4_324, %c6_325, %c0_326, %c0_327] : memref<5x9x16x16xf32, #tpu.memory_space<vmem>>, vector<1x1x16x16xf32>
    %287 = vector.shape_cast %286 : vector<1x1x16x16xf32> to vector<16x16xf32>
    %c0_328 = arith.constant 0 : index
    %c36_329 = arith.constant 36 : index
    %288 = vector.load %arg5[%c0_328, %c36_329] : memref<16x512xf32, #tpu.memory_space<vmem>>, vector<16x384xf32>
    %cst_330 = arith.constant dense<0.000000e+00> : vector<16x384xf32>
    %289 = tpu.matmul %287, %288, %cst_330 {dimension_numbers = #tpu.dot_dimension_numbers<[1], [0], [0], [1], [0, 0, 1, 1], [], []>} : vector<16x16xf32>, vector<16x384xf32>, vector<16x384xf32> -> vector<16x384xf32>
    %290 = arith.addf %285, %289 : vector<16x384xf32>
    %c4_331 = arith.constant 4 : index
    %c7_332 = arith.constant 7 : index
    %c0_333 = arith.constant 0 : index
    %c0_334 = arith.constant 0 : index
    %291 = vector.load %arg2[%c4_331, %c7_332, %c0_333, %c0_334] : memref<5x9x16x16xf32, #tpu.memory_space<vmem>>, vector<1x1x16x16xf32>
    %292 = vector.shape_cast %291 : vector<1x1x16x16xf32> to vector<16x16xf32>
    %c0_335 = arith.constant 0 : index
    %c37_336 = arith.constant 37 : index
    %293 = vector.load %arg5[%c0_335, %c37_336] : memref<16x512xf32, #tpu.memory_space<vmem>>, vector<16x384xf32>
    %cst_337 = arith.constant dense<0.000000e+00> : vector<16x384xf32>
    %294 = tpu.matmul %292, %293, %cst_337 {dimension_numbers = #tpu.dot_dimension_numbers<[1], [0], [0], [1], [0, 0, 1, 1], [], []>} : vector<16x16xf32>, vector<16x384xf32>, vector<16x384xf32> -> vector<16x384xf32>
    %295 = arith.addf %290, %294 : vector<16x384xf32>
    %c4_338 = arith.constant 4 : index
    %c8_339 = arith.constant 8 : index
    %c0_340 = arith.constant 0 : index
    %c0_341 = arith.constant 0 : index
    %296 = vector.load %arg2[%c4_338, %c8_339, %c0_340, %c0_341] : memref<5x9x16x16xf32, #tpu.memory_space<vmem>>, vector<1x1x16x16xf32>
    %297 = vector.shape_cast %296 : vector<1x1x16x16xf32> to vector<16x16xf32>
    %c0_342 = arith.constant 0 : index
    %c38_343 = arith.constant 38 : index
    %298 = vector.load %arg5[%c0_342, %c38_343] : memref<16x512xf32, #tpu.memory_space<vmem>>, vector<16x384xf32>
    %cst_344 = arith.constant dense<0.000000e+00> : vector<16x384xf32>
    %299 = tpu.matmul %297, %298, %cst_344 {dimension_numbers = #tpu.dot_dimension_numbers<[1], [0], [0], [1], [0, 0, 1, 1], [], []>} : vector<16x16xf32>, vector<16x384xf32>, vector<16x384xf32> -> vector<16x384xf32>
    %300 = arith.addf %295, %299 : vector<16x384xf32>
    %c0_345 = arith.constant 0 : index
    %c0_346 = arith.constant 0 : index
    %c19_347 = arith.constant 19 : index
    %301 = vector.load %arg1[%c0_345, %c0_346, %c19_347] : memref<1x1x512xf32, #tpu.memory_space<vmem>>, vector<1x1x384xf32>
    %302 = vector.shape_cast %301 : vector<1x1x384xf32> to vector<1x384xf32>
    %303 = vector.extract_strided_slice %300 {offsets = [0, 0], sizes = [1, 384], strides = [1, 1]} : vector<16x384xf32> to vector<1x384xf32>
    %304 = arith.subf %302, %303 : vector<1x384xf32>
    %c0_348 = arith.constant 0 : index
    %c0_349 = arith.constant 0 : index
    %c0_350 = arith.constant 0 : index
    %305 = vector.load %arg4[%c0_348, %c0_349, %c0_350] : memref<1x1x384xf32, #tpu.memory_space<vmem>>, vector<1x1x384xf32>
    %306 = vector.shape_cast %305 : vector<1x1x384xf32> to vector<1x384xf32>
    %307 = vector.shape_cast %304 : vector<1x384xf32> to vector<1x1x384xf32>
    tpu.vector_store %arg4[%c0_348, %c0_349, %c0_350], %307 {strides = array<i32>} : memref<1x1x384xf32, #tpu.memory_space<vmem>>, vector<1x1x384xf32>,
    return
  }
  func.func @transform_0(%arg0: i32) -> (i32, i32, i32) {
    %c0_i32 = arith.constant 0 : i32
    %c0_i32_0 = arith.constant 0 : i32
    %c0_i32_1 = arith.constant 0 : i32
    return %arg0, %c0_i32, %c0_i32_0 : i32, i32, i32
  }
  func.func @transform_1(%arg0: i32) -> (i32, i32, i32, i32) {
    %c0_i32 = arith.constant 0 : i32
    %c0_i32_0 = arith.constant 0 : i32
    %c0_i32_1 = arith.constant 0 : i32
    %c0_i32_2 = arith.constant 0 : i32
    %c0_i32_3 = arith.constant 0 : i32
    return %c0_i32, %c0_i32_0, %c0_i32_1, %c0_i32_2 : i32, i32, i32, i32
  }
  func.func @transform_2(%arg0: i32) -> (i32, i32, i32) {
    %c0_i32 = arith.constant 0 : i32
    %c0_i32_0 = arith.constant 0 : i32
    %c0_i32_1 = arith.constant 0 : i32
    %c0_i32_2 = arith.constant 0 : i32
    return %c0_i32, %c0_i32_0, %c0_i32_1 : i32, i32, i32
  }
  func.func @transform_3(%arg0: i32) -> (i32, i32, i32) {
    %c0_i32 = arith.constant 0 : i32
    %c0_i32_0 = arith.constant 0 : i32
    %c0_i32_1 = arith.constant 0 : i32
    return %arg0, %c0_i32, %c0_i32_0 : i32, i32, i32
  }
}

</mosaic_0001>

<bundles_post_ra>
// kernel: dncnn_forward.1
= control target key start
LH: loop header
LB: loop body
LE: loop exit
PB: predicated region body
PF: predicated region fallthrough
CT: control target
= control target key end

     0   :  { %8 = vsyncpa [#allocation5], 0  ;;  %s6782_s12 = smov 0   ;;  %s8156_s0 = inlined_call_operand.vmem [shape: f32[2,1,512], index: 0, kind: input, shape index: {}]   ;;  %s8157_s1 = inlined_call_operand.hbm [shape: f32[5,9,16,16], index: 1, kind: input, shape index: {}]   ;;  %s8158_s2 = inlined_call_operand.vmem [shape: f32[5,16,1], index: 2, kind: input, shape index: {}]   ;;  %s8159_s3 = inlined_call_operand.vmem [shape: f32[2,1,384], index: 3, kind: output, shape index: {}]  }
   0x1 LB: > { %s124_s15 = sshll.u32 %s8157_s1, 4  ;;  %s5582_s16 = sadd.s32 4294967295, %s6746_s12   ;;  %s6746_s12 = sphi %s6782_s12, %s14_s12   ;;  %s125_s15 = int_to_ptr.hbm [resolvable:$true] %s124_s15 }
   0x2   : > { %p5584_p0 = scmp.ge.s32.totalorder %s6746_s12, 1  ;;  %p113_p1 = scmp.lt.s32.totalorder %s6746_s12, 3 }
   0x3   : > { %p5879_p2 = scmp.eq.s32.totalorder %s5582_s16, 0  ;;  %s6748_s17 = smov [#allocation4]  }
   0x4   : > { %p114_p3 = pnand %p5584_p0, %p113_p1  ;;  %s126_s18 = sshll.u32 %s6748_s17, 4  ;;  %s127_s18 = int_to_ptr.vmem [resolvable:$true] %s126_s18 }
   0x5   : > { %s6749_s19 = smov 128   ;;  %s6750_s20 = smov 8  }
   0x6   : > { %p5875_p4 = pneg %p114_p3  ;;  %152 = sbr.rel (%p114_p3) target bundleno = 2565 (0xa05), region = 32 }
   0x8   : > { %p5876_p5 = pnand %p5879_p2, %p5875_p4 }
   0xa   : > { %5878 = dma.hbm_to_vmem [thread:$0]  (!%p5876_p5), %s125_s15, 11520, %s127_s18, [#allocation5], %s6749_s19, %s6749_s19, %s6750_s20  }
   0xb   : > { %6741 = dma.done.wait (%p5879_p2), [#allocation5], 11520  }
   0xc   : > { %6743 = vsyncadd (%p5879_p2), [#allocation5], 4294955776  ;;  %p175_p6 = scmp.lt.s32.totalorder %s5582_s16, 1  ;;  %v8161_v0 = vmov 0.0   ;;  %v8160_v1 = vlaneseq  ;;  %s6752_s21 = smov 127   ;;  %vm362_vm1 = vcmask 1039360  }
   0xd   : > { %190 = vst [vmem:[#allocation2] sm:$0xfe] %v8161_v0  ;;  %5904 = vrot.lane.b32.xlu0 %v8161_v0, %s6752_s21  ;;  %s6753_s22 = smov 126   ;;  %s6754_s27 = smov 110   ;;  %vm375_vm2 = vcmask 130048   ;;  %v328_v29 = vld [vmem:[#allocation4 + $0x10] sm:$0xff] }
   0xe   : > { %191 = vst [vmem:[#allocation2 + $0x8] sm:$0xfe] %v8161_v0  ;;  %s8258_s16 = smov (!%p175_p6, %s5582_s16), 1  ;;  %5924 = vrot.lane.b32.xlu2 %v8161_v0, %s6753_s22  ;;  %vm186_vm0 = vcmp.lt.s32.totalorder %v8160_v1, 512  ;;  %s6755_s28 = smov 109   ;;  %vm545_vm3 = vcmask 1031168  }
   0xf   : > { %192 = vst [vmem:[#allocation2 + $0x10] sm:$0xfe] %v8161_v0  ;;  %s5589_s23 = sshll.u32 %s8258_s16, 2  ;;  %s6756_s29 = smov 108   ;;  %vm658_vm4 = vcmask 900096   ;;  %v329_v45 = vld [vmem:[#allocation4 + $0x18] sm:$0xff] }
  0x10   : > { %193 = vst [vmem:[#allocation2 + $0x18] sm:$0xfe] %v8161_v0  ;;  %s6808_s26 = scalar_lea.vmem %s8156_s0, %s5589_s23  ;;  %s6757_s30 = smov 92   ;;  %v319_v58 = vld [vmem:[#allocation4] sm:$0xff]  ;;  %vm771_vm5 = vcmask 891904   ;;  %vm8170_vm6 = vcmask 883712  }
  0x11   : > { %194 = vst [vmem:[#allocation2 + $0x20] sm:$0xff] %v8161_v0  ;;  %v183_v2 = vld [vmem:[%s6808_s26] sm:$0xf]  ;;  %s6758_s4 = smov 91   ;;  %s6759_s5 = smov 90   ;;  %vm8165_vm7 = vcmask 752640  }
  0x12   : > { %197 = vst [vmem:[#allocation2 + $0x38] sm:$0xff] %v8161_v0  ;;  %v527_v63 = vld [vmem:[#allocation4 + $0x20] sm:$0xff]  ;;  %vm8164_vm8 = vcmask 744448   ;;  %vm8163_vm9 = vcmask 736256   ;;  %s6761_s6 = smov 19  }
  0x13   : > { %188 = vst.msk [vmem:[#allocation2] ss:$8 sm:$0xf] %vm186_vm0, %v183_v2  ;;  %vm198_vm0 = vcmask 154624  }
  0x1a   : > { %v6813_v3 = vld [vmem:[#allocation2 + $0x10] sm:$0xff]  ;;  %v333_v4 = vld [vmem:[#allocation2 + $0x18] sm:$0xff]  ;;  %v6815_v5 = vld [vmem:[#allocation2 + $0x8] sm:$0xff] }
  0x1b   : > { %v5913_v6 = vpack.i.bf16 %v333_v4, %v6813_v3  ;;  %v5908_v7 = vpack.i.bf16 %v6815_v5, %v8161_v0  ;;  %v6820_v8 = vld [vmem:[#allocation2] sm:$0xff]  ;;  %v5938_v11 = vpack.i.bf16 %v6813_v3, %v8161_v0  ;;  %v5943_v12 = vpack.i.bf16 %v333_v4, %v8161_v0 }
  0x1c   : > { %v5928_v9 = vpack.i.bf16 %v6815_v5, %v6820_v8  ;;  %v5918_v10 = vpack.i.bf16 %v6820_v8, %v8161_v0  ;;  %v5953_v13 = vpack.i.bf16 %v6813_v3, %v6815_v5 }
  0x1d   : > { %5914 = vrot.lane.b32.xlu1 %v5913_v6, %s6752_s21  ;;  %5909 = vrot.lane.b32.xlu0 %v5908_v7, %s6752_s21 }
  0x1e   : > { %5929 = vrot.lane.b32.xlu2 %v5928_v9, %s6753_s22 }
  0x25   : > { %5919 = vrot.lane.b32.xlu1 %v5918_v10, %s6752_s21  ;;  %5939 = vrot.lane.b32.xlu0 %v5938_v11, %s6753_s22 }
  0x26   : > { %5934 = vrot.lane.b32.xlu2 %v8161_v0, %s6754_s27 }
  0x2d   : > { %5944 = vrot.lane.b32.xlu1 %v5943_v12, %s6753_s22  ;;  %5949 = vrot.lane.b32.xlu0 %v5918_v10, %s6754_s27 }
  0x2e   : > { %5959 = vrot.lane.b32.xlu2 %v5943_v12, %s6754_s27 }
  0x35   : > { %5954 = vrot.lane.b32.xlu1 %v5953_v13, %s6754_s27  ;;  %5964 = vrot.lane.b32.xlu0 %v8161_v0, %s6755_s28 }
  0x36   : > { %5974 = vrot.lane.b32.xlu2 %v5928_v9, %s6755_s28 }
  0x3d   : > { %5969 = vrot.lane.b32.xlu1 %v8161_v0, %s6755_s28  ;;  %5979 = vrot.lane.b32.xlu0 %v5913_v6, %s6755_s28 }
  0x3e   : > { %5989 = vrot.lane.b32.xlu2 %v5928_v9, %s6756_s29 }
  0x45   : > { %5984 = vrot.lane.b32.xlu1 %v8161_v0, %s6756_s29  ;;  %5994 = vrot.lane.b32.xlu0 %v8161_v0, %s6756_s29 }
  0x46   : > { %6004 = vrot.lane.b32.xlu2 %v5913_v6, %s6756_s29 }
  0x4d   : > { %5999 = vrot.lane.b32.xlu1 %v8161_v0, %s6757_s30  ;;  %6009 = vrot.lane.b32.xlu0 %v5928_v9, %s6757_s30 }
  0x4e   : > { %6019 = vrot.lane.b32.xlu2 %v5943_v12, %s6757_s30 }
  0x55   : > { %6014 = vrot.lane.b32.xlu1 %v5938_v11, %s6757_s30  ;;  %6024 = vrot.lane.b32.xlu0 %v8161_v0, %s6758_s4 }
  0x56   : > { %6034 = vrot.lane.b32.xlu2 %v5953_v13, %s6758_s4 }
  0x5d   : > { %6039 = vrot.lane.b32.xlu0 %v5943_v12, %s6758_s4  ;;  %6029 = vrot.lane.b32.xlu1 %v5918_v10, %s6758_s4  ;;  %v320_v12 = vld [vmem:[#allocation4 + $0x8] sm:$0xff] }
  0x5e   : > { %6049 = vrot.lane.b32.xlu2 %v8161_v0, %s6759_s5 }
  0x65   : > { %6044 = vrot.lane.b32.xlu1 %v8161_v0, %s6759_s5  ;;  %6054 = vrot.lane.b32.xlu0 %v5928_v9, %s6759_s5 }
  0x68   : > { %v6870_v14 = vpop.permute.xlu2 %5924 }
  0x69   : > { %v5927_v23 = vunpack.i.h.bf16 %v6870_v14  ;;  %v5926_v24 = vunpack.i.l.bf16 %v6870_v14 }
  0x6b   : > { %v549_v37 = vsel %vm545_vm3, %v5926_v24, %v5927_v23 }
  0x6d   : > { %6059 = vrot.lane.b32.xlu1 %v5913_v6, %s6759_s5 }
  0x78   : > { %v6872_v18 = vpop.permute.xlu2 %5929 }
  0x79   : > { %v5932_v30 = vunpack.i.h.bf16 %v6872_v18  ;;  %v5931_v35 = vunpack.i.l.bf16 %v6872_v18 }
  0x7b   : > { %v546_v39 = vsel %vm545_vm3, %v5931_v35, %v5932_v30 }
  0x7f   : > { %v5905_v15 = vpop.permute.xlu0 %5904 }
  0x80   : > { %v5907_v16 = vunpack.i.h.bf16 %v5905_v15  ;;  %v5906_v17 = vunpack.i.l.bf16 %v5905_v15  ;;  %v6875_v20 = vpop.permute.xlu2 %5934 }
  0x81   : > { %v5937_v31 = vunpack.i.h.bf16 %v6875_v20  ;;  %v5936_v32 = vunpack.i.l.bf16 %v6875_v20 }
  0x82   : > { %v367_v19 = vsel %vm362_vm1, %v5906_v17, %v5907_v16 }
  0x83   : > { %419 = vmatpush.msra.mxu1 %v367_v19  ;;  %v662_v38 = vsel %vm658_vm4, %v5936_v32, %v5937_v31  ;;  %v528_v19 = vld [vmem:[#allocation4 + $0x28] sm:$0xff] }
  0x88   : > { %v6892_v40 = vpop.permute.xlu2 %5959 }
  0x89   : > { %v5961_v56 = vunpack.i.l.bf16 %v6892_v40  ;;  %v5962_v4 = vunpack.i.h.bf16 %v6892_v40 }
  0x8f   : > { %v5915_v21 = vpop.permute.xlu1 %5914  ;;  %v5910_v22 = vpop.permute.xlu0 %5909 }
  0x90   : > { %v5917_v25 = vunpack.i.h.bf16 %v5915_v21  ;;  %v5916_v26 = vunpack.i.l.bf16 %v5915_v21  ;;  %v5912_v27 = vunpack.i.h.bf16 %v5910_v22  ;;  %v5911_v28 = vunpack.i.l.bf16 %v5910_v22  ;;  %v6900_v50 = vpop.permute.xlu2 %5974 }
  0x91   : > { %v5976_v7 = vunpack.i.l.bf16 %v6900_v50  ;;  %v5977_v13 = vunpack.i.h.bf16 %v6900_v50 }
  0x92   : > { %v364_v33 = vsel %vm362_vm1, %v5912_v27, %v5916_v26  ;;  %v368_v34 = vsel %vm362_vm1, %v5907_v16, %v5911_v28  ;;  %v365_v36 = vsel %vm362_vm1, %v5916_v26, %v5917_v25 }
  0x93   : > { %420 = vmatpush.msra.mxu1 %v364_v33  ;;  %442 = vmatpush.msra.mxu2 %v368_v34  ;;  %v772_v20 = vsel %vm771_vm5, %v5976_v7, %v5977_v13  ;;  %v754_v7 = vld [vmem:[#allocation4 + $0x48] sm:$0xff] }
  0x94   : > { %5592 = vmatmul.msk.f32.vlgmr.msra.gmra.mxu1 %vm375_vm2, %v328_v29 }
  0x95   : > { %443 = vmatpush.msra.mxu2 %v365_v36  ;;  %517 = vmatpush.msrb.mxu1 %v8161_v0 }
  0x96   : > { %5594 = vmatmul.msk.f32.vlgmr.msra.gmra.mxu2 %vm375_vm2, %v328_v29 }
  0x97   : > { %v5920_v41 = vpop.permute.xlu1 %5919  ;;  %v5940_v42 = vpop.permute.xlu0 %5939  ;;  %578 = vmatpush.msrb.mxu2 %v549_v37  ;;  %518 = vmatpush.msrb.mxu1 %v6813_v3 }
  0x98   : > { %v5922_v43 = vunpack.i.h.bf16 %v5920_v41  ;;  %v5921_v44 = vunpack.i.l.bf16 %v5920_v41  ;;  %v5942_v48 = vunpack.i.h.bf16 %v5940_v42  ;;  %v5941_v49 = vunpack.i.l.bf16 %v5940_v42  ;;  %v5990_v14 = vpop.permute.xlu2 %5989  ;;  %v641_v42 = vld [vmem:[#allocation4 + $0x38] sm:$0xff] }
  0x99   : > { %691 = vmatpush.msra.mxu1 %v662_v38  ;;  %579 = vmatpush.msrb.mxu2 %v546_v39  ;;  %v5992_v33 = vunpack.i.h.bf16 %v5990_v14  ;;  %v5991_v34 = vunpack.i.l.bf16 %v5990_v14 }
  0x9a   : > { %v366_v46 = vsel %vm362_vm1, %v5921_v44, %v5906_v17  ;;  %v363_v47 = vsel %vm362_vm1, %v5922_v43, %v5912_v27  ;;  %v550_v57 = vsel %vm545_vm3, %v5927_v23, %v5941_v49  ;;  %v547_v59 = vsel %vm545_vm3, %v5932_v30, %v5942_v48  ;;  %v640_v27 = vld [vmem:[#allocation4 + $0x30] sm:$0xff] }
  0x9b   : > { %396 = vmatpush.msra.mxu0 %v366_v46  ;;  %5868 = vmatpush.msra.mxu3 %v366_v46  ;;  %v885_v46 = vsel %vm8170_vm6, %v5991_v34, %v5992_v33 }
  0x9c   : > { %5593 = vmatmul.msk.f32.gmra.mxu1 %vm375_vm2, %v329_v45 }
  0x9d   : > { %397 = vmatpush.msra.mxu0 %v363_v47  ;;  %5869 = vmatpush.msra.mxu3 %v363_v47 }
  0x9e   : > { %5590 = vmatmul.msk.f32.vlgmr.msra.gmra.mxu0 %vm375_vm2, %v328_v29  ;;  %5591 = vmatmul.msk.f32.vlgmr.msra.gmra.mxu3 %vm375_vm2, %v329_v45 }
  0x9f   : > { %471 = vmatpush.msrb.mxu3 %v8161_v0  ;;  %5595 = vmatmul.msk.f32.gmra.mxu2 %vm375_vm2, %v329_v45  ;;  %v5945_v51 = vpop.permute.xlu1 %5944  ;;  %v5950_v52 = vpop.permute.xlu0 %5949 }
  0xa0   : > { %494 = vmatpush.msrb.mxu0 %v8161_v0  ;;  %v5947_v53 = vunpack.i.h.bf16 %v5945_v51  ;;  %v5946_v54 = vunpack.i.l.bf16 %v5945_v51  ;;  %v5951_v55 = vunpack.i.l.bf16 %v5950_v52  ;;  %v5952_v3 = vunpack.i.h.bf16 %v5950_v52  ;;  %v6005_v32 = vpop.permute.xlu2 %6004 }
  0xa1   : > { %472 = vmatpush.msrb.mxu3 %v6820_v8  ;;  %v6006_v35 = vunpack.i.l.bf16 %v6005_v32  ;;  %v6007_v43 = vunpack.i.h.bf16 %v6005_v32 }
  0xa2   : > { %495 = vmatpush.msrb.mxu0 %v6815_v5  ;;  %v551_v60 = vsel %vm545_vm3, %v5941_v49, %v5946_v54  ;;  %v548_v61 = vsel %vm545_vm3, %v5942_v48, %v5947_v53  ;;  %v663_v62 = vsel %vm658_vm4, %v5937_v31, %v5951_v55  ;;  %v664_v2 = vsel %vm658_vm4, %v5951_v55, %v5961_v56 }
  0xa3   : > { %601 = vmatpush.msra.mxu3 %v550_v57  ;;  %714 = vmatpush.msra.mxu2 %v663_v62  ;;  %v886_v47 = vsel %vm8170_vm6, %v5992_v33, %v6006_v35  ;;  %v887_v49 = vsel %vm8170_vm6, %v6006_v35, %v6007_v43  ;;  %v753_v57 = vld [vmem:[#allocation4 + $0x40] sm:$0xff] }
  0xa4   : > { %624 = vmatpush.msra.mxu0 %v551_v60  ;;  %5600 = vmatmul.msk.f32.vlgmr.msrb.gmra.mxu1 %vm375_vm2, %v319_v58 }
  0xa5   : > { %602 = vmatpush.msra.mxu3 %v547_v59 }
  0xa6   : > { %625 = vmatpush.msra.mxu0 %v548_v61  ;;  %5596 = vmatmul.msk.f32.vlgmr.msrb.gmra.mxu3 %vm375_vm2, %v319_v58 }
  0xa7   : > { %5598 = vmatmul.msk.f32.vlgmr.msrb.gmra.mxu0 %vm375_vm2, %v319_v58  ;;  %5602 = vmatmul.msk.f32.vlgmr.msrb.gmra.mxu2 %vm375_vm2, %v527_v63  ;;  %v5955_v5 = vpop.permute.xlu1 %5954  ;;  %v5965_v6 = vpop.permute.xlu0 %5964 }
  0xa8   : > { %737 = vmatpush.msrb.mxu3 %v664_v2  ;;  %v5957_v8 = vunpack.i.h.bf16 %v5955_v5  ;;  %v5956_v9 = vunpack.i.l.bf16 %v5955_v5  ;;  %v5967_v10 = vunpack.i.h.bf16 %v5965_v6  ;;  %v5966_v11 = vunpack.i.l.bf16 %v5965_v6  ;;  %v6020_v50 = vpop.permute.xlu2 %6019 }
  0xa9   : > { %v6022_v60 = vunpack.i.h.bf16 %v6020_v50  ;;  %v6021_v61 = vunpack.i.l.bf16 %v6020_v50  ;;  %v1205_v50 = vld [vmem:[#allocation4 + $0x80] sm:$0xff] }
  0xaa   : > { %v659_v15 = vsel %vm658_vm4, %v5952_v3, %v5956_v9  ;;  %v660_v16 = vsel %vm658_vm4, %v5956_v9, %v5957_v8  ;;  %v661_v17 = vsel %vm658_vm4, %v5957_v8, %v5962_v4  ;;  %v775_v18 = vsel %vm771_vm5, %v5966_v11, %v5967_v10 }
  0xab   : > { %692 = vmatpush.msra.mxu1 %v659_v15  ;;  %715 = vmatpush.msra.mxu2 %v660_v16 }
  0xac   : > { %5601 = vmatmul.msk.f32.gmra.mxu1 %vm375_vm2, %v320_v12  ;;  %738 = vmatpush.msrb.mxu3 %v661_v17 }
  0xad   : > { %804 = vmatpush.msrb.mxu0 %v775_v18 }
  0xae   : > { %5597 = vmatmul.msk.f32.gmra.mxu3 %vm375_vm2, %v320_v12 }
  0xaf   : > { %5599 = vmatmul.msk.f32.gmra.mxu0 %vm375_vm2, %v320_v12  ;;  %5603 = vmatmul.msk.f32.gmra.mxu2 %vm375_vm2, %v528_v19  ;;  %v5970_v21 = vpop.permute.xlu1 %5969  ;;  %v5980_v22 = vpop.permute.xlu0 %5979 }
  0xb0   : > { %805 = vmatpush.msrb.mxu0 %v772_v20  ;;  %v5972_v23 = vunpack.i.h.bf16 %v5970_v21  ;;  %v5971_v24 = vunpack.i.l.bf16 %v5970_v21  ;;  %v5982_v25 = vunpack.i.h.bf16 %v5980_v22  ;;  %v5981_v26 = vunpack.i.l.bf16 %v5980_v22  ;;  %v6035_v6 = vpop.permute.xlu2 %6034  ;;  %v866_v21 = vld [vmem:[#allocation4 + $0x50] sm:$0xff] }
  0xb1   : > { %v6036_v14 = vunpack.i.l.bf16 %v6035_v6 }
  0xb2   : > { %v776_v28 = vsel %vm771_vm5, %v5967_v10, %v5971_v24  ;;  %v777_v29 = vsel %vm771_vm5, %v5971_v24, %v5972_v23  ;;  %v773_v30 = vsel %vm771_vm5, %v5977_v13, %v5981_v26  ;;  %v774_v31 = vsel %vm771_vm5, %v5981_v26, %v5982_v25 }
  0xb3   : > { %827 = vmatpush.msrb.mxu1 %v776_v28  ;;  %850 = vmatpush.msrb.mxu2 %v777_v29  ;;  %v6037_v13 = vunpack.i.h.bf16 %v6035_v6  ;;  %v979_v28 = vld [vmem:[#allocation4 + $0x60] sm:$0xff] }
  0xb4   : > { %5608 = vmatmul.msk.f32.vlgmr.msra.gmra.mxu1 %vm375_vm2, %v640_v27 }
  0xb5   : > { %828 = vmatpush.msrb.mxu1 %v773_v30  ;;  %851 = vmatpush.msrb.mxu2 %v774_v31  ;;  %v1112_v26 = vsel %vm8164_vm8, %v6036_v14, %v6037_v13 }
  0xb6   : > { %5604 = vmatmul.msk.f32.vlgmr.msra.gmra.mxu3 %vm375_vm2, %v527_v63 }
  0xb7   : > { %5606 = vmatmul.msk.f32.vlgmr.msra.gmra.mxu0 %vm375_vm2, %v527_v63  ;;  %5610 = vmatmul.msk.f32.vlgmr.msra.gmra.mxu2 %vm375_vm2, %v640_v27  ;;  %v5985_v36 = vpop.permute.xlu1 %5984  ;;  %v5995_v37 = vpop.permute.xlu0 %5994 }
  0xb8   : > { %v5987_v38 = vunpack.i.h.bf16 %v5985_v36  ;;  %v5986_v39 = vunpack.i.l.bf16 %v5985_v36  ;;  %v5997_v40 = vunpack.i.h.bf16 %v5995_v37  ;;  %v5996_v41 = vunpack.i.l.bf16 %v5995_v37  ;;  %v6050_v20 = vpop.permute.xlu2 %6049 }
  0xb9   : > { %v6052_v22 = vunpack.i.h.bf16 %v6050_v20 }
  0xba   : > { %v888_v44 = vsel %vm8170_vm6, %v5986_v39, %v5987_v38  ;;  %v889_v45 = vsel %vm8170_vm6, %v5987_v38, %v5996_v41  ;;  %v890_v48 = vsel %vm8170_vm6, %v5996_v41, %v5997_v40  ;;  %v867_v38 = vld [vmem:[#allocation4 + $0x58] sm:$0xff] }
  0xbb   : > { %917 = vmatpush.msra.mxu3 %v888_v44  ;;  %940 = vmatpush.msra.mxu0 %v889_v45 }
  0xbc   : > { %5609 = vmatmul.msk.f32.gmra.mxu1 %vm375_vm2, %v641_v42 }
  0xbd   : > { %918 = vmatpush.msra.mxu3 %v885_v46  ;;  %941 = vmatpush.msra.mxu0 %v886_v47  ;;  %v1092_v46 = vld [vmem:[#allocation4 + $0x70] sm:$0xff] }
  0xbe   : > { %5605 = vmatmul.msk.f32.gmra.mxu3 %vm375_vm2, %v528_v19  ;;  %963 = vmatpush.msra.mxu1 %v890_v48 }
  0xbf   : > { %5607 = vmatmul.msk.f32.gmra.mxu0 %vm375_vm2, %v528_v19  ;;  %5611 = vmatmul.msk.f32.gmra.mxu2 %vm375_vm2, %v641_v42  ;;  %v6000_v51 = vpop.permute.xlu1 %5999  ;;  %v6010_v52 = vpop.permute.xlu0 %6009 }
  0xc0   : > { %v6002_v53 = vunpack.i.h.bf16 %v6000_v51  ;;  %v6001_v54 = vunpack.i.l.bf16 %v6000_v51  ;;  %v6012_v55 = vunpack.i.h.bf16 %v6010_v52  ;;  %v6011_v56 = vunpack.i.l.bf16 %v6010_v52  ;;  %964 = vmatpush.msra.mxu1 %v887_v49  ;;  %v1093_v49 = vld [vmem:[#allocation4 + $0x78] sm:$0xff]  ;;  %v1206_v51 = vld [vmem:[#allocation4 + $0x88] sm:$0xff] }
  0xc2   : > { %v1001_v58 = vsel %vm8165_vm7, %v6001_v54, %v6002_v53  ;;  %v998_v59 = vsel %vm8165_vm7, %v6011_v56, %v6012_v55 }
  0xc3   : > { %1030 = vmatpush.msra.mxu2 %v1001_v58 }
  0xc4   : > { %5616 = vmatmul.msk.f32.vlgmr.msrb.gmra.mxu1 %vm375_vm2, %v753_v57 }
  0xc5   : > { %1031 = vmatpush.msra.mxu2 %v998_v59 }
  0xc6   : > { %5612 = vmatmul.msk.f32.vlgmr.msrb.gmra.mxu3 %vm375_vm2, %v640_v27  ;;  %v6051_v27 = vunpack.i.l.bf16 %v6050_v20  ;;  %v6760_v20 = vmov 0  }
  0xc7   : > { %5614 = vmatmul.msk.f32.vlgmr.msrb.gmra.mxu0 %vm375_vm2, %v753_v57  ;;  %5618 = vmatmul.msk.f32.vlgmr.msrb.gmra.mxu2 %vm375_vm2, %v753_v57  ;;  %v6015_v62 = vpop.permute.xlu1 %6014  ;;  %v6025_v63 = vpop.permute.xlu0 %6024 }
  0xc8   : > { %v6017_v2 = vunpack.i.h.bf16 %v6015_v62  ;;  %v6016_v3 = vunpack.i.l.bf16 %v6015_v62  ;;  %v6027_v4 = vunpack.i.h.bf16 %v6025_v63  ;;  %v6026_v5 = vunpack.i.l.bf16 %v6025_v63  ;;  %6223 = vset.pattern.permute.xlu1 %v6760_v20  ;;  %6224 = vset.pattern.permute.xlu2 %v6760_v20 }
  0xc9   : > { %v1229_v30 = vsel %vm8163_vm9, %v6051_v27, %v6052_v22  ;;  %6385 = vset.pattern.permute.xlu0 %v6760_v20 }
  0xca   : > { %v1002_v8 = vsel %vm8165_vm7, %v6002_v53, %v6016_v3  ;;  %v999_v9 = vsel %vm8165_vm7, %v6012_v55, %v6017_v2  ;;  %v1003_v10 = vsel %vm8165_vm7, %v6016_v3, %v6021_v61  ;;  %v1000_v11 = vsel %vm8165_vm7, %v6017_v2, %v6022_v60 }
  0xcb   : > { %1053 = vmatpush.msrb.mxu3 %v1002_v8  ;;  %1076 = vmatpush.msrb.mxu0 %v1003_v10  ;;  %v1114_v12 = vsel %vm8164_vm8, %v6026_v5, %v6027_v4  ;;  %v7039_v10 = vand.u32 127, %v8160_v1 }
  0xcc   : > { %5617 = vmatmul.msk.f32.gmra.mxu1 %vm375_vm2, %v754_v7 }
  0xcd   : > { %1054 = vmatpush.msrb.mxu3 %v999_v9  ;;  %1077 = vmatpush.msrb.mxu0 %v1000_v11  ;;  %v211_v11 = vand.u32 65535, %v7039_v10 }
  0xce   : > { %5613 = vmatmul.msk.f32.gmra.mxu3 %vm375_vm2, %v641_v42  ;;  %1143 = vmatpush.msrb.mxu1 %v1114_v12  ;;  %v980_v42 = vld [vmem:[#allocation4 + $0x68] sm:$0xff]  ;;  %v7043_v12 = vadd.s32 128, %v7039_v10 }
  0xcf   : > { %5615 = vmatmul.msk.f32.gmra.mxu0 %vm375_vm2, %v754_v7  ;;  %5619 = vmatmul.msk.f32.gmra.mxu2 %vm375_vm2, %v754_v7  ;;  %v6040_v15 = vpop.permute.xlu0 %6039  ;;  %v6030_v16 = vpop.permute.xlu1 %6029 }
  0xd0   : > { %v6041_v17 = vunpack.i.l.bf16 %v6040_v15  ;;  %v6032_v18 = vunpack.i.h.bf16 %v6030_v16  ;;  %v6031_v19 = vunpack.i.l.bf16 %v6030_v16  ;;  %v6042_v23 = vunpack.i.h.bf16 %v6040_v15 }
  0xd1   : > { %v212_v16 = vshrl.u32 %v7039_v10, 16 }
  0xd2   : > { %v1115_v24 = vsel %vm8164_vm8, %v6027_v4, %v6031_v19  ;;  %v1111_v25 = vsel %vm8164_vm8, %v6032_v18, %v6036_v14  ;;  %v1116_v29 = vsel %vm8164_vm8, %v6031_v19, %v6041_v17  ;;  %v1113_v31 = vsel %vm8164_vm8, %v6037_v13, %v6042_v23 }
  0xd3   : > { %1166 = vmatpush.msrb.mxu2 %v1115_v24  ;;  %1144 = vmatpush.msrb.mxu1 %v1111_v25  ;;  %v215_v17 = vmul.u32 58254, %v211_v11  ;;  %v240_v19 = vand.u32 65535, %v7043_v12  ;;  %v216_v22 = vmul.u32 14564, %v212_v16  ;;  %v7056_v24 = vadd.s32 256, %v7039_v10 }
  0xd4   : > { %5624 = vmatmul.msk.f32.vlgmr.msra.gmra.mxu1 %vm375_vm2, %v866_v21  ;;  %v241_v25 = vshrl.u32 %v7043_v12, 16 }
  0xd5   : > { %1167 = vmatpush.msrb.mxu2 %v1112_v26  ;;  %v218_v23 = vshll.u32 %v215_v17, 16  ;;  %v244_v26 = vmul.u32 58254, %v240_v19 }
  0xd6   : > { %5620 = vmatmul.msk.f32.vlgmr.msra.gmra.mxu3 %vm375_vm2, %v866_v21 }
  0xd7   : > { %5622 = vmatmul.msk.f32.vlgmr.msra.gmra.mxu0 %vm375_vm2, %v866_v21  ;;  %5626 = vmatmul.msk.f32.vlgmr.msra.gmra.mxu2 %vm375_vm2, %v979_v28  ;;  %v6045_v32 = vpop.permute.xlu1 %6044  ;;  %v6055_v33 = vpop.permute.xlu0 %6054  ;;  %v214_v21 = vmul.u32 14564, %v211_v11 }
  0xd8   : > { %1189 = vmatpush.msra.mxu3 %v1116_v29  ;;  %v6047_v34 = vunpack.i.h.bf16 %v6045_v32  ;;  %v6046_v35 = vunpack.i.l.bf16 %v6045_v32  ;;  %v6057_v36 = vunpack.i.h.bf16 %v6055_v33  ;;  %v6056_v37 = vunpack.i.l.bf16 %v6055_v33  ;;  %1302 = vmatpush.msra.mxu2 %v1229_v30 }
  0xd9   : > { %vm222_vm10 = vc.u32 %v214_v21, %v218_v23  ;;  %v224_v32 = vadd.s32 %v218_v23, %v214_v21  ;;  %v270_v33 = vshrl.u32 %v7056_v24, 16  ;;  %v246_v23 = vmul.u32 58254, %v241_v25 }
  0xda   : > { %1190 = vmatpush.msra.mxu3 %v1113_v31  ;;  %v1227_v39 = vsel %vm8163_vm9, %v6046_v35, %v6047_v34  ;;  %v1228_v40 = vsel %vm8163_vm9, %v6047_v34, %v6051_v27  ;;  %v1224_v41 = vsel %vm8163_vm9, %v6056_v37, %v6057_v36  ;;  %v269_v27 = vand.u32 65535, %v7056_v24 }
  0xdb   : > { %1256 = vmatpush.msra.mxu0 %v1227_v39  ;;  %1279 = vmatpush.msra.mxu1 %v1228_v40  ;;  %v220_v31 = vshll.u32 %v216_v22, 16  ;;  %v245_v35 = vmul.u32 14564, %v241_v25  ;;  %v243_v39 = vmul.u32 14564, %v240_v19  ;;  %v247_v40 = vshll.u32 %v244_v26, 16 }
  0xdc   : > { %5625 = vmatmul.msk.f32.gmra.mxu1 %vm375_vm2, %v867_v38  ;;  %v273_v37 = vmul.u32 58254, %v269_v27 }
  0xdd   : > { %1257 = vmatpush.msra.mxu0 %v1224_v41  ;;  %v274_v41 = vmul.u32 14564, %v270_v33  ;;  %vm226_vm11 = vc.u32 %v224_v32, %v220_v31  ;;  %vm251_vm13 = vc.u32 %v243_v39, %v247_v40  ;;  %v219_v31 = vshrl.u32 %v215_v17, 16 }
  0xde   : > { %5621 = vmatmul.msk.f32.gmra.mxu3 %vm375_vm2, %v867_v38  ;;  %v227_v11 = vsel %vm226_vm11, 1, %v6760_v20 }
  0xdf   : > { %5623 = vmatmul.msk.f32.gmra.mxu0 %vm375_vm2, %v867_v38  ;;  %5627 = vmatmul.msk.f32.gmra.mxu2 %vm375_vm2, %v980_v42  ;;  %v6060_v43 = vpop.permute.xlu1 %6059  ;;  %v217_v38 = vmul.u32 58254, %v212_v16 }
  0xe0   : > { %v6062_v44 = vunpack.i.h.bf16 %v6060_v43  ;;  %v6061_v45 = vunpack.i.l.bf16 %v6060_v43  ;;  %v276_v43 = vshll.u32 %v273_v37, 16 }
  0xe2   : > { %v1225_v47 = vsel %vm8163_vm9, %v6057_v36, %v6061_v45  ;;  %v1226_v48 = vsel %vm8163_vm9, %v6061_v45, %v6062_v44  ;;  %v272_v36 = vmul.u32 14564, %v269_v27  ;;  %v278_v44 = vshll.u32 %v274_v41, 16 }
  0xe3   : > { %1280 = vmatpush.msra.mxu1 %v1225_v47  ;;  %1303 = vmatpush.msra.mxu2 %v1226_v48  ;;  %v249_v45 = vshll.u32 %v245_v35, 16  ;;  %v253_v48 = vadd.s32 %v247_v40, %v243_v39  ;;  %v252_v27 = vsel %vm251_vm13, 1, %v6760_v20  ;;  %v221_v40 = vshrl.u32 %v216_v22, 16 }
  0xe4   : > { %5632 = vmatmul.msk.f32.vlgmr.msrb.gmra.mxu1 %vm375_vm2, %v1092_v46  ;;  %vm280_vm12 = vc.u32 %v272_v36, %v276_v43  ;;  %v254_v39 = vadd.s32 %v252_v27, %v246_v23 }
  0xe5   : > { %v281_v16 = vsel %vm280_vm12, 1, %v6760_v20  ;;  %vm255_vm15 = vc.u32 %v253_v48, %v249_v45 }
  0xe6   : > { %5628 = vmatmul.msk.f32.vlgmr.msrb.gmra.mxu3 %vm375_vm2, %v979_v28 }
  0xe7   : > { %5630 = vmatmul.msk.f32.vlgmr.msrb.gmra.mxu0 %vm375_vm2, %v979_v28  ;;  %5634 = vmatmul.msk.f32.vlgmr.msrb.gmra.mxu2 %vm375_vm2, %v1092_v46 }
  0xec   : > { %5633 = vmatmul.msk.f32.gmra.mxu1 %vm375_vm2, %v1093_v49 }
  0xee   : > { %5629 = vmatmul.msk.f32.gmra.mxu3 %vm375_vm2, %v980_v42 }
  0xef   : > { %5631 = vmatmul.msk.f32.gmra.mxu0 %vm375_vm2, %v980_v42  ;;  %5635 = vmatmul.msk.f32.gmra.mxu2 %vm375_vm2, %v1093_v49  ;;  %v223_v42 = vsel %vm222_vm10, 1, %v6760_v20  ;;  %vm201_vm10 = vcmask 1047704  }
  0xf0   : > { %v225_v47 = vadd.s32 %v223_v42, %v217_v38 }
  0xf2   : > { %v229_v32 = vadd.s32 %v227_v11, %v225_v47  ;;  %v250_v47 = vshrl.u32 %v245_v35, 16 }
  0xf4   : > { %5640 = vmatmul.msk.f32.vlgmr.msra.gmra.mxu1 %vm375_vm2, %v1205_v50  ;;  %v230_v42 = vadd.s32 %v229_v32, %v219_v31 }
  0xf6   : > { %5636 = vmatmul.msk.f32.vlgmr.msra.gmra.mxu3 %vm375_vm2, %v1092_v46  ;;  %v282_v46 = vadd.s32 %v276_v43, %v272_v36  ;;  %v277_v43 = vshrl.u32 %v273_v37, 16  ;;  %v231_v25 = vadd.s32 %v230_v42, %v221_v40 }
  0xf7   : > { %5638 = vmatmul.msk.f32.vlgmr.msra.gmra.mxu0 %vm375_vm2, %v1205_v50  ;;  %5642 = vmatmul.msk.f32.vlgmr.msra.gmra.mxu2 %vm375_vm2, %v1205_v50 }
  0xf8   : > { %vm284_vm14 = vc.u32 %v282_v46, %v278_v44  ;;  %v248_v46 = vshrl.u32 %v244_v26, 16  ;;  %v232_v48 = vshrl.u32 %v231_v25, 4 }
  0xf9   : > { %v285_v38 = vsel %vm284_vm14, 1, %v6760_v20 }
  0xfa   : > { %v233_v27 = vmul.u32 18, %v232_v48 }
  0xfc   : > { %5641 = vmatmul.msk.f32.gmra.mxu1 %vm375_vm2, %v1206_v51 }
  0xfe   : > { %5637 = vmatmul.msk.f32.gmra.mxu3 %vm375_vm2, %v1093_v49  ;;  %v275_v49 = vmul.u32 58254, %v270_v33  ;;  %v256_v33 = vsel %vm255_vm15, 1, %v6760_v20 }
  0xff   : > { %5639 = vmatmul.msk.f32.gmra.mxu0 %vm375_vm2, %v1206_v51  ;;  %5643 = vmatmul.msk.f32.gmra.mxu2 %vm375_vm2, %v1206_v51 }
 0x100   : > { %v283_v36 = vadd.s32 %v281_v16, %v275_v49 }
 0x102   : > { %v287_v1 = vadd.s32 %v285_v38, %v283_v36 }
 0x104   : > { %v288_v17 = vadd.s32 %v287_v1, %v277_v43 }
 0x111   : > { %v6998_v52 = vpop.f32.mrf.mxu1 }
 0x119   : > { %v7000_v53 = vpop.f32.mrf.mxu1  ;;  %v7002_v54 = vpop.f32.mrf.mxu2 }
 0x11b   : > { %v7004_v55 = vpop.f32.mrf.mxu0 }
 0x121   : > { %v7006_v56 = vpop.f32.mrf.mxu3  ;;  %v7008_v57 = vpop.f32.mrf.mxu1 }
 0x122   : > { %v7010_v58 = vpop.f32.mrf.mxu2 }
 0x124   : > { %v7012_v59 = vpop.f32.mrf.mxu0 }
 0x129   : > { %v7014_v60 = vpop.f32.mrf.mxu3  ;;  %v7016_v61 = vpop.f32.mrf.mxu1 }
 0x12a   : > { %v7018_v62 = vpop.f32.mrf.mxu2  ;;  %v475_v22 = vadd.f32 %v7014_v60, %v7004_v55 }
 0x12c   : > { %v7020_v63 = vpop.f32.mrf.mxu0  ;;  %v633_v31 = vadd.f32 %v7018_v62, %v475_v22 }
 0x12d   : > { %v501_v1 = vadd.f32 %v7020_v63, %v7000_v53  ;;  %v8175_v53 = vmov 0.0   ;;  %v521_v63 = vadd.f32 %v7008_v57, %v7002_v54 }
 0x12e   : > { %200 = vst.msk [vmem:[#allocation3 + $0x20] sm:$0xff] %vm198_vm0, %v8175_v53 }
 0x12f   : > { %199 = vst.msk [vmem:[#allocation3] sm:$0xff] %vm198_vm0, %v8175_v53 }
 0x130   : > { %202 = vst.msk [vmem:[#allocation3 + $0x18] sm:$0xff] %vm201_vm10, %v8175_v53 }
 0x131   : > { %v7022_v2 = vpop.f32.mrf.mxu3  ;;  %v7024_v3 = vpop.f32.mrf.mxu1  ;;  %203 = vst.msk [vmem:[#allocation3 + $0x38] sm:$0xff] %vm201_vm10, %v8175_v53 }
 0x132   : > { %v7026_v4 = vpop.f32.mrf.mxu2  ;;  %v746_v35 = vadd.f32 %v7024_v3, %v633_v31  ;;  %v478_v55 = vadd.f32 %v7022_v2, %v7006_v56 }
 0x134   : > { %v7028_v5 = vpop.f32.mrf.mxu0  ;;  %v636_v54 = vadd.f32 %v7026_v4, %v478_v55 }
 0x135   : > { %v635_v57 = vadd.f32 %v7028_v5, %v521_v63 }
 0x139   : > { %v7030_v6 = vpop.f32.mrf.mxu3  ;;  %v7032_v7 = vpop.f32.mrf.mxu1 }
 0x13a   : > { %v7034_v8 = vpop.f32.mrf.mxu2 }
 0x13c   : > { %v7036_v9 = vpop.f32.mrf.mxu0 }
 0x141   : > { %v7045_v13 = vpop.f32.mrf.mxu3  ;;  %v7047_v14 = vpop.f32.mrf.mxu1 }
 0x142   : > { %v7049_v15 = vpop.f32.mrf.mxu2  ;;  %v637_v36 = vadd.f32 %v7045_v13, %v501_v1  ;;  %v498_v13 = vadd.f32 %v7012_v59, %v6998_v52 }
 0x144   : > { %v7052_v18 = vpop.f32.mrf.mxu0 }
 0x145   : > { %v859_v62 = vadd.f32 %v7052_v18, %v746_v35  ;;  %v750_v18 = vadd.f32 %v7049_v15, %v637_v36 }
 0x149   : > { %v7060_v28 = vpop.f32.mrf.mxu3  ;;  %v7062_v29 = vpop.f32.mrf.mxu1 }
 0x14a   : > { %v7064_v30 = vpop.f32.mrf.mxu2  ;;  %v748_v40 = vadd.f32 %v7060_v28, %v635_v57  ;;  %v863_v59 = vadd.f32 %v7062_v29, %v750_v18  ;;  %v8189_v57 = vmov 0 }
 0x14c   : > { %v7067_v34 = vpop.f32.mrf.mxu0 }
 0x151   : > { %v7069_v50 = vpop.f32.mrf.mxu3  ;;  %v7071_v51 = vpop.f32.mrf.mxu1 }
 0x152   : > { %8171 = vst [vmem:[#allocation7_spill] sm:$0xff] %v7069_v50  ;;  %v7073_v19 = vpop.f32.mrf.mxu2 }
 0x153   : > { %8172 = vst [vmem:[#allocation8_spill] sm:$0xff] %v7071_v51  ;;  %v279_v51 = vshrl.u32 %v274_v41, 16 }
 0x154   : > { %8173 = vst [vmem:[#allocation9_spill] sm:$0xff] %v7073_v19  ;;  %v7075_v21 = vpop.f32.mrf.mxu0 }
 0x155   : > { %8174 = vst [vmem:[#allocation10_spill] sm:$0xff] %v7075_v21  ;;  %v258_v21 = vadd.s32 %v256_v33, %v254_v39  ;;  %v289_v49 = vadd.s32 %v288_v17, %v279_v51  ;;  %v234_v51 = vsub.s32 %v7039_v10, %v233_v27  ;;  %v634_v39 = vadd.f32 %v7030_v6, %v498_v13 }
 0x156   : > { %v749_v33 = vadd.f32 %v7032_v7, %v636_v54  ;;  %v524_v17 = vadd.f32 %v7016_v61, %v7010_v58  ;;  %v8180_v58 = vmov 0 }
 0x157   : > { %v259_v45 = vadd.s32 %v258_v21, %v248_v46  ;;  %v290_v26 = vshrl.u32 %v289_v49, 4  ;;  %vm295_vm11 = vcmp.ne.s32.totalorder %v234_v51, 0  ;;  %vm298_vm12 = vcmp.lt.s32.totalorder %v234_v51, 0 }
 0x158   : > { %vm7121_vm13 = vmand %vm298_vm12, %vm295_vm11  ;;  %v862_v5 = vadd.f32 %v7067_v34, %v749_v33  ;;  %v638_v48 = vadd.f32 %v7036_v9, %v524_v17 }
 0x159   : > { %v920_v0 = vpop.f32.mrf.mxu3  ;;  %v7077_v50 = vpop.f32.mrf.mxu1  ;;  %v260_v23 = vadd.s32 %v259_v45, %v250_v47  ;;  %v291_v21 = vmul.u32 18, %v290_v26 }
 0x15a   : > { %v1033_v19 = vpop.f32.mrf.mxu2  ;;  %v972_v2 = vadd.f32 %v920_v0, %v859_v62  ;;  %v304_v0 = vadd.s32 18, %v234_v51 }
 0x15b   : > { %v261_v41 = vshrl.u32 %v260_v23, 4  ;;  %v292_v10 = vsub.s32 %v7056_v24, %v291_v21  ;;  %v8188_v53 = vld [vmem:[#allocation9_spill] sm:$0xff] }
 0x15c   : > { %v946_v44 = vpop.f32.mrf.mxu0  ;;  %v1085_v4 = vadd.f32 %v1033_v19, %v972_v2  ;;  %v307_v28 = vsel %vm7121_vm13, %v304_v0, %v234_v51  ;;  %v861_v19 = vadd.f32 %v7064_v30, %v748_v40  ;;  %v8187_v9 = vld [vmem:[#allocation10_spill] sm:$0xff] }
 0x15d   : > { %v262_v56 = vmul.u32 18, %v261_v41  ;;  %vm297_vm14 = vcmp.ne.s32.totalorder %v292_v10, 0  ;;  %vm300_vm15 = vcmp.lt.s32.totalorder %v292_v10, 0  ;;  %v976_v6 = vadd.f32 %v946_v44, %v863_v59 }
 0x15e   : > { %v306_v25 = vadd.s32 18, %v292_v10  ;;  %vm7134_vm9 = vmand %vm300_vm15, %vm297_vm14  ;;  %vm7141_vm13 = vcmp.lt.s32.totalorder %v307_v28, 16  ;;  %vm315_vm15 = vcmp.lt.s32.totalorder %v7056_v24, 286 }
 0x15f   : > { %v263_v52 = vsub.s32 %v7043_v12, %v262_v56  ;;  %v747_v12 = vadd.f32 %v7034_v8, %v634_v39  ;;  %v8181_v58 = vsel %vm7141_vm13, 4294967295, %v8180_v58  ;;  %v8183_v8 = vld [vmem:[#allocation8_spill] sm:$0xff] }
 0x160   : > { %8182 = vst [vmem:[#allocation11_spill] sm:$0xff] %v8181_v58  ;;  %v309_v30 = vsel %vm7134_vm9, %v306_v25, %v292_v10 }
 0x161   : > { %v923_v11 = vpop.f32.mrf.mxu3  ;;  %v1146_v20 = vpop.f32.mrf.mxu1  ;;  %vm296_vm11 = vcmp.ne.s32.totalorder %v263_v52, 0  ;;  %vm299_vm12 = vcmp.lt.s32.totalorder %v263_v52, 0  ;;  %v860_v49 = vadd.f32 %v7047_v14, %v747_v12  ;;  %v305_v61 = vadd.s32 18, %v263_v52 }
 0x162   : > { %v7081_v37 = vpop.f32.mrf.mxu2  ;;  %v1198_v46 = vadd.f32 %v1146_v20, %v1085_v4  ;;  %v975_v44 = vadd.f32 %v923_v11, %v862_v5  ;;  %v974_v20 = vadd.f32 %v8183_v8, %v861_v19  ;;  %vm7146_vm14 = vmand %vm299_vm12, %vm296_vm11  ;;  %v8186_v11 = vld [vmem:[#allocation7_spill] sm:$0xff]  ;;  %vm312_vm9 = vcmp.lt.s32.totalorder %v309_v30, 16 }
 0x163   : > { %v751_v27 = vadd.f32 %v8186_v11, %v638_v48  ;;  %v973_v26 = vadd.f32 %v8187_v9, %v860_v49  ;;  %v308_v21 = vsel %vm7146_vm14, %v305_v61, %v263_v52  ;;  %vm7170_vm12 = vmand %vm312_vm9, %vm315_vm15  ;;  %vm8194_vm14 = vcmask 736256  }
 0x164   : > { %v7083_v16 = vpop.f32.mrf.mxu0  ;;  %v1088_v14 = vadd.f32 %v7081_v37, %v975_v44  ;;  %vm7166_vm11 = vcmp.lt.s32.totalorder %v308_v21, 16  ;;  %vm8195_vm9 = vmmov %vm8194_vm14 }
 0x165   : > { %v1087_v31 = vadd.f32 %v7083_v16, %v974_v20  ;;  %v864_v63 = vadd.f32 %v8188_v53, %v751_v27  ;;  %v8190_v57 = vsel %vm7166_vm11, 4294967295, %v8189_v57  ;;  %vm8196_vm15 = vmmov %vm8195_vm9 }
 0x166   : > { %8191 = vst [vmem:[#allocation8_spill] sm:$0xff] %v8190_v57 }
 0x167   : > { %v977_v54 = vadd.f32 %v7077_v50, %v864_v63  ;;  %v1384_v63 = vld [vmem:[#allocation4 + $0xa8] sm:$0xff] }
 0x169   : > { %v7092_v60 = vpop.f32.mrf.mxu3  ;;  %v7094_v32 = vpop.f32.mrf.mxu1 }
 0x16a   : > { %v7098_v38 = vpop.f32.mrf.mxu2  ;;  %v1086_v55 = vadd.f32 %v7092_v60, %v973_v26  ;;  %v1201_v37 = vadd.f32 %v7094_v32, %v1088_v14  ;;  %v7249_v14 = vld [vmem:[#allocation4 + $0x90] sm:$0xff] }
 0x16c   : > { %v7104_v3 = vpop.f32.mrf.mxu0  ;;  %v1199_v60 = vadd.f32 %v7098_v38, %v1086_v55  ;;  %v1383_v55 = vld [vmem:[#allocation4 + $0xa0] sm:$0xff] }
 0x16d   : > { %v1090_v39 = vadd.f32 %v7104_v3, %v977_v54 }
 0x171   : > { %v1059_v15 = vpop.f32.mrf.mxu3  ;;  %v1282_v43 = vpop.f32.mrf.mxu1 }
 0x172   : > { %v1172_v7 = vpop.f32.mrf.mxu2  ;;  %v1089_v47 = vadd.f32 %v1059_v15, %v976_v6  ;;  %v1312_v50 = vadd.f32 %v1282_v43, %v1199_v60 }
 0x174   : > { %v1259_v29 = vpop.f32.mrf.mxu0  ;;  %v1202_v41 = vadd.f32 %v1172_v7, %v1089_v47  ;;  %v1318_v59 = vmax.f32 %v1312_v50, 0.0 }
 0x175   : > { %v1311_v45 = vadd.f32 %v1259_v29, %v1198_v46 }
 0x176   : > { %v1330_v15 = vsel %vm7166_vm11, %v1318_v59, 0.0 }
 0x177   : > { %v1317_v22 = vmax.f32 %v1311_v45, 0.0 }
 0x179   : > { %v1329_v1 = vsel %vm7141_vm13, %v1317_v22, 0.0  ;;  %v1192_v35 = vpop.f32.mrf.mxu3  ;;  %v1285_v51 = vpop.f32.mrf.mxu1 }
 0x17a   : > { %1341 = vrot.lane.b32.xlu1 %v1329_v1, %s6761_s6  ;;  %v1200_v16 = vadd.f32 %v1192_v35, %v1087_v31  ;;  %v1315_v36 = vadd.f32 %v1285_v51, %v1202_v41  ;;  %v1305_v62 = vpop.f32.mrf.mxu2  ;;  %v7253_v31 = vld [vmem:[#allocation4 + $0x98] sm:$0xff] }
 0x17c   : > { %v1262_v56 = vpop.f32.mrf.mxu0  ;;  %v1321_v2 = vmax.f32 %v1315_v36, 0.0  ;;  %v1313_v13 = vadd.f32 %v1305_v62, %v1200_v16 }
 0x17d   : > { %v1314_v10 = vadd.f32 %v1262_v56, %v1201_v37 }
 0x17e   : > { %v1319_v18 = vmax.f32 %v1313_v13, 0.0  ;;  %v1333_v0 = vsel %vm7166_vm11, %v1321_v2, 0.0 }
 0x17f   : > { %v1320_v32 = vmax.f32 %v1314_v10, 0.0  ;;  %1349 = vrot.lane.b32.xlu0 %v1333_v0, %s6761_s6 }
 0x180   : > { %v1331_v40 = vsel %vm7170_vm12, %v1319_v18, 0.0 }
 0x181   : > { %v1332_v33 = vsel %vm7141_vm13, %v1320_v32, 0.0  ;;  %v1195_v42 = vpop.f32.mrf.mxu3 }
 0x182   : > { %1347 = vrot.lane.b32.xlu2 %v1332_v33, %s6761_s6  ;;  %1345 = vrot.lane.b32.xlu1 %v1331_v40, %s6761_s6  ;;  %v1203_v38 = vadd.f32 %v1195_v42, %v1090_v39  ;;  %v1308_v52 = vpop.f32.mrf.mxu2 }
 0x184   : > { %v1316_v4 = vadd.f32 %v1308_v52, %v1203_v38 }
 0x186   : > { %v1322_v5 = vmax.f32 %v1316_v4, 0.0 }
 0x188   : > { %v1334_v3 = vsel %vm7170_vm12, %v1322_v5, 0.0 }
 0x189   : > { %1351 = vrot.lane.b32.xlu0 %v1334_v3, %s6761_s6 }
 0x18a   : > { %1343 = vrot.lane.b32.xlu2 %v1330_v15, %s6761_s6 }
 0x1dc   : > { %v1348_v43 = vpop.permute.xlu2 %1347 }
 0x1dd   : > { %1369 = vst.msk [vmem:[#allocation3 + $0x20] sm:$0xff] %vm201_vm10, %v1348_v43 }
 0x1e4   : > { %v1379_v6 = vld [vmem:[#allocation3 + $0x20] sm:$0xff]  ;;  %v1344_v28 = vpop.permute.xlu2 %1343 }
 0x1e5   : > { %1524 = vmatpush.msrb.mxu2 %v1379_v6 }
 0x1ec   : > { %v1342_v46 = vpop.permute.xlu1 %1341 }
 0x1ed   : > { %1365 = vst.msk [vmem:[#allocation3] sm:$0xff] %vm201_vm10, %v1342_v46  ;;  %v7197_v17 = vsel %vm198_vm0, %v1342_v46, %v1344_v28 }
 0x1f1   : > { %v1350_v7 = vpop.permute.xlu0 %1349 }
 0x1f2   : > { %v7194_v25 = vsel %vm198_vm0, %v1348_v43, %v1350_v7 }
 0x1f3   : > { %v6068_v34 = vpack.i.bf16 %v7194_v25, %v1379_v6 }
 0x1f4   : > { %v1346_v12 = vpop.permute.xlu1 %1345  ;;  %v1376_v29 = vld [vmem:[#allocation3] sm:$0xff] }
 0x1f5   : > { %1368 = vst.msk [vmem:[#allocation3 + $0x18] sm:$0xff] %vm198_vm0, %v1346_v12  ;;  %1525 = vmatpush.msrb.mxu2 %v1376_v29  ;;  %v6063_v19 = vpack.i.bf16 %v7197_v17, %v1376_v29  ;;  %6069 = vrot.lane.b32.xlu2 %v6068_v34, %s6752_s21  ;;  %v7205_v44 = vsel %vm198_vm0, %v1344_v28, %v1346_v12 }
 0x1f6   : > { %v6113_v23 = vpack.i.bf16 %v7205_v44, %v7197_v17  ;;  %5650 = vmatmul.msk.f32.vlgmr.msrb.gmra.mxu2 %vm375_vm2, %v7249_v14 }
 0x1f7   : > { %6064 = vrot.lane.b32.xlu0 %v6063_v19, %s6752_s21 }
 0x1fb   : > { %v1352_v47 = vpop.permute.xlu0 %1351 }
 0x1fc   : > { %v1388_v45 = vld [vmem:[#allocation3 + $0x18] sm:$0xff]  ;;  %1372 = vst.msk [vmem:[#allocation3 + $0x38] sm:$0xff] %vm198_vm0, %v1352_v47  ;;  %v7212_v49 = vsel %vm198_vm0, %v1350_v7, %v1352_v47 }
 0x1fd   : > { %v6078_v48 = vpack.i.bf16 %v1388_v45, %v7205_v44  ;;  %v6103_v22 = vpack.i.bf16 %v7205_v44, %v7212_v49  ;;  %v6108_v30 = vpack.i.bf16 %v1376_v29, %v7212_v49 }
 0x1fe   : > { %5651 = vmatmul.msk.f32.gmra.mxu2 %vm375_vm2, %v7253_v31 }
 0x1ff   : > { %6084 = vrot.lane.b32.xlu0 %v6068_v34, %s6753_s22  ;;  %6079 = vrot.lane.b32.xlu2 %v6078_v48, %s6752_s21 }
 0x203   : > { %v1392_v61 = vld [vmem:[#allocation3 + $0x38] sm:$0xff] }
 0x204   : > { %v6073_v8 = vpack.i.bf16 %v1392_v61, %v7212_v49  ;;  %v6093_v20 = vpack.i.bf16 %v1388_v45, %v1392_v61 }
 0x206   : > { %6074 = vrot.lane.b32.xlu1 %v6073_v8, %s6752_s21 }
 0x207   : > { %6094 = vrot.lane.b32.xlu0 %v6093_v20, %s6753_s22  ;;  %6104 = vrot.lane.b32.xlu2 %v6103_v22, %s6753_s22 }
 0x20e   : > { %6089 = vrot.lane.b32.xlu1 %v6063_v19, %s6753_s22 }
 0x20f   : > { %6114 = vrot.lane.b32.xlu0 %v6113_v23, %s6754_s27  ;;  %6109 = vrot.lane.b32.xlu2 %v6108_v30, %s6754_s27 }
 0x216   : > { %6099 = vrot.lane.b32.xlu1 %v6068_v34, %s6754_s27 }
 0x217   : > { %6129 = vrot.lane.b32.xlu0 %v6063_v19, %s6755_s28  ;;  %6124 = vrot.lane.b32.xlu2 %v6068_v34, %s6755_s28 }
 0x21e   : > { %6119 = vrot.lane.b32.xlu1 %v6093_v20, %s6754_s27 }
 0x21f   : > { %6139 = vrot.lane.b32.xlu0 %v6068_v34, %s6756_s29  ;;  %6134 = vrot.lane.b32.xlu2 %v6078_v48, %s6755_s28 }
 0x226   : > { %6144 = vrot.lane.b32.xlu1 %v6073_v8, %s6755_s28 }
 0x227   : > { %6154 = vrot.lane.b32.xlu0 %v6093_v20, %s6756_s29  ;;  %6164 = vrot.lane.b32.xlu2 %v6103_v22, %s6756_s29 }
 0x22e   : > { %6149 = vrot.lane.b32.xlu1 %v6063_v19, %s6756_s29 }
 0x22f   : > { %6184 = vrot.lane.b32.xlu0 %v6103_v22, %s6757_s30  ;;  %6169 = vrot.lane.b32.xlu2 %v6063_v19, %s6757_s30 }
 0x236   : > { %6159 = vrot.lane.b32.xlu1 %v6068_v34, %s6757_s30 }
 0x237   : > { %6189 = vrot.lane.b32.xlu0 %v6108_v30, %s6758_s4  ;;  %6179 = vrot.lane.b32.xlu2 %v6068_v34, %s6758_s4 }
 0x23e   : > { %6174 = vrot.lane.b32.xlu1 %v6093_v20, %s6757_s30 }
 0x23f   : > { %6204 = vrot.lane.b32.xlu0 %v6068_v34, %s6759_s5  ;;  %6199 = vrot.lane.b32.xlu2 %v6093_v20, %s6758_s4  ;;  %v1581_v20 = vld [vmem:[#allocation4 + $0xb8] sm:$0xff] }
 0x246   : > { %6194 = vrot.lane.b32.xlu1 %v6113_v23, %s6758_s4 }
 0x247   : > { %6219 = vrot.lane.b32.xlu0 %v6078_v48, %s6759_s5  ;;  %6214 = vrot.lane.b32.xlu2 %v6073_v8, %s6759_s5 }
 0x24e   : > { %6209 = vrot.lane.b32.xlu1 %v6063_v19, %s6759_s5 }
 0x24f   : > { %v6070_v11 = vpop.permute.xlu2 %6069 }
 0x250   : > { %v6072_v27 = vunpack.i.h.bf16 %v6070_v11  ;;  %v6071_v9 = vunpack.i.l.bf16 %v6070_v11 }
 0x252   : > { %v1420_v26 = vsel %vm362_vm1, %v6071_v9, %v6072_v27 }
 0x253   : > { %1449 = vmatpush.msrb.mxu3 %v1420_v26 }
 0x259   : > { %v6080_v41 = vpop.permute.xlu2 %6079 }
 0x25a   : > { %v6082_v18 = vunpack.i.h.bf16 %v6080_v41  ;;  %v6081_v0 = vunpack.i.l.bf16 %v6080_v41 }
 0x25c   : > { %v1419_v5 = vsel %vm362_vm1, %v6081_v0, %v6082_v18 }
 0x261   : > { %v6105_v1 = vpop.permute.xlu2 %6104 }
 0x262   : > { %v6106_v62 = vunpack.i.l.bf16 %v6105_v1  ;;  %v6107_v42 = vunpack.i.h.bf16 %v6105_v1 }
 0x269   : > { %v6065_v35 = vpop.permute.xlu0 %6064  ;;  %v7260_v16 = vpop.permute.xlu2 %6109 }
 0x26a   : > { %v6067_v51 = vunpack.i.h.bf16 %v6065_v35  ;;  %v6066_v21 = vunpack.i.l.bf16 %v6065_v35  ;;  %v6111_v34 = vunpack.i.l.bf16 %v7260_v16  ;;  %v6112_v22 = vunpack.i.h.bf16 %v7260_v16 }
 0x26c   : > { %v1417_v37 = vsel %vm362_vm1, %v6066_v21, %v6067_v51  ;;  %v1418_v4 = vsel %vm362_vm1, %v6067_v51, %v6081_v0 }
 0x26d   : > { %1450 = vmatpush.msrb.mxu3 %v1417_v37 }
 0x26e   : > { %5644 = vmatmul.msk.f32.vlgmr.msrb.gmra.mxu3 %vm375_vm2, %v1383_v55 }
 0x26f   : > { %1547 = vmatpush.msra.mxu3 %v7194_v25  ;;  %v1580_v25 = vld [vmem:[#allocation4 + $0xb0] sm:$0xff] }
 0x271   : > { %1548 = vmatpush.msra.mxu3 %v7197_v17  ;;  %v6085_v36 = vpop.permute.xlu0 %6084  ;;  %v7265_v13 = vpop.permute.xlu2 %6124 }
 0x272   : > { %v6087_v53 = vunpack.i.h.bf16 %v6085_v36  ;;  %v6086_v38 = vunpack.i.l.bf16 %v6085_v36  ;;  %v6127_v52 = vunpack.i.h.bf16 %v7265_v13  ;;  %v6126_v59 = vunpack.i.l.bf16 %v7265_v13 }
 0x274   : > { %v1602_v56 = vsel %vm545_vm3, %v6087_v53, %v6106_v62  ;;  %v1601_v15 = vsel %vm545_vm3, %v6086_v38, %v6087_v53  ;;  %v1825_v46 = vsel %vm771_vm5, %v6126_v59, %v6127_v52 }
 0x275   : > { %1653 = vmatpush.msra.mxu2 %v1602_v56 }
 0x276   : > { %5645 = vmatmul.msk.f32.gmra.mxu3 %vm375_vm2, %v1384_v63 }
 0x278   : > { %v6075_v10 = vpop.permute.xlu1 %6074 }
 0x279   : > { %v6095_v2 = vpop.permute.xlu0 %6094  ;;  %v6077_v60 = vunpack.i.h.bf16 %v6075_v10  ;;  %v6076_v32 = vunpack.i.l.bf16 %v6075_v10  ;;  %v7284_v17 = vpop.permute.xlu2 %6134 }
 0x27a   : > { %v6096_v54 = vunpack.i.l.bf16 %v6095_v2  ;;  %v6097_v39 = vunpack.i.h.bf16 %v6095_v2 }
 0x27b   : > { %v1421_v50 = vsel %vm362_vm1, %v6072_v27, %v6076_v32  ;;  %v1422_v33 = vsel %vm362_vm1, %v6076_v32, %v6077_v60  ;;  %v6137_v60 = vunpack.i.h.bf16 %v7284_v17  ;;  %v6136_v32 = vunpack.i.l.bf16 %v7284_v17 }
 0x27c   : > { %v1603_v40 = vsel %vm545_vm3, %v6106_v62, %v6096_v54  ;;  %1472 = vmatpush.msrb.mxu0 %v1421_v50  ;;  %1495 = vmatpush.msrb.mxu1 %v1422_v33  ;;  %v1600_v3 = vsel %vm545_vm3, %v6107_v42, %v6097_v39  ;;  %v1692_v62 = vld [vmem:[#allocation4 + $0xc0] sm:$0xff]  ;;  %v1693_v50 = vld [vmem:[#allocation4 + $0xc8] sm:$0xff] }
 0x27d   : > { %1676 = vmatpush.msrb.mxu3 %v1603_v40 }
 0x27e   : > { %5652 = vmatmul.msk.f32.vlgmr.msra.gmra.mxu3 %vm375_vm2, %v7249_v14  ;;  %1473 = vmatpush.msrb.mxu0 %v1418_v4 }
 0x27f   : > { %1496 = vmatpush.msrb.mxu1 %v1419_v5  ;;  %1677 = vmatpush.msrb.mxu3 %v1600_v3 }
 0x280   : > { %5646 = vmatmul.msk.f32.vlgmr.msrb.gmra.mxu0 %vm375_vm2, %v1383_v55  ;;  %5648 = vmatmul.msk.f32.vlgmr.msrb.gmra.mxu1 %vm375_vm2, %v1383_v55  ;;  %v6090_v6 = vpop.permute.xlu1 %6089 }
 0x281   : > { %v6115_v43 = vpop.permute.xlu0 %6114  ;;  %1570 = vmatpush.msra.mxu0 %v7212_v49  ;;  %1630 = vmatpush.msra.mxu1 %v1601_v15  ;;  %v6092_v7 = vunpack.i.h.bf16 %v6090_v6  ;;  %v6091_v28 = vunpack.i.l.bf16 %v6090_v6  ;;  %v7299_v27 = vpop.permute.xlu2 %6164 }
 0x282   : > { %1854 = vmatpush.msra.mxu3 %v1825_v46  ;;  %v6116_v19 = vunpack.i.l.bf16 %v6115_v43  ;;  %v6117_v8 = vunpack.i.h.bf16 %v6115_v43  ;;  %v6166_v35 = vunpack.i.l.bf16 %v7299_v27  ;;  %v6167_v13 = vunpack.i.h.bf16 %v7299_v27  ;;  %v1805_v46 = vld [vmem:[#allocation4 + $0xd8] sm:$0xff] }
 0x283   : > { %1571 = vmatpush.msra.mxu0 %v7205_v44  ;;  %v1598_v12 = vsel %vm545_vm3, %v6091_v28, %v6092_v7  ;;  %v1599_v29 = vsel %vm545_vm3, %v6092_v7, %v6107_v42  ;;  %v1824_v42 = vsel %vm771_vm5, %v6136_v32, %v6137_v60  ;;  %v7337_v7 = vld [vmem:[#allocation4 + $0xe0] sm:$0xff] }
 0x284   : > { %1631 = vmatpush.msra.mxu1 %v1598_v12  ;;  %1654 = vmatpush.msra.mxu2 %v1599_v29  ;;  %v1710_v9 = vsel %vm658_vm4, %v6112_v22, %v6116_v19  ;;  %v1711_v26 = vsel %vm658_vm4, %v6116_v19, %v6117_v8 }
 0x285   : > { %5658 = vmatmul.msk.f32.vlgmr.msra.gmra.mxu2 %vm375_vm2, %v1580_v25 }
 0x286   : > { %5653 = vmatmul.msk.f32.gmra.mxu3 %vm375_vm2, %v7253_v31 }
 0x288   : > { %5647 = vmatmul.msk.f32.gmra.mxu0 %vm375_vm2, %v1384_v63  ;;  %5649 = vmatmul.msk.f32.gmra.mxu1 %vm375_vm2, %v1384_v63  ;;  %v6100_v44 = vpop.permute.xlu1 %6099 }
 0x289   : > { %v6130_v47 = vpop.permute.xlu0 %6129  ;;  %v6102_v49 = vunpack.i.h.bf16 %v6100_v44  ;;  %v6101_v61 = vunpack.i.l.bf16 %v6100_v44 }
 0x28a   : > { %v6132_v45 = vunpack.i.h.bf16 %v6130_v47  ;;  %v6131_v48 = vunpack.i.l.bf16 %v6130_v47 }
 0x28b   : > { %v1713_v23 = vsel %vm658_vm4, %v6101_v61, %v6102_v49  ;;  %v1714_v30 = vsel %vm658_vm4, %v6102_v49, %v6111_v34 }
 0x28c   : > { %v1822_v11 = vsel %vm771_vm5, %v6131_v48, %v6132_v45  ;;  %1742 = vmatpush.msrb.mxu0 %v1713_v23  ;;  %1765 = vmatpush.msrb.mxu1 %v1714_v30  ;;  %v1823_v33 = vsel %vm771_vm5, %v6132_v45, %v6136_v32  ;;  %v7352_v23 = vld [vmem:[#allocation4 + $0xe8] sm:$0xff] }
 0x28d   : > { %1855 = vmatpush.msra.mxu3 %v1822_v11  ;;  %5659 = vmatmul.msk.f32.gmra.mxu2 %vm375_vm2, %v1581_v20 }
 0x28e   : > { %5660 = vmatmul.msk.f32.vlgmr.msrb.gmra.mxu3 %vm375_vm2, %v1580_v25  ;;  %1743 = vmatpush.msrb.mxu0 %v1710_v9 }
 0x28f   : > { %1766 = vmatpush.msrb.mxu1 %v1711_v26 }
 0x290   : > { %5654 = vmatmul.msk.f32.vlgmr.msra.gmra.mxu0 %vm375_vm2, %v7249_v14  ;;  %5656 = vmatmul.msk.f32.vlgmr.msra.gmra.mxu1 %vm375_vm2, %v1580_v25  ;;  %v6120_v1 = vpop.permute.xlu1 %6119  ;;  %v7313_v14 = vpop.permute.xlu2 %6169 }
 0x291   : > { %v6140_v41 = vpop.permute.xlu0 %6139  ;;  %v6122_v21 = vunpack.i.h.bf16 %v6120_v1  ;;  %v6121_v55 = vunpack.i.l.bf16 %v6120_v1  ;;  %v6172_v28 = vunpack.i.h.bf16 %v7313_v14  ;;  %v6171_v12 = vunpack.i.l.bf16 %v7313_v14 }
 0x292   : > { %v6142_v51 = vunpack.i.h.bf16 %v6140_v41  ;;  %v6141_v36 = vunpack.i.l.bf16 %v6140_v41 }
 0x293   : > { %v1715_v37 = vsel %vm658_vm4, %v6111_v34, %v6121_v55  ;;  %v1712_v53 = vsel %vm658_vm4, %v6117_v8, %v6122_v21 }
 0x294   : > { %v1938_v16 = vsel %vm8170_vm6, %v6142_v51, %v6166_v35  ;;  %1788 = vmatpush.msrb.mxu2 %v1715_v37  ;;  %v1937_v63 = vsel %vm8170_vm6, %v6141_v36, %v6142_v51 }
 0x295   : > { %1989 = vmatpush.msrb.mxu3 %v1938_v16  ;;  %v2028_v16 = vld [vmem:[#allocation4 + $0xf0] sm:$0xff] }
 0x296   : > { %5661 = vmatmul.msk.f32.gmra.mxu3 %vm375_vm2, %v1581_v20  ;;  %1789 = vmatpush.msrb.mxu2 %v1712_v53 }
 0x297   : > { %5666 = vmatmul.msk.f32.vlgmr.msrb.gmra.mxu2 %vm375_vm2, %v1692_v62 }
 0x298   : > { %5655 = vmatmul.msk.f32.gmra.mxu0 %vm375_vm2, %v7253_v31  ;;  %5657 = vmatmul.msk.f32.gmra.mxu1 %vm375_vm2, %v1581_v20  ;;  %v6145_v2 = vpop.permute.xlu1 %6144  ;;  %v1804_v31 = vld [vmem:[#allocation4 + $0xd0] sm:$0xff]  ;;  %v6180_v3 = vpop.permute.xlu2 %6179  ;;  %v2046_v20 = vsel %vm8165_vm7, %v6171_v12, %v6172_v28 }
 0x299   : > { %v6155_v56 = vpop.permute.xlu0 %6154  ;;  %1966 = vmatpush.msra.mxu2 %v1937_v63  ;;  %v6147_v10 = vunpack.i.h.bf16 %v6145_v2  ;;  %v6146_v54 = vunpack.i.l.bf16 %v6145_v2  ;;  %v6182_v48 = vunpack.i.h.bf16 %v6180_v3  ;;  %v6181_v49 = vunpack.i.l.bf16 %v6180_v3  ;;  %v5699_v3 = vld [vmem:[%s8158_s2 + $0x18] sm:$0xff] }
 0x29a   : > { %v6156_v39 = vunpack.i.l.bf16 %v6155_v56  ;;  %v6157_v40 = vunpack.i.h.bf16 %v6155_v56  ;;  %2373 = vperm.xlu1 %6223, %v5699_v3  }
 0x29b   : > { %v1826_v18 = vsel %vm771_vm5, %v6127_v52, %v6146_v54  ;;  %v1827_v0 = vsel %vm771_vm5, %v6146_v54, %v6147_v10  ;;  %v2161_v11 = vsel %vm8164_vm8, %v6181_v49, %v6182_v48 }
 0x29c   : > { %1877 = vmatpush.msra.mxu0 %v1826_v18  ;;  %1900 = vmatpush.msra.mxu1 %v1827_v0  ;;  %v1939_v38 = vsel %vm8170_vm6, %v6166_v35, %v6156_v39  ;;  %v1936_v15 = vsel %vm8170_vm6, %v6167_v13, %v6157_v40 }
 0x29e   : > { %5668 = vmatmul.msk.f32.vlgmr.msra.gmra.mxu3 %vm375_vm2, %v1804_v31  ;;  %1878 = vmatpush.msra.mxu0 %v1823_v33 }
 0x29f   : > { %1901 = vmatpush.msra.mxu1 %v1824_v42  ;;  %5667 = vmatmul.msk.f32.gmra.mxu2 %vm375_vm2, %v1693_v50 }
 0x2a0   : > { %5662 = vmatmul.msk.f32.vlgmr.msrb.gmra.mxu0 %vm375_vm2, %v1692_v62  ;;  %5664 = vmatmul.msk.f32.vlgmr.msrb.gmra.mxu1 %vm375_vm2, %v1692_v62  ;;  %v6150_v59 = vpop.permute.xlu1 %6149  ;;  %v6200_v61 = vpop.permute.xlu2 %6199 }
 0x2a1   : > { %v6185_v52 = vpop.permute.xlu0 %6184  ;;  %2012 = vmatpush.msrb.mxu0 %v1939_v38  ;;  %v6152_v4 = vunpack.i.h.bf16 %v6150_v59  ;;  %v6151_v5 = vunpack.i.l.bf16 %v6150_v59  ;;  %v6201_v30 = vunpack.i.l.bf16 %v6200_v61  ;;  %v6202_v53 = vunpack.i.h.bf16 %v6200_v61 }
 0x2a2   : > { %v6186_v29 = vunpack.i.l.bf16 %v6185_v52  ;;  %v6187_v47 = vunpack.i.h.bf16 %v6185_v52 }
 0x2a3   : > { %2013 = vmatpush.msrb.mxu0 %v1936_v15  ;;  %v1934_v43 = vsel %vm8170_vm6, %v6151_v5, %v6152_v4  ;;  %v1935_v6 = vsel %vm8170_vm6, %v6152_v4, %v6167_v13  ;;  %v2140_v5 = vld [vmem:[#allocation4 + $0x100] sm:$0xff]  ;;  %v2252_v15 = vld [vmem:[#allocation4 + $0x110] sm:$0xff] }
 0x2a4   : > { %1967 = vmatpush.msra.mxu2 %v1934_v43  ;;  %1990 = vmatpush.msrb.mxu3 %v1935_v6  ;;  %v2047_v22 = vsel %vm8165_vm7, %v6172_v28, %v6187_v47  ;;  %v2141_v43 = vld [vmem:[#allocation4 + $0x108] sm:$0xff]  ;;  %v2253_v6 = vld [vmem:[#allocation4 + $0x118] sm:$0xff]  ;;  %v1527_v28 = vpop.f32.mrf.mxu2 }
 0x2a6   : > { %5669 = vmatmul.msk.f32.gmra.mxu3 %vm375_vm2, %v1805_v46 }
 0x2a7   : > { %5674 = vmatmul.msk.f32.vlgmr.msra.gmra.mxu2 %vm375_vm2, %v7337_v7 }
 0x2a8   : > { %5663 = vmatmul.msk.f32.gmra.mxu0 %vm375_vm2, %v1693_v50  ;;  %5665 = vmatmul.msk.f32.gmra.mxu1 %vm375_vm2, %v1693_v50  ;;  %v6160_v17 = vpop.permute.xlu1 %6159  ;;  %v6215_v2 = vpop.permute.xlu2 %6214 }
 0x2a9   : > { %v6190_v25 = vpop.permute.xlu0 %6189  ;;  %v6162_v34 = vunpack.i.h.bf16 %v6160_v17  ;;  %v6161_v19 = vunpack.i.l.bf16 %v6160_v17  ;;  %v6217_v18 = vunpack.i.h.bf16 %v6215_v2  ;;  %v6216_v0 = vunpack.i.l.bf16 %v6215_v2 }
 0x2aa   : > { %v6191_v8 = vunpack.i.l.bf16 %v6190_v25  ;;  %v6192_v14 = vunpack.i.h.bf16 %v6190_v25 }
 0x2ab   : > { %v2049_v44 = vsel %vm8165_vm7, %v6161_v19, %v6162_v34  ;;  %v2050_v45 = vsel %vm8165_vm7, %v6162_v34, %v6186_v29  ;;  %v2275_v42 = vsel %vm8196_vm15, %v6216_v0, %v6217_v18 }
 0x2ac   : > { %2078 = vmatpush.msrb.mxu1 %v2049_v44  ;;  %2101 = vmatpush.msrb.mxu2 %v2050_v45  ;;  %v2162_v9 = vsel %vm8164_vm8, %v6182_v48, %v6191_v8  ;;  %v2163_v26 = vsel %vm8164_vm8, %v6191_v8, %v6201_v30 }
 0x2ae   : > { %5676 = vmatmul.msk.f32.vlgmr.msrb.gmra.mxu3 %vm375_vm2, %v7337_v7  ;;  %2079 = vmatpush.msrb.mxu1 %v2046_v20 }
 0x2af   : > { %2102 = vmatpush.msrb.mxu2 %v2047_v22 }
 0x2b0   : > { %5670 = vmatmul.msk.f32.vlgmr.msra.gmra.mxu0 %vm375_vm2, %v1804_v31  ;;  %5672 = vmatmul.msk.f32.vlgmr.msra.gmra.mxu1 %vm375_vm2, %v1804_v31  ;;  %v6175_v27 = vpop.permute.xlu1 %6174  ;;  %v2029_v31 = vld [vmem:[#allocation4 + $0xf8] sm:$0xff] }
 0x2b1   : > { %5675 = vmatmul.msk.f32.gmra.mxu2 %vm375_vm2, %v7352_v23  ;;  %2190 = vmatpush.msra.mxu0 %v2161_v11  ;;  %v6205_v41 = vpop.permute.xlu0 %6204  ;;  %v6176_v1 = vunpack.i.l.bf16 %v6175_v27  ;;  %v6177_v35 = vunpack.i.h.bf16 %v6175_v27 }
 0x2b2   : > { %2213 = vmatpush.msra.mxu1 %v2162_v9  ;;  %2236 = vmatpush.msra.mxu2 %v2163_v26  ;;  %v6207_v21 = vunpack.i.h.bf16 %v6205_v41  ;;  %v6206_v55 = vunpack.i.l.bf16 %v6205_v41 }
 0x2b3   : > { %v2051_v51 = vsel %vm8165_vm7, %v6186_v29, %v6176_v1  ;;  %v2048_v37 = vsel %vm8165_vm7, %v6187_v47, %v6177_v35  ;;  %v1530_v29 = vpop.f32.mrf.mxu2 }
 0x2b4   : > { %2124 = vmatpush.msra.mxu3 %v2051_v51  ;;  %v2273_v36 = vsel %vm8194_vm14, %v6206_v55, %v6207_v21  ;;  %v2274_v33 = vsel %vm8195_vm9, %v6207_v21, %v6216_v0  ;;  %vm8197_vm14 = vmmov %vm8195_vm9 }
 0x2b6   : > { %5677 = vmatmul.msk.f32.gmra.mxu3 %vm375_vm2, %v7352_v23 }
 0x2b7   : > { %2125 = vmatpush.msra.mxu3 %v2048_v37 }
 0x2b8   : > { %5671 = vmatmul.msk.f32.gmra.mxu0 %vm375_vm2, %v1805_v46  ;;  %5673 = vmatmul.msk.f32.gmra.mxu1 %vm375_vm2, %v1805_v46  ;;  %v6195_v62 = vpop.permute.xlu1 %6194  ;;  %v5698_v46 = vld [vmem:[%s8158_s2 + $0x10] sm:$0xff] }
 0x2b9   : > { %5682 = vmatmul.msk.f32.vlgmr.msrb.gmra.mxu2 %vm375_vm2, %v2028_v16  ;;  %2302 = vmatpush.msrb.mxu3 %v2273_v36  ;;  %v6197_v63 = vunpack.i.h.bf16 %v6195_v62  ;;  %v6196_v56 = vunpack.i.l.bf16 %v6195_v62  ;;  %v6220_v32 = vpop.permute.xlu0 %6219 }
 0x2ba   : > { %v6222_v39 = vunpack.i.h.bf16 %v6220_v32  ;;  %v6221_v50 = vunpack.i.l.bf16 %v6220_v32  ;;  %2368 = vperm.xlu2 %6224, %v5698_v46  }
 0x2bb   : > { %v2158_v10 = vsel %vm8164_vm8, %v6192_v14, %v6196_v56  ;;  %v2159_v54 = vsel %vm8164_vm8, %v6196_v56, %v6197_v63  ;;  %v2160_v60 = vsel %vm8164_vm8, %v6197_v63, %v6202_v53  ;;  %vm8198_vm8 = vmmov %vm8195_vm9 }
 0x2bc   : > { %2191 = vmatpush.msra.mxu0 %v2158_v10  ;;  %2214 = vmatpush.msra.mxu1 %v2159_v54  ;;  %v2272_v52 = vsel %vm8197_vm14, %v6221_v50, %v6222_v39  ;;  %vm8199_vm7 = vmmov %vm8198_vm8 }
 0x2bd   : > { %2237 = vmatpush.msra.mxu2 %v2160_v60 }
 0x2be   : > { %5684 = vmatmul.msk.f32.vlgmr.msra.gmra.mxu3 %vm375_vm2, %v2028_v16 }
 0x2c0   : > { %5678 = vmatmul.msk.f32.vlgmr.msrb.gmra.mxu0 %vm375_vm2, %v7337_v7  ;;  %5680 = vmatmul.msk.f32.vlgmr.msrb.gmra.mxu1 %vm375_vm2, %v2028_v16  ;;  %v6210_v40 = vpop.permute.xlu1 %6209 }
 0x2c1   : > { %5683 = vmatmul.msk.f32.gmra.mxu2 %vm375_vm2, %v2029_v31  ;;  %2325 = vmatpush.msrb.mxu0 %v2274_v33  ;;  %v6212_v13 = vunpack.i.h.bf16 %v6210_v40  ;;  %v6211_v38 = vunpack.i.l.bf16 %v6210_v40 }
 0x2c2   : > { %2348 = vmatpush.msrb.mxu1 %v2275_v42 }
 0x2c3   : > { %v2270_v59 = vsel %vm8198_vm8, %v6211_v38, %v6212_v13  ;;  %v2271_v4 = vsel %vm8199_vm7, %v6212_v13, %v6221_v50  ;;  %vm8201_vm7 = vcmask 752640   ;;  %vm8202_vm8 = vcmask 744448  }
 0x2c4   : > { %2349 = vmatpush.msrb.mxu1 %v2272_v52  ;;  %2303 = vmatpush.msrb.mxu3 %v2270_v59  ;;  %vm8203_vm9 = vmmov %vm8201_vm7 }
 0x2c5   : > { %2326 = vmatpush.msrb.mxu0 %v2271_v4  ;;  %vm8204_vm15 = vmmov %vm8201_vm7 }
 0x2c6   : > { %5685 = vmatmul.msk.f32.gmra.mxu3 %vm375_vm2, %v2029_v31  ;;  %vm8205_vm14 = vmmov %vm8201_vm7 }
 0x2c8   : > { %5679 = vmatmul.msk.f32.gmra.mxu0 %vm375_vm2, %v7352_v23  ;;  %5681 = vmatmul.msk.f32.gmra.mxu1 %vm375_vm2, %v2029_v31 }
 0x2c9   : > { %5690 = vmatmul.msk.f32.vlgmr.msra.gmra.mxu2 %vm375_vm2, %v2140_v5 }
 0x2ce   : > { %5692 = vmatmul.msk.f32.vlgmr.msrb.gmra.mxu3 %vm375_vm2, %v2252_v15 }
 0x2d0   : > { %5686 = vmatmul.msk.f32.vlgmr.msra.gmra.mxu0 %vm375_vm2, %v2140_v5  ;;  %5688 = vmatmul.msk.f32.vlgmr.msra.gmra.mxu1 %vm375_vm2, %v2140_v5 }
 0x2d1   : > { %5691 = vmatmul.msk.f32.gmra.mxu2 %vm375_vm2, %v2141_v43 }
 0x2d6   : > { %5693 = vmatmul.msk.f32.gmra.mxu3 %vm375_vm2, %v2253_v6 }
 0x2d8   : > { %5687 = vmatmul.msk.f32.gmra.mxu0 %vm375_vm2, %v2141_v43  ;;  %5689 = vmatmul.msk.f32.gmra.mxu1 %vm375_vm2, %v2141_v43 }
 0x2e0   : > { %5694 = vmatmul.msk.f32.vlgmr.msrb.gmra.mxu0 %vm375_vm2, %v2252_v15  ;;  %5696 = vmatmul.msk.f32.vlgmr.msrb.gmra.mxu1 %vm375_vm2, %v2252_v15 }
 0x2e8   : > { %5695 = vmatmul.msk.f32.gmra.mxu0 %vm375_vm2, %v2253_v6  ;;  %5697 = vmatmul.msk.f32.gmra.mxu1 %vm375_vm2, %v2253_v6 }
 0x2f1   : > { %v1452_v7 = vpop.f32.mrf.mxu3 }
 0x2f2   : > { %v1528_v0 = vadd.f32 %v1527_v28, %v1452_v7 }
 0x2f9   : > { %v1455_v25 = vpop.f32.mrf.mxu3 }
 0x2fa   : > { %v1531_v32 = vadd.f32 %v1530_v29, %v1455_v25 }
 0x2fd   : > { %v1475_v17 = vpop.f32.mrf.mxu0  ;;  %v7404_v12 = vpop.f32.mrf.mxu1 }
 0x301   : > { %v1550_v34 = vpop.f32.mrf.mxu3 }
 0x302   : > { %v1551_v7 = vadd.f32 %v1550_v34, %v1475_v17 }
 0x305   : > { %v1478_v19 = vpop.f32.mrf.mxu0  ;;  %v1501_v47 = vpop.f32.mrf.mxu1 }
 0x308   : > { %v1656_v44 = vpop.f32.mrf.mxu2 }
 0x309   : > { %v1553_v45 = vpop.f32.mrf.mxu3 }
 0x30a   : > { %v1554_v46 = vadd.f32 %v1553_v45, %v1478_v19 }
 0x30d   : > { %v1573_v48 = vpop.f32.mrf.mxu0  ;;  %v1633_v49 = vpop.f32.mrf.mxu1 }
 0x30e   : > { %v1685_v33 = vadd.f32 %v1633_v49, %v1528_v0  ;;  %v1574_v49 = vadd.f32 %v1573_v48, %v7404_v12 }
 0x310   : > { %v1659_v8 = vpop.f32.mrf.mxu2 }
 0x311   : > { %v1679_v61 = vpop.f32.mrf.mxu3 }
 0x315   : > { %v1576_v20 = vpop.f32.mrf.mxu0  ;;  %v1636_v22 = vpop.f32.mrf.mxu1 }
 0x316   : > { %v1688_v50 = vadd.f32 %v1636_v22, %v1531_v32  ;;  %v1577_v25 = vadd.f32 %v1576_v20, %v1501_v47  ;;  %v2374_v22 = vpop.permute.xlu1 %2373 }
 0x319   : > { %v1682_v23 = vpop.f32.mrf.mxu3 }
 0x31a   : > { %v7406_v30 = vpop.f32.mrf.mxu2 }
 0x31d   : > { %v1745_v11 = vpop.f32.mrf.mxu0  ;;  %v1768_v27 = vpop.f32.mrf.mxu1 }
 0x31e   : > { %v1797_v42 = vadd.f32 %v1745_v11, %v1685_v33  ;;  %v1689_v11 = vadd.f32 %v1659_v8, %v1554_v46 }
 0x321   : > { %v1857_v9 = vpop.f32.mrf.mxu3 }
 0x322   : > { %v1794_v26 = vpop.f32.mrf.mxu2  ;;  %v1909_v52 = vadd.f32 %v1857_v9, %v1797_v42  ;;  %v1686_v9 = vadd.f32 %v1656_v44, %v1551_v7 }
 0x325   : > { %v1748_v41 = vpop.f32.mrf.mxu0  ;;  %v1771_v1 = vpop.f32.mrf.mxu1 }
 0x326   : > { %v1800_v40 = vadd.f32 %v1748_v41, %v1688_v50  ;;  %v1690_v41 = vadd.f32 %v1682_v23, %v1577_v25  ;;  %v1801_v0 = vadd.f32 %v1771_v1, %v1689_v11  ;;  %v1798_v50 = vadd.f32 %v1768_v27, %v1686_v9 }
 0x328   : > { %v1802_v32 = vadd.f32 %v1794_v26, %v1690_v41 }
 0x329   : > { %v1860_v35 = vpop.f32.mrf.mxu3 }
 0x32a   : > { %v1969_v55 = vpop.f32.mrf.mxu2  ;;  %v1912_v38 = vadd.f32 %v1860_v35, %v1800_v40 }
 0x32b   : > { %v2021_v4 = vadd.f32 %v1969_v55, %v1909_v52  ;;  %v1687_v55 = vadd.f32 %v1679_v61, %v1574_v49 }
 0x32d   : > { %v1880_v51 = vpop.f32.mrf.mxu0  ;;  %v1903_v21 = vpop.f32.mrf.mxu1  ;;  %v1799_v17 = vadd.f32 %v7406_v30, %v1687_v55 }
 0x32f   : > { %v1911_v48 = vadd.f32 %v1903_v21, %v1799_v17 }
 0x331   : > { %v7408_v37 = vpop.f32.mrf.mxu3 }
 0x334   : > { %v1972_v62 = vpop.f32.mrf.mxu2 }
 0x335   : > { %v1883_v16 = vpop.f32.mrf.mxu0  ;;  %v1906_v36 = vpop.f32.mrf.mxu1  ;;  %v2024_v59 = vadd.f32 %v1972_v62, %v1912_v38 }
 0x336   : > { %v1913_v34 = vadd.f32 %v1883_v16, %v1801_v0  ;;  %v1914_v45 = vadd.f32 %v1906_v36, %v1802_v32 }
 0x339   : > { %v1995_v53 = vpop.f32.mrf.mxu3 }
 0x33a   : > { %v2025_v8 = vadd.f32 %v1995_v53, %v1913_v34 }
 0x33c   : > { %v2104_v2 = vpop.f32.mrf.mxu2 }
 0x33d   : > { %v2015_v14 = vpop.f32.mrf.mxu0  ;;  %v2081_v63 = vpop.f32.mrf.mxu1 }
 0x33e   : > { %v2133_v43 = vadd.f32 %v2081_v63, %v2021_v4  ;;  %v2023_v27 = vadd.f32 %v2015_v14, %v1911_v48 }
 0x341   : > { %v7410_v56 = vpop.f32.mrf.mxu3 }
 0x342   : > { %v2135_v36 = vadd.f32 %v7410_v56, %v2023_v27 }
 0x344   : > { %v2107_v18 = vpop.f32.mrf.mxu2 }
 0x345   : > { %v2018_v10 = vpop.f32.mrf.mxu0  ;;  %v2084_v54 = vpop.f32.mrf.mxu1  ;;  %v2137_v26 = vadd.f32 %v2107_v18, %v2025_v8  ;;  %v7497_v8 = vld [vmem:[#allocation4 + $0x120] sm:$0xff] }
 0x346   : > { %v2136_v15 = vadd.f32 %v2084_v54, %v2024_v59  ;;  %v2369_v54 = vpop.permute.xlu2 %2368 }
 0x349   : > { %v2130_v60 = vpop.f32.mrf.mxu3 }
 0x34c   : > { %v2239_v6 = vpop.f32.mrf.mxu2 }
 0x34d   : > { %v2193_v31 = vpop.f32.mrf.mxu0  ;;  %v2216_v39 = vpop.f32.mrf.mxu1 }
 0x34e   : > { %v2245_v28 = vadd.f32 %v2193_v31, %v2133_v43  ;;  %v1910_v31 = vadd.f32 %v1880_v51, %v1798_v50 }
 0x350   : > { %v2022_v23 = vadd.f32 %v7408_v37, %v1910_v31 }
 0x351   : > { %v2305_v13 = vpop.f32.mrf.mxu3 }
 0x352   : > { %v2357_v62 = vadd.f32 %v2305_v13, %v2245_v28  ;;  %v2134_v16 = vadd.f32 %v2104_v2, %v2022_v23 }
 0x354   : > { %v2376_v12 = vadd.f32 %v2369_v54, %v2357_v62  ;;  %v2242_v61 = vpop.f32.mrf.mxu2  ;;  %v2246_v40 = vadd.f32 %v2216_v39, %v2134_v16 }
 0x355   : > { %v2196_v5 = vpop.f32.mrf.mxu0  ;;  %v2219_v3 = vpop.f32.mrf.mxu1 }
 0x356   : > { %v2248_v29 = vadd.f32 %v2196_v5, %v2136_v15  ;;  %v2382_v30 = vmax.f32 %v2376_v12, 0.0  ;;  %v2249_v33 = vadd.f32 %v2219_v3, %v2137_v26  ;;  %v5755_v12 = vld [vmem:[%s8158_s2 + $0x28] sm:$0xff] }
 0x358   : > { %v2388_v38 = vsel %vm7141_vm13, %v2382_v30, 0.0 }
 0x359   : > { %v2308_v57 = vpop.f32.mrf.mxu3 }
 0x35a   : > { %v2360_v35 = vadd.f32 %v2308_v57, %v2248_v29  ;;  %v2026_v57 = vadd.f32 %v2018_v10, %v1914_v45  ;;  %v2247_v10 = vadd.f32 %v2239_v6, %v2135_v36 }
 0x35c   : > { %v2379_v63 = vadd.f32 %v2374_v22, %v2360_v35  ;;  %v2138_v1 = vadd.f32 %v2130_v60, %v2026_v57  ;;  %v7501_v57 = vld [vmem:[#allocation4 + $0x128] sm:$0xff] }
 0x35d   : > { %v2328_v19 = vpop.f32.mrf.mxu0  ;;  %v2351_v47 = vpop.f32.mrf.mxu1 }
 0x35e   : > { %v2385_v20 = vmax.f32 %v2379_v63, 0.0  ;;  %v2250_v51 = vadd.f32 %v2242_v61, %v2138_v1  ;;  %v2358_v52 = vadd.f32 %v2328_v19, %v2246_v40  ;;  %v2359_v37 = vadd.f32 %v2351_v47, %v2247_v10 }
 0x360   : > { %v2391_v44 = vsel %vm7141_vm13, %v2385_v20, 0.0  ;;  %v2377_v56 = vadd.f32 %v2369_v54, %v2358_v52  ;;  %v2378_v59 = vadd.f32 %v2369_v54, %v2359_v37 }
 0x361   : > { %2406 = vrot.lane.b32.xlu0 %v2391_v44, %s6761_s6 }
 0x362   : > { %v2384_v3 = vmax.f32 %v2378_v59, 0.0  ;;  %v2383_v15 = vmax.f32 %v2377_v56, 0.0 }
 0x364   : > { %v2390_v43 = vsel %vm7170_vm12, %v2384_v3, 0.0  ;;  %v2389_v6 = vsel %vm7166_vm11, %v2383_v15, 0.0 }
 0x365   : > { %v2331_v21 = vpop.f32.mrf.mxu0  ;;  %v2354_v53 = vpop.f32.mrf.mxu1 }
 0x366   : > { %v2361_v42 = vadd.f32 %v2331_v21, %v2249_v33  ;;  %v2362_v13 = vadd.f32 %v2354_v53, %v2250_v51  ;;  %v2442_v21 = vld [vmem:[#allocation4 + $0x130] sm:$0xff] }
 0x368   : > { %v2380_v14 = vadd.f32 %v2374_v22, %v2361_v42  ;;  %v2381_v18 = vadd.f32 %v2374_v22, %v2362_v13 }
 0x369   : > { %2400 = vrot.lane.b32.xlu0 %v2388_v38, %s6761_s6 }
 0x36a   : > { %v2387_v2 = vmax.f32 %v2381_v18, 0.0  ;;  %v2386_v60 = vmax.f32 %v2380_v14, 0.0 }
 0x36c   : > { %v2393_v4 = vsel %vm7170_vm12, %v2387_v2, 0.0  ;;  %v2392_v39 = vsel %vm7166_vm11, %v2386_v60, 0.0 }
 0x36d   : > { %2410 = vrot.lane.b32.xlu2 %v2393_v4, %s6761_s6  ;;  %2408 = vrot.lane.b32.xlu1 %v2392_v39, %s6761_s6  ;;  %v2443_v4 = vld [vmem:[#allocation4 + $0x138] sm:$0xff] }
 0x375   : > { %2404 = vrot.lane.b32.xlu2 %v2390_v43, %s6761_s6  ;;  %2402 = vrot.lane.b32.xlu1 %v2389_v6, %s6761_s6 }
 0x3c7   : > { %v2411_v46 = vpop.permute.xlu2 %2410 }
 0x3c8   : > { %2431 = vst.msk [vmem:[#allocation2 + $0x38] sm:$0xff] %vm198_vm0, %v2411_v46 }
 0x3cf   : > { %v2405_v25 = vpop.permute.xlu2 %2404  ;;  %v2451_v54 = vld [vmem:[#allocation2 + $0x38] sm:$0xff] }
 0x3d0   : > { %2427 = vst.msk [vmem:[#allocation2 + $0x18] sm:$0xff] %vm198_vm0, %v2405_v25 }
 0x3d3   : > { %v2407_v29 = vpop.permute.xlu0 %2406 }
 0x3d4   : > { %2428 = vst.msk [vmem:[#allocation2 + $0x20] sm:$0xff] %vm201_vm10, %v2407_v29 }
 0x3d7   : > { %v2447_v62 = vld [vmem:[#allocation2 + $0x18] sm:$0xff] }
 0x3d8   : > { %v6240_v63 = vpack.i.bf16 %v2447_v62, %v2451_v54 }
 0x3db   : > { %v2401_v7 = vpop.permute.xlu0 %2400  ;;  %v2438_v28 = vld [vmem:[#allocation2 + $0x20] sm:$0xff] }
 0x3dc   : > { %2424 = vst.msk [vmem:[#allocation2] sm:$0xff] %vm201_vm10, %v2401_v7  ;;  %2583 = vmatpush.msra.mxu1 %v2438_v28 }
 0x3df   : > { %v2409_v22 = vpop.permute.xlu1 %2408 }
 0x3e0   : > { %v7439_v49 = vsel %vm198_vm0, %v2407_v29, %v2409_v22  ;;  %v7443_v41 = vsel %vm198_vm0, %v2409_v22, %v2411_v46 }
 0x3e1   : > { %v6225_v11 = vpack.i.bf16 %v7439_v49, %v2438_v28  ;;  %v6260_v19 = vpack.i.bf16 %v2451_v54, %v7443_v41  ;;  %v6315_v45 = vpack.i.bf16 %v7443_v41, %v7439_v49 }
 0x3e3   : > { %v2435_v35 = vld [vmem:[#allocation2] sm:$0xff]  ;;  %6226 = vrot.lane.b32.xlu0 %v6225_v11, %s6752_s21 }
 0x3e4   : > { %2584 = vmatpush.msra.mxu1 %v2435_v35  ;;  %v6230_v9 = vpack.i.bf16 %v2435_v35, %v7443_v41  ;;  %v6320_v31 = vpack.i.bf16 %v2435_v35, %v2438_v28 }
 0x3e5   : > { %5706 = vmatmul.msk.f32.vlgmr.msra.gmra.mxu1 %vm375_vm2, %v7497_v8 }
 0x3e6   : > { %6231 = vrot.lane.b32.xlu1 %v6230_v9, %s6752_s21 }
 0x3e7   : > { %v2403_v55 = vpop.permute.xlu1 %2402 }
 0x3e8   : > { %v7449_v32 = vsel %vm198_vm0, %v2401_v7, %v2403_v55  ;;  %v7452_v0 = vsel %vm198_vm0, %v2403_v55, %v2405_v25  ;;  %v2639_v55 = vld [vmem:[#allocation4 + $0x140] sm:$0xff] }
 0x3e9   : > { %v6235_v50 = vpack.i.bf16 %v7452_v0, %v7449_v32  ;;  %v6245_v47 = vpack.i.bf16 %v7449_v32, %v2435_v35  ;;  %v6250_v17 = vpack.i.bf16 %v2447_v62, %v7452_v0  ;;  %v6275_v34 = vpack.i.bf16 %v7452_v0, %v7443_v41 }
 0x3ea   : > { %v6305_v20 = vpack.i.bf16 %v7449_v32, %v2451_v54 }
 0x3eb   : > { %6241 = vrot.lane.b32.xlu0 %v6240_v63, %s6752_s21  ;;  %6236 = vrot.lane.b32.xlu2 %v6235_v50, %s6752_s21 }
 0x3ed   : > { %5707 = vmatmul.msk.f32.gmra.mxu1 %vm375_vm2, %v7501_v57 }
 0x3ee   : > { %6256 = vrot.lane.b32.xlu1 %v6225_v11, %s6753_s22 }
 0x3f3   : > { %6261 = vrot.lane.b32.xlu0 %v6260_v19, %s6753_s22  ;;  %6246 = vrot.lane.b32.xlu2 %v6245_v47, %s6753_s22 }
 0x3f6   : > { %6271 = vrot.lane.b32.xlu1 %v6225_v11, %s6754_s27 }
 0x3fb   : > { %6266 = vrot.lane.b32.xlu0 %v6245_v47, %s6754_s27  ;;  %6251 = vrot.lane.b32.xlu2 %v6250_v17, %s6753_s22 }
 0x3fe   : > { %6276 = vrot.lane.b32.xlu1 %v6275_v34, %s6754_s27 }
 0x403   : > { %6296 = vrot.lane.b32.xlu0 %v6230_v9, %s6755_s28  ;;  %6286 = vrot.lane.b32.xlu2 %v6225_v11, %s6755_s28 }
 0x406   : > { %6281 = vrot.lane.b32.xlu1 %v6235_v50, %s6755_s28 }
 0x40b   : > { %6301 = vrot.lane.b32.xlu0 %v6240_v63, %s6755_s28  ;;  %6291 = vrot.lane.b32.xlu2 %v6240_v63, %s6754_s27 }
 0x40e   : > { %6316 = vrot.lane.b32.xlu1 %v6315_v45, %s6756_s29 }
 0x413   : > { %6311 = vrot.lane.b32.xlu0 %v6250_v17, %s6756_s29  ;;  %6306 = vrot.lane.b32.xlu2 %v6305_v20, %s6756_s29 }
 0x416   : > { %6321 = vrot.lane.b32.xlu1 %v6320_v31, %s6756_s29 }
 0x41b   : > { %6326 = vrot.lane.b32.xlu0 %v6245_v47, %s6757_s30  ;;  %6336 = vrot.lane.b32.xlu2 %v6225_v11, %s6757_s30 }
 0x41e   : > { %6341 = vrot.lane.b32.xlu1 %v6260_v19, %s6757_s30 }
 0x423   : > { %6331 = vrot.lane.b32.xlu0 %v6250_v17, %s6757_s30  ;;  %6351 = vrot.lane.b32.xlu2 %v6225_v11, %s6758_s4 }
 0x426   : > { %6346 = vrot.lane.b32.xlu1 %v6245_v47, %s6758_s4 }
 0x42b   : > { %6366 = vrot.lane.b32.xlu0 %v6225_v11, %s6759_s5  ;;  %6356 = vrot.lane.b32.xlu2 %v6275_v34, %s6758_s4 }
 0x42e   : > { %6376 = vrot.lane.b32.xlu1 %v6230_v9, %s6759_s5 }
 0x433   : > { %6371 = vrot.lane.b32.xlu0 %v6240_v63, %s6758_s4  ;;  %6361 = vrot.lane.b32.xlu2 %v6235_v50, %s6759_s5 }
 0x436   : > { %6381 = vrot.lane.b32.xlu1 %v6240_v63, %s6759_s5 }
 0x43b   : > { %3432 = vperm.xlu2 %6224, %v5755_v12  }
 0x445   : > { %v6237_v48 = vpop.permute.xlu2 %6236 }
 0x446   : > { %v6239_v16 = vunpack.i.h.bf16 %v6237_v48  ;;  %v6238_v36 = vunpack.i.l.bf16 %v6237_v48 }
 0x448   : > { %v2477_v40 = vsel %vm362_vm1, %v6238_v36, %v6239_v16 }
 0x44d   : > { %v7503_v44 = vpop.permute.xlu2 %6246 }
 0x44e   : > { %v6249_v18 = vunpack.i.h.bf16 %v7503_v44  ;;  %v6248_v2 = vunpack.i.l.bf16 %v7503_v44  ;;  %v2640_v44 = vld [vmem:[#allocation4 + $0x148] sm:$0xff] }
 0x450   : > { %v2657_v15 = vsel %vm545_vm3, %v6248_v2, %v6249_v18 }
 0x455   : > { %v6227_v61 = vpop.permute.xlu0 %6226  ;;  %v6252_v23 = vpop.permute.xlu2 %6251 }
 0x456   : > { %v6229_v27 = vunpack.i.h.bf16 %v6227_v61  ;;  %v6228_v26 = vunpack.i.l.bf16 %v6227_v61  ;;  %v6254_v43 = vunpack.i.h.bf16 %v6252_v23  ;;  %v6253_v6 = vunpack.i.l.bf16 %v6252_v23 }
 0x458   : > { %v6232_v1 = vpop.permute.xlu1 %6231  ;;  %v2479_v30 = vsel %vm362_vm1, %v6228_v26, %v6229_v27  ;;  %v2658_v9 = vsel %vm545_vm3, %v6249_v18, %v6253_v6  ;;  %v2659_v62 = vsel %vm545_vm3, %v6253_v6, %v6254_v43 }
 0x459   : > { %v6234_v51 = vunpack.i.h.bf16 %v6232_v1  ;;  %v6233_v33 = vunpack.i.l.bf16 %v6232_v1  ;;  %2508 = vmatpush.msrb.mxu2 %v2479_v30 }
 0x45b   : > { %v2480_v53 = vsel %vm362_vm1, %v6229_v27, %v6233_v33  ;;  %v2476_v10 = vsel %vm362_vm1, %v6234_v51, %v6238_v36 }
 0x45c   : > { %2531 = vmatpush.msra.mxu3 %v2480_v53  ;;  %2509 = vmatpush.msrb.mxu2 %v2476_v10  ;;  %v2751_v53 = vld [vmem:[#allocation4 + $0x150] sm:$0xff] }
 0x45d   : > { %5700 = vmatmul.msk.f32.vlgmr.msrb.gmra.mxu2 %vm375_vm2, %v2442_v21  ;;  %v6242_v42 = vpop.permute.xlu0 %6241  ;;  %v7512_v13 = vpop.permute.xlu2 %6286 }
 0x45e   : > { %2532 = vmatpush.msra.mxu3 %v2477_v40  ;;  %2606 = vmatpush.msra.mxu2 %v7439_v49  ;;  %v6244_v38 = vunpack.i.h.bf16 %v6242_v42  ;;  %v6243_v52 = vunpack.i.l.bf16 %v6242_v42  ;;  %v6289_v49 = vunpack.i.h.bf16 %v7512_v13  ;;  %v6288_v11 = vunpack.i.l.bf16 %v7512_v13 }
 0x45f   : > { %5702 = vmatmul.msk.f32.vlgmr.msra.gmra.mxu3 %vm375_vm2, %v2442_v21 }
 0x460   : > { %2629 = vmatpush.msrb.mxu3 %v7443_v41  ;;  %v6257_v37 = vpop.permute.xlu1 %6256  ;;  %2607 = vmatpush.msra.mxu2 %v7449_v32  ;;  %v2481_v14 = vsel %vm362_vm1, %v6233_v33, %v6243_v52  ;;  %v2478_v59 = vsel %vm362_vm1, %v6239_v16, %v6244_v38 }
 0x461   : > { %v6259_v60 = vunpack.i.h.bf16 %v6257_v37  ;;  %v6258_v56 = vunpack.i.l.bf16 %v6257_v37  ;;  %2554 = vmatpush.msra.mxu0 %v2481_v14 }
 0x462   : > { %2630 = vmatpush.msrb.mxu3 %v7452_v0  ;;  %v2884_v0 = vsel %vm771_vm5, %v6288_v11, %v6289_v49 }
 0x463   : > { %2555 = vmatpush.msra.mxu0 %v2478_v59  ;;  %v2660_v39 = vsel %vm545_vm3, %v6258_v56, %v6259_v60 }
 0x464   : > { %5704 = vmatmul.msk.f32.vlgmr.msra.gmra.mxu0 %vm375_vm2, %v2442_v21 }
 0x465   : > { %5701 = vmatmul.msk.f32.gmra.mxu2 %vm375_vm2, %v2443_v4  ;;  %2689 = vmatpush.msrb.mxu0 %v2660_v39  ;;  %v6262_v3 = vpop.permute.xlu0 %6261  ;;  %v6292_v29 = vpop.permute.xlu2 %6291 }
 0x466   : > { %v6264_v46 = vunpack.i.h.bf16 %v6262_v3  ;;  %v6263_v25 = vunpack.i.l.bf16 %v6262_v3  ;;  %v6293_v34 = vunpack.i.l.bf16 %v6292_v29  ;;  %v6294_v31 = vunpack.i.h.bf16 %v6292_v29 }
 0x467   : > { %5703 = vmatmul.msk.f32.gmra.mxu3 %vm375_vm2, %v2443_v4  ;;  %2690 = vmatpush.msrb.mxu0 %v2657_v15 }
 0x468   : > { %v6272_v7 = vpop.permute.xlu1 %6271  ;;  %v2661_v28 = vsel %vm545_vm3, %v6259_v60, %v6263_v25  ;;  %v2662_v22 = vsel %vm545_vm3, %v6263_v25, %v6264_v46 }
 0x469   : > { %v6274_v41 = vunpack.i.h.bf16 %v6272_v7  ;;  %v6273_v35 = vunpack.i.l.bf16 %v6272_v7  ;;  %2712 = vmatpush.msrb.mxu1 %v2661_v28  ;;  %2735 = vmatpush.msrb.mxu2 %v2662_v22  ;;  %v2863_v22 = vld [vmem:[#allocation4 + $0x160] sm:$0xff] }
 0x46b   : > { %v2772_v32 = vsel %vm658_vm4, %v6273_v35, %v6274_v41  ;;  %2713 = vmatpush.msrb.mxu1 %v2658_v9  ;;  %2736 = vmatpush.msrb.mxu2 %v2659_v62  ;;  %v2975_v35 = vld [vmem:[#allocation4 + $0x170] sm:$0xff] }
 0x46c   : > { %2801 = vmatpush.msra.mxu3 %v2772_v32  ;;  %5705 = vmatmul.msk.f32.gmra.mxu0 %vm375_vm2, %v2443_v4  ;;  %v2752_v4 = vld [vmem:[#allocation4 + $0x158] sm:$0xff] }
 0x46d   : > { %5708 = vmatmul.msk.f32.vlgmr.msra.gmra.mxu2 %vm375_vm2, %v7497_v8  ;;  %v6267_v54 = vpop.permute.xlu0 %6266  ;;  %5714 = vmatmul.msk.f32.vlgmr.msrb.gmra.mxu1 %vm375_vm2, %v2639_v55  ;;  %v7542_v19 = vpop.permute.xlu2 %6306 }
 0x46e   : > { %2913 = vmatpush.msra.mxu2 %v2884_v0  ;;  %v6269_v63 = vunpack.i.h.bf16 %v6267_v54  ;;  %v6268_v50 = vunpack.i.l.bf16 %v6267_v54  ;;  %v6308_v42 = vunpack.i.l.bf16 %v7542_v19  ;;  %v6309_v15 = vunpack.i.h.bf16 %v7542_v19 }
 0x46f   : > { %5710 = vmatmul.msk.f32.vlgmr.msrb.gmra.mxu3 %vm375_vm2, %v7497_v8 }
 0x470   : > { %v6277_v47 = vpop.permute.xlu1 %6276  ;;  %v2769_v17 = vsel %vm658_vm4, %v6268_v50, %v6269_v63 }
 0x471   : > { %v6279_v45 = vunpack.i.h.bf16 %v6277_v47  ;;  %v6278_v20 = vunpack.i.l.bf16 %v6277_v47  ;;  %2802 = vmatpush.msra.mxu3 %v2769_v17 }
 0x473   : > { %v2773_v12 = vsel %vm658_vm4, %v6274_v41, %v6278_v20  ;;  %v2774_v48 = vsel %vm658_vm4, %v6278_v20, %v6293_v34  ;;  %v2770_v61 = vsel %vm658_vm4, %v6269_v63, %v6279_v45  ;;  %v2771_v8 = vsel %vm658_vm4, %v6279_v45, %v6294_v31  ;;  %v2864_v34 = vld [vmem:[#allocation4 + $0x168] sm:$0xff]  ;;  %v2976_v31 = vld [vmem:[#allocation4 + $0x178] sm:$0xff] }
 0x474   : > { %2824 = vmatpush.msra.mxu0 %v2773_v12  ;;  %2847 = vmatpush.msra.mxu1 %v2774_v48 }
 0x475   : > { %5709 = vmatmul.msk.f32.gmra.mxu2 %vm375_vm2, %v7501_v57  ;;  %5712 = vmatmul.msk.f32.vlgmr.msrb.gmra.mxu0 %vm375_vm2, %v2639_v55  ;;  %v6297_v23 = vpop.permute.xlu0 %6296  ;;  %v7556_v51 = vpop.permute.xlu2 %6336 }
 0x476   : > { %2825 = vmatpush.msra.mxu0 %v2770_v61  ;;  %2848 = vmatpush.msra.mxu1 %v2771_v8  ;;  %v6298_v27 = vunpack.i.l.bf16 %v6297_v23  ;;  %v6299_v30 = vunpack.i.h.bf16 %v6297_v23  ;;  %v6339_v52 = vunpack.i.h.bf16 %v7556_v51  ;;  %v6338_v37 = vunpack.i.l.bf16 %v7556_v51  ;;  %v3087_v51 = vld [vmem:[#allocation4 + $0x180] sm:$0xff] }
 0x477   : > { %5711 = vmatmul.msk.f32.gmra.mxu3 %vm375_vm2, %v7501_v57  ;;  %5715 = vmatmul.msk.f32.gmra.mxu1 %vm375_vm2, %v2640_v44 }
 0x478   : > { %v6282_v26 = vpop.permute.xlu1 %6281  ;;  %v2885_v1 = vsel %vm771_vm5, %v6289_v49, %v6298_v27  ;;  %v3108_v39 = vsel %vm8201_vm7, %v6338_v37, %v6339_v52  ;;  %vm8206_vm7 = vmmov %vm8202_vm8 }
 0x479   : > { %v6284_v16 = vunpack.i.h.bf16 %v6282_v26  ;;  %v6283_v36 = vunpack.i.l.bf16 %v6282_v26  ;;  %2936 = vmatpush.msrb.mxu3 %v2885_v1 }
 0x47b   : > { %v2881_v33 = vsel %vm771_vm5, %v6299_v30, %v6283_v36  ;;  %v2882_v21 = vsel %vm771_vm5, %v6283_v36, %v6284_v16 }
 0x47c   : > { %2914 = vmatpush.msra.mxu2 %v2881_v33  ;;  %2937 = vmatpush.msrb.mxu3 %v2882_v21 }
 0x47d   : > { %5713 = vmatmul.msk.f32.gmra.mxu0 %vm375_vm2, %v2640_v44  ;;  %5716 = vmatmul.msk.f32.vlgmr.msrb.gmra.mxu2 %vm375_vm2, %v2639_v55  ;;  %v6302_v57 = vpop.permute.xlu0 %6301  ;;  %v6352_v59 = vpop.permute.xlu2 %6351 }
 0x47e   : > { %v6304_v10 = vunpack.i.h.bf16 %v6302_v57  ;;  %v6303_v40 = vunpack.i.l.bf16 %v6302_v57  ;;  %v6354_v49 = vunpack.i.h.bf16 %v6352_v59  ;;  %v6353_v11 = vunpack.i.l.bf16 %v6352_v59 }
 0x47f   : > { %5718 = vmatmul.msk.f32.vlgmr.msra.gmra.mxu3 %vm375_vm2, %v2751_v53  ;;  %5722 = vmatmul.msk.f32.vlgmr.msra.gmra.mxu1 %vm375_vm2, %v2751_v53 }
 0x480   : > { %v6317_v13 = vpop.permute.xlu1 %6316  ;;  %v2886_v38 = vsel %vm771_vm5, %v6298_v27, %v6303_v40  ;;  %v2883_v2 = vsel %vm771_vm5, %v6284_v16, %v6304_v10  ;;  %v3220_v54 = vsel %vm8202_vm8, %v6353_v11, %v6354_v49  ;;  %vm8207_vm8 = vmmov %vm8203_vm9 }
 0x481   : > { %v6319_v14 = vunpack.i.h.bf16 %v6317_v13  ;;  %v6318_v18 = vunpack.i.l.bf16 %v6317_v13  ;;  %2959 = vmatpush.msrb.mxu0 %v2886_v38 }
 0x483   : > { %v2997_v60 = vsel %vm8170_vm6, %v6318_v18, %v6319_v14  ;;  %v2998_v56 = vsel %vm8170_vm6, %v6319_v14, %v6308_v42  ;;  %2960 = vmatpush.msrb.mxu0 %v2883_v2 }
 0x484   : > { %3048 = vmatpush.msrb.mxu2 %v2997_v60  ;;  %3071 = vmatpush.msra.mxu3 %v2998_v56 }
 0x485   : > { %5717 = vmatmul.msk.f32.gmra.mxu2 %vm375_vm2, %v2640_v44  ;;  %5720 = vmatmul.msk.f32.vlgmr.msra.gmra.mxu0 %vm375_vm2, %v2751_v53  ;;  %v6312_v3 = vpop.permute.xlu0 %6311  ;;  %v7583_v55 = vpop.permute.xlu2 %6356 }
 0x486   : > { %3137 = vmatpush.msra.mxu0 %v3108_v39  ;;  %v6314_v43 = vunpack.i.h.bf16 %v6312_v3  ;;  %v6313_v6 = vunpack.i.l.bf16 %v6312_v3  ;;  %v6358_v19 = vunpack.i.l.bf16 %v7583_v55  ;;  %v6359_v26 = vunpack.i.h.bf16 %v7583_v55 }
 0x487   : > { %5719 = vmatmul.msk.f32.gmra.mxu3 %vm375_vm2, %v2752_v4  ;;  %5723 = vmatmul.msk.f32.gmra.mxu1 %vm375_vm2, %v2752_v4 }
 0x488   : > { %v6322_v46 = vpop.permute.xlu1 %6321  ;;  %v2994_v25 = vsel %vm8170_vm6, %v6309_v15, %v6313_v6  ;;  %v2995_v29 = vsel %vm8170_vm6, %v6313_v6, %v6314_v43  ;;  %v3221_v12 = vsel %vm8206_vm7, %v6354_v49, %v6358_v19  ;;  %v2586_v49 = vpop.f32.mrf.mxu1 }
 0x489   : > { %v6324_v7 = vunpack.i.h.bf16 %v6322_v46  ;;  %v6323_v28 = vunpack.i.l.bf16 %v6322_v46  ;;  %3049 = vmatpush.msrb.mxu2 %v2994_v25  ;;  %3072 = vmatpush.msra.mxu3 %v2995_v29  ;;  %v3199_v46 = vld [vmem:[#allocation4 + $0x190] sm:$0xff]  ;;  %v5754_v29 = vld [vmem:[%s8158_s2 + $0x20] sm:$0xff] }
 0x48a   : > { %3427 = vperm.xlu0 %6385, %v5754_v29  }
 0x48b   : > { %v2996_v41 = vsel %vm8170_vm6, %v6323_v28, %v6318_v18  ;;  %v2993_v9 = vsel %vm8170_vm6, %v6324_v7, %v6309_v15  ;;  %v3088_v18 = vld [vmem:[#allocation4 + $0x188] sm:$0xff]  ;;  %v3200_v7 = vld [vmem:[#allocation4 + $0x198] sm:$0xff]  ;;  %v3311_v28 = vld [vmem:[#allocation4 + $0x1a0] sm:$0xff] }
 0x48c   : > { %3025 = vmatpush.msrb.mxu1 %v2996_v41 }
 0x48d   : > { %5721 = vmatmul.msk.f32.gmra.mxu0 %vm375_vm2, %v2752_v4  ;;  %5724 = vmatmul.msk.f32.vlgmr.msra.gmra.mxu2 %vm375_vm2, %v2863_v22  ;;  %v6327_v62 = vpop.permute.xlu0 %6326  ;;  %v6362_v21 = vpop.permute.xlu2 %6361 }
 0x48e   : > { %3026 = vmatpush.msrb.mxu1 %v2993_v9  ;;  %v6329_v32 = vunpack.i.h.bf16 %v6327_v62  ;;  %v6328_v0 = vunpack.i.l.bf16 %v6327_v62  ;;  %v6364_v42 = vunpack.i.h.bf16 %v6362_v21  ;;  %v6363_v13 = vunpack.i.l.bf16 %v6362_v21 }
 0x48f   : > { %5726 = vmatmul.msk.f32.vlgmr.msrb.gmra.mxu3 %vm375_vm2, %v2863_v22  ;;  %5730 = vmatmul.msk.f32.vlgmr.msrb.gmra.mxu1 %vm375_vm2, %v2975_v35 }
 0x490   : > { %3249 = vmatpush.msrb.mxu3 %v3220_v54  ;;  %v6342_v63 = vpop.permute.xlu1 %6341  ;;  %v3105_v50 = vsel %vm8203_vm9, %v6328_v0, %v6329_v32  ;;  %vm8208_vm9 = vmmov %vm8207_vm8 }
 0x491   : > { %v6344_v47 = vunpack.i.h.bf16 %v6342_v63  ;;  %v6343_v17 = vunpack.i.l.bf16 %v6342_v63  ;;  %3138 = vmatpush.msra.mxu0 %v3105_v50 }
 0x493   : > { %v3109_v45 = vsel %vm8204_vm15, %v6339_v52, %v6343_v17  ;;  %v3110_v20 = vsel %vm8205_vm14, %v6343_v17, %v6344_v47  ;;  %vm8209_vm15 = vmmov %vm8206_vm7 }
 0x494   : > { %3160 = vmatpush.msra.mxu1 %v3109_v45  ;;  %3183 = vmatpush.msra.mxu2 %v3110_v20  ;;  %vm8210_vm14 = vmmov %vm8206_vm7  ;;  %vm8211_vm7 = vcmask 736256  }
 0x495   : > { %5725 = vmatmul.msk.f32.gmra.mxu2 %vm375_vm2, %v2864_v34  ;;  %5728 = vmatmul.msk.f32.vlgmr.msrb.gmra.mxu0 %vm375_vm2, %v2863_v22  ;;  %v6332_v48 = vpop.permute.xlu0 %6331  ;;  %v3312_v22 = vld [vmem:[#allocation4 + $0x1a8] sm:$0xff] }
 0x496   : > { %3272 = vmatpush.msrb.mxu0 %v3221_v12  ;;  %v6334_v44 = vunpack.i.h.bf16 %v6332_v48  ;;  %v6333_v61 = vunpack.i.l.bf16 %v6332_v48 }
 0x497   : > { %5727 = vmatmul.msk.f32.gmra.mxu3 %vm375_vm2, %v2864_v34  ;;  %5731 = vmatmul.msk.f32.gmra.mxu1 %vm375_vm2, %v2976_v31 }
 0x498   : > { %v6347_v8 = vpop.permute.xlu1 %6346  ;;  %v3106_v23 = vsel %vm8207_vm8, %v6329_v32, %v6333_v61  ;;  %v3107_v27 = vsel %vm8208_vm9, %v6333_v61, %v6334_v44  ;;  %vm8212_vm8 = vmmov %vm8211_vm7 }
 0x499   : > { %v6349_v1 = vunpack.i.h.bf16 %v6347_v8  ;;  %v6348_v30 = vunpack.i.l.bf16 %v6347_v8  ;;  %3161 = vmatpush.msra.mxu1 %v3106_v23  ;;  %3184 = vmatpush.msra.mxu2 %v3107_v27  ;;  %vm8213_vm9 = vmmov %vm8211_vm7 }
 0x49b   : > { %v3217_v16 = vsel %vm8209_vm15, %v6348_v30, %v6349_v1  ;;  %v3218_v36 = vsel %vm8210_vm14, %v6349_v1, %v6359_v26  ;;  %vm8214_vm15 = vmmov %vm8211_vm7 }
 0x49c   : > { %3250 = vmatpush.msrb.mxu3 %v3217_v16  ;;  %3273 = vmatpush.msrb.mxu0 %v3218_v36  ;;  %v3330_v2 = vsel %vm8214_vm15, %v6363_v13, %v6364_v42  ;;  %vm8218_vm15 = vcmask 752640  }
 0x49d   : > { %5729 = vmatmul.msk.f32.gmra.mxu0 %vm375_vm2, %v2864_v34  ;;  %5732 = vmatmul.msk.f32.vlgmr.msrb.gmra.mxu2 %vm375_vm2, %v2975_v35  ;;  %v6367_v33 = vpop.permute.xlu0 %6366 }
 0x49e   : > { %v6369_v53 = vunpack.i.h.bf16 %v6367_v33  ;;  %v6368_v57 = vunpack.i.l.bf16 %v6367_v33 }
 0x49f   : > { %5734 = vmatmul.msk.f32.vlgmr.msra.gmra.mxu3 %vm375_vm2, %v2975_v35  ;;  %5738 = vmatmul.msk.f32.vlgmr.msra.gmra.mxu1 %vm375_vm2, %v3087_v51  ;;  %v2589_v35 = vpop.f32.mrf.mxu1 }
 0x4a0   : > { %v6377_v10 = vpop.permute.xlu1 %6376  ;;  %v3332_v40 = vsel %vm8211_vm7, %v6368_v57, %v6369_v53  ;;  %vm8215_vm7 = vmmov %vm8210_vm14 }
 0x4a1   : > { %v6379_v38 = vunpack.i.h.bf16 %v6377_v10  ;;  %v6378_v52 = vunpack.i.l.bf16 %v6377_v10  ;;  %3361 = vmatpush.msrb.mxu2 %v3332_v40 }
 0x4a3   : > { %v3333_v37 = vsel %vm8212_vm8, %v6369_v53, %v6378_v52  ;;  %v3329_v14 = vsel %vm8213_vm9, %v6379_v38, %v6363_v13  ;;  %vm8216_vm9 = vmmov %vm8212_vm8 }
 0x4a4   : > { %3384 = vmatpush.msra.mxu3 %v3333_v37  ;;  %3362 = vmatpush.msrb.mxu2 %v3329_v14 }
 0x4a5   : > { %5733 = vmatmul.msk.f32.gmra.mxu2 %vm375_vm2, %v2976_v31  ;;  %5736 = vmatmul.msk.f32.vlgmr.msra.gmra.mxu0 %vm375_vm2, %v3087_v51  ;;  %v6372_v60 = vpop.permute.xlu0 %6371 }
 0x4a6   : > { %3385 = vmatpush.msra.mxu3 %v3330_v2  ;;  %v6374_v56 = vunpack.i.h.bf16 %v6372_v60  ;;  %v6373_v59 = vunpack.i.l.bf16 %v6372_v60 }
 0x4a7   : > { %5735 = vmatmul.msk.f32.gmra.mxu3 %vm375_vm2, %v2976_v31  ;;  %5739 = vmatmul.msk.f32.gmra.mxu1 %vm375_vm2, %v3088_v18 }
 0x4a8   : > { %v6382_v4 = vpop.permute.xlu1 %6381  ;;  %v3222_v39 = vsel %vm8210_vm14, %v6358_v19, %v6373_v59  ;;  %v3219_v43 = vsel %vm8215_vm7, %v6359_v26, %v6374_v56  ;;  %vm8219_vm14 = vmmov %vm8218_vm15 }
 0x4a9   : > { %v6384_v3 = vunpack.i.h.bf16 %v6382_v4  ;;  %v6383_v15 = vunpack.i.l.bf16 %v6382_v4  ;;  %3295 = vmatpush.msrb.mxu1 %v3222_v39 }
 0x4ab   : > { %v3334_v6 = vsel %vm8212_vm8, %v6378_v52, %v6383_v15  ;;  %3296 = vmatpush.msrb.mxu1 %v3219_v43  ;;  %v3331_v25 = vsel %vm8216_vm9, %v6364_v42, %v6384_v3  ;;  %vm8220_vm8 = vmmov %vm8219_vm14 }
 0x4ac   : > { %3407 = vmatpush.msra.mxu0 %v3334_v6  ;;  %vm8221_vm9 = vmmov %vm8220_vm8 }
 0x4ad   : > { %5737 = vmatmul.msk.f32.gmra.mxu0 %vm375_vm2, %v3088_v18  ;;  %5740 = vmatmul.msk.f32.vlgmr.msra.gmra.mxu2 %vm375_vm2, %v3087_v51 }
 0x4ae   : > { %3408 = vmatpush.msra.mxu0 %v3331_v25 }
 0x4af   : > { %5742 = vmatmul.msk.f32.vlgmr.msrb.gmra.mxu3 %vm375_vm2, %v3199_v46  ;;  %5746 = vmatmul.msk.f32.vlgmr.msrb.gmra.mxu1 %vm375_vm2, %v3199_v46 }
 0x4b5   : > { %5741 = vmatmul.msk.f32.gmra.mxu2 %vm375_vm2, %v3088_v18  ;;  %5744 = vmatmul.msk.f32.vlgmr.msrb.gmra.mxu0 %vm375_vm2, %v3199_v46 }
 0x4b7   : > { %5743 = vmatmul.msk.f32.gmra.mxu3 %vm375_vm2, %v3200_v7  ;;  %5747 = vmatmul.msk.f32.gmra.mxu1 %vm375_vm2, %v3200_v7 }
 0x4bd   : > { %5745 = vmatmul.msk.f32.gmra.mxu0 %vm375_vm2, %v3200_v7  ;;  %5748 = vmatmul.msk.f32.vlgmr.msrb.gmra.mxu2 %vm375_vm2, %v3311_v28 }
 0x4bf   : > { %5750 = vmatmul.msk.f32.vlgmr.msra.gmra.mxu3 %vm375_vm2, %v3311_v28 }
 0x4c5   : > { %5749 = vmatmul.msk.f32.gmra.mxu2 %vm375_vm2, %v3312_v22  ;;  %5752 = vmatmul.msk.f32.vlgmr.msra.gmra.mxu0 %vm375_vm2, %v3311_v28 }
 0x4c7   : > { %5751 = vmatmul.msk.f32.gmra.mxu3 %vm375_vm2, %v3312_v22 }
 0x4cd   : > { %5753 = vmatmul.msk.f32.gmra.mxu0 %vm375_vm2, %v3312_v22 }
 0x4e0   : > { %v2511_v11 = vpop.f32.mrf.mxu2 }
 0x4e1   : > { %v7640_v41 = vpop.f32.mrf.mxu0  ;;  %v2587_v6 = vadd.f32 %v2586_v49, %v2511_v11 }
 0x4e2   : > { %v2534_v9 = vpop.f32.mrf.mxu3 }
 0x4e8   : > { %v2514_v62 = vpop.f32.mrf.mxu2 }
 0x4e9   : > { %v2560_v55 = vpop.f32.mrf.mxu0  ;;  %v2590_v25 = vadd.f32 %v2589_v35, %v2514_v62 }
 0x4ea   : > { %v2537_v32 = vpop.f32.mrf.mxu3  ;;  %v2715_v0 = vpop.f32.mrf.mxu1 }
 0x4f0   : > { %v2609_v54 = vpop.f32.mrf.mxu2 }
 0x4f1   : > { %v2610_v38 = vadd.f32 %v2609_v54, %v2534_v9 }
 0x4f2   : > { %v2632_v63 = vpop.f32.mrf.mxu3  ;;  %v2692_v50 = vpop.f32.mrf.mxu0 }
 0x4f3   : > { %v2745_v18 = vadd.f32 %v2715_v0, %v2610_v38  ;;  %v2744_v7 = vadd.f32 %v2692_v50, %v2587_v6 }
 0x4f4   : > { %v2718_v19 = vpop.f32.mrf.mxu1 }
 0x4f8   : > { %v2612_v47 = vpop.f32.mrf.mxu2 }
 0x4f9   : > { %v2613_v56 = vadd.f32 %v2612_v47, %v2537_v32  ;;  %v2633_v47 = vadd.f32 %v2632_v63, %v7640_v41 }
 0x4fa   : > { %v2635_v17 = vpop.f32.mrf.mxu3  ;;  %v2695_v34 = vpop.f32.mrf.mxu0 }
 0x4fb   : > { %v2636_v59 = vadd.f32 %v2635_v17, %v2560_v55  ;;  %v2748_v29 = vadd.f32 %v2718_v19, %v2613_v56  ;;  %v2747_v28 = vadd.f32 %v2695_v34, %v2590_v25 }
 0x4fc   : > { %v7642_v45 = vpop.f32.mrf.mxu1  ;;  %v3428_v19 = vpop.permute.xlu0 %3427 }
 0x500   : > { %v2738_v20 = vpop.f32.mrf.mxu2 }
 0x501   : > { %v2746_v50 = vadd.f32 %v2738_v20, %v2633_v47 }
 0x502   : > { %v2804_v31 = vpop.f32.mrf.mxu3  ;;  %v2827_v12 = vpop.f32.mrf.mxu0 }
 0x503   : > { %v2857_v2 = vadd.f32 %v2827_v12, %v2745_v18  ;;  %v2856_v58 = vadd.f32 %v2804_v31, %v2744_v7  ;;  %v3433_v18 = vpop.permute.xlu2 %3432 }
 0x504   : > { %v2853_v44 = vpop.f32.mrf.mxu1 }
 0x508   : > { %v2741_v48 = vpop.f32.mrf.mxu2 }
 0x509   : > { %v2749_v15 = vadd.f32 %v2741_v48, %v2636_v59 }
 0x50a   : > { %v2807_v61 = vpop.f32.mrf.mxu3  ;;  %v2830_v8 = vpop.f32.mrf.mxu0 }
 0x50b   : > { %v2860_v22 = vadd.f32 %v2830_v8, %v2748_v29  ;;  %v2861_v9 = vadd.f32 %v2853_v44, %v2749_v15  ;;  %v2859_v12 = vadd.f32 %v2807_v61, %v2747_v28 }
 0x50c   : > { %v3028_v1 = vpop.f32.mrf.mxu1 }
 0x510   : > { %v2916_v23 = vpop.f32.mrf.mxu2 }
 0x511   : > { %v2968_v17 = vadd.f32 %v2916_v23, %v2856_v58 }
 0x512   : > { %v2939_v27 = vpop.f32.mrf.mxu3  ;;  %v7644_v26 = vpop.f32.mrf.mxu0 }
 0x513   : > { %v2969_v4 = vadd.f32 %v2939_v27, %v2857_v2  ;;  %v3080_v8 = vadd.f32 %v3028_v1, %v2968_v17 }
 0x514   : > { %v3031_v51 = vpop.f32.mrf.mxu1 }
 0x518   : > { %v2919_v30 = vpop.f32.mrf.mxu2 }
 0x519   : > { %v2971_v49 = vadd.f32 %v2919_v30, %v2859_v12 }
 0x51a   : > { %v2942_v16 = vpop.f32.mrf.mxu3  ;;  %v2965_v36 = vpop.f32.mrf.mxu0 }
 0x51b   : > { %v2972_v38 = vadd.f32 %v2942_v16, %v2860_v22  ;;  %v2973_v32 = vadd.f32 %v2965_v36, %v2861_v9  ;;  %v2858_v36 = vadd.f32 %v7642_v45, %v2746_v50 }
 0x51c   : > { %v3163_v57 = vpop.f32.mrf.mxu1 }
 0x51d   : > { %v2970_v20 = vadd.f32 %v7644_v26, %v2858_v36  ;;  %v5810_v36 = vld [vmem:[%s8158_s2 + $0x30] sm:$0xff] }
 0x520   : > { %v3051_v33 = vpop.f32.mrf.mxu2 }
 0x521   : > { %v3081_v43 = vadd.f32 %v3051_v33, %v2969_v4  ;;  %v3083_v33 = vadd.f32 %v3031_v51, %v2971_v49 }
 0x522   : > { %v7646_v21 = vpop.f32.mrf.mxu3  ;;  %v3140_v53 = vpop.f32.mrf.mxu0 }
 0x523   : > { %v3193_v54 = vadd.f32 %v3163_v57, %v3081_v43  ;;  %v3192_v57 = vadd.f32 %v3140_v53, %v3080_v8  ;;  %v3082_v45 = vadd.f32 %v7646_v21, %v2970_v20 }
 0x524   : > { %v3166_v52 = vpop.f32.mrf.mxu1 }
 0x528   : > { %v3054_v10 = vpop.f32.mrf.mxu2 }
 0x529   : > { %v3084_v11 = vadd.f32 %v3054_v10, %v2972_v38 }
 0x52a   : > { %v3077_v40 = vpop.f32.mrf.mxu3  ;;  %v3143_v42 = vpop.f32.mrf.mxu0 }
 0x52b   : > { %v3085_v35 = vadd.f32 %v3077_v40, %v2973_v32  ;;  %v3196_v61 = vadd.f32 %v3166_v52, %v3084_v11  ;;  %v3195_v41 = vadd.f32 %v3143_v42, %v3083_v33 }
 0x52c   : > { %v3298_v46 = vpop.f32.mrf.mxu1 }
 0x530   : > { %v7648_v13 = vpop.f32.mrf.mxu2 }
 0x531   : > { %v3194_v56 = vadd.f32 %v7648_v13, %v3082_v45 }
 0x532   : > { %v3252_v37 = vpop.f32.mrf.mxu3  ;;  %v3275_v14 = vpop.f32.mrf.mxu0 }
 0x533   : > { %v3305_v55 = vadd.f32 %v3275_v14, %v3193_v54  ;;  %v3304_v40 = vadd.f32 %v3252_v37, %v3192_v57  ;;  %v3306_v21 = vadd.f32 %v3298_v46, %v3194_v56 }
 0x534   : > { %v3301_v31 = vpop.f32.mrf.mxu1 }
 0x538   : > { %v3189_v60 = vpop.f32.mrf.mxu2 }
 0x539   : > { %v3197_v34 = vadd.f32 %v3189_v60, %v3085_v35 }
 0x53a   : > { %v3255_v39 = vpop.f32.mrf.mxu3  ;;  %v3278_v3 = vpop.f32.mrf.mxu0 }
 0x53b   : > { %v3308_v58 = vadd.f32 %v3278_v3, %v3196_v61  ;;  %v3309_v63 = vadd.f32 %v3301_v31, %v3197_v34  ;;  %v3307_v51 = vadd.f32 %v3255_v39, %v3195_v41 }
 0x540   : > { %v3364_v0 = vpop.f32.mrf.mxu2 }
 0x541   : > { %v3416_v53 = vadd.f32 %v3364_v0, %v3304_v40  ;;  %v7745_v40 = vld [vmem:[#allocation4 + $0x1b8] sm:$0xff] }
 0x542   : > { %v3387_v48 = vpop.f32.mrf.mxu3  ;;  %v3410_v27 = vpop.f32.mrf.mxu0 }
 0x543   : > { %v3417_v62 = vadd.f32 %v3387_v48, %v3305_v55  ;;  %v3435_v26 = vadd.f32 %v3428_v19, %v3416_v53  ;;  %v3418_v39 = vadd.f32 %v3410_v27, %v3306_v21 }
 0x545   : > { %v3436_v44 = vadd.f32 %v3428_v19, %v3417_v62  ;;  %v3441_v43 = vmax.f32 %v3435_v26, 0.0  ;;  %v3437_v25 = vadd.f32 %v3428_v19, %v3418_v39 }
 0x547   : > { %v3442_v16 = vmax.f32 %v3436_v44, 0.0  ;;  %v3447_v29 = vsel %vm7141_vm13, %v3441_v43, 0.0  ;;  %v3443_v28 = vmax.f32 %v3437_v25, 0.0 }
 0x548   : > { %v3367_v23 = vpop.f32.mrf.mxu2 }
 0x549   : > { %v3448_v30 = vsel %vm7166_vm11, %v3442_v16, 0.0  ;;  %v3419_v42 = vadd.f32 %v3367_v23, %v3307_v51  ;;  %v3449_v22 = vsel %vm7170_vm12, %v3443_v28, 0.0 }
 0x54a   : > { %3461 = vrot.lane.b32.xlu0 %v3448_v30, %s6761_s6  ;;  %v3390_v10 = vpop.f32.mrf.mxu3  ;;  %v3413_v1 = vpop.f32.mrf.mxu0  ;;  %v7740_v30 = vld [vmem:[#allocation4 + $0x1b0] sm:$0xff] }
 0x54b   : > { %v3420_v52 = vadd.f32 %v3390_v10, %v3308_v58  ;;  %v3421_v14 = vadd.f32 %v3413_v1, %v3309_v63  ;;  %v3438_v3 = vadd.f32 %v3433_v18, %v3419_v42  ;;  %v5811_v63 = vld [vmem:[%s8158_s2 + $0x38] sm:$0xff] }
 0x54d   : > { %v3439_v2 = vadd.f32 %v3433_v18, %v3420_v52  ;;  %v3440_v60 = vadd.f32 %v3433_v18, %v3421_v14  ;;  %v3444_v6 = vmax.f32 %v3438_v3, 0.0 }
 0x54f   : > { %v3445_v59 = vmax.f32 %v3439_v2, 0.0  ;;  %v3446_v4 = vmax.f32 %v3440_v60, 0.0  ;;  %v3450_v7 = vsel %vm7141_vm13, %v3444_v6, 0.0  ;;  %v3501_v60 = vld [vmem:[#allocation4 + $0x1c0] sm:$0xff] }
 0x551   : > { %v3451_v15 = vsel %vm7166_vm11, %v3445_v59, 0.0  ;;  %v3452_v37 = vsel %vm7170_vm12, %v3446_v4, 0.0 }
 0x552   : > { %3467 = vrot.lane.b32.xlu2 %v3451_v15, %s6761_s6  ;;  %3469 = vrot.lane.b32.xlu1 %v3452_v37, %s6761_s6  ;;  %v3502_v15 = vld [vmem:[#allocation4 + $0x1c8] sm:$0xff] }
 0x55a   : > { %3459 = vrot.lane.b32.xlu2 %v3447_v29, %s6761_s6  ;;  %3465 = vrot.lane.b32.xlu1 %v3450_v7, %s6761_s6 }
 0x562   : > { %3463 = vrot.lane.b32.xlu1 %v3449_v22, %s6761_s6 }
 0x5ac   : > { %v3468_v46 = vpop.permute.xlu2 %3467 }
 0x5b4   : > { %v3460_v9 = vpop.permute.xlu2 %3459 }
 0x5b5   : > { %3483 = vst.msk [vmem:[#allocation3] sm:$0xff] %vm201_vm10, %v3460_v9 }
 0x5bc   : > { %v3462_v54 = vpop.permute.xlu0 %3461  ;;  %v3494_v11 = vld [vmem:[#allocation3] sm:$0xff] }
 0x5bd   : > { %v7675_v0 = vsel %vm198_vm0, %v3460_v9, %v3462_v54 }
 0x5be   : > { %v6411_v31 = vpack.i.bf16 %v7675_v0, %v3494_v11 }
 0x5c4   : > { %v3470_v12 = vpop.permute.xlu1 %3469 }
 0x5c5   : > { %v7678_v38 = vsel %vm198_vm0, %v3468_v46, %v3470_v12  ;;  %3490 = vst.msk [vmem:[#allocation3 + $0x38] sm:$0xff] %vm198_vm0, %v3470_v12 }
 0x5c6   : > { %v6421_v44 = vpack.i.bf16 %v3494_v11, %v7678_v38 }
 0x5cc   : > { %v3466_v32 = vpop.permute.xlu1 %3465  ;;  %v3510_v55 = vld [vmem:[#allocation3 + $0x38] sm:$0xff] }
 0x5cd   : > { %v7682_v47 = vsel %vm198_vm0, %v3466_v32, %v3468_v46  ;;  %3487 = vst.msk [vmem:[#allocation3 + $0x20] sm:$0xff] %vm201_vm10, %v3466_v32  ;;  %v6391_v17 = vpack.i.bf16 %v7675_v0, %v3510_v55  ;;  %v6471_v16 = vpack.i.bf16 %v3510_v55, %v7678_v38 }
 0x5ce   : > { %v6386_v48 = vpack.i.bf16 %v7678_v38, %v7682_v47 }
 0x5cf   : > { %6392 = vrot.lane.b32.xlu0 %v6391_v17, %s6752_s21 }
 0x5d0   : > { %6387 = vrot.lane.b32.xlu2 %v6386_v48, %s6752_s21 }
 0x5d4   : > { %v3464_v27 = vpop.permute.xlu1 %3463  ;;  %v3497_v49 = vld [vmem:[#allocation3 + $0x20] sm:$0xff] }
 0x5d5   : > { %v7691_v35 = vsel %vm198_vm0, %v3462_v54, %v3464_v27  ;;  %3486 = vst.msk [vmem:[#allocation3 + $0x18] sm:$0xff] %vm198_vm0, %v3464_v27  ;;  %3642 = vmatpush.msrb.mxu0 %v3497_v49  ;;  %v6406_v62 = vpack.i.bf16 %v7682_v47, %v3497_v49  ;;  %v6401_v50 = vpack.i.bf16 %v3494_v11, %v3497_v49 }
 0x5d6   : > { %v6431_v33 = vpack.i.bf16 %v7691_v35, %v7678_v38  ;;  %v6426_v61 = vpack.i.bf16 %v7691_v35, %v7675_v0 }
 0x5d7   : > { %3643 = vmatpush.msrb.mxu0 %v3494_v11  ;;  %6407 = vrot.lane.b32.xlu0 %v6406_v62, %s6753_s22  ;;  %v3698_v11 = vld [vmem:[#allocation4 + $0x1d0] sm:$0xff] }
 0x5d8   : > { %6402 = vrot.lane.b32.xlu2 %v6401_v50, %s6752_s21  ;;  %5762 = vmatmul.msk.f32.vlgmr.msrb.gmra.mxu0 %vm375_vm2, %v7740_v30 }
 0x5dc   : > { %v3506_v19 = vld [vmem:[#allocation3 + $0x18] sm:$0xff] }
 0x5dd   : > { %v6396_v34 = vpack.i.bf16 %v3506_v19, %v7691_v35  ;;  %v6516_v8 = vpack.i.bf16 %v3506_v19, %v3510_v55 }
 0x5df   : > { %6397 = vrot.lane.b32.xlu1 %v6396_v34, %s6752_s21  ;;  %6422 = vrot.lane.b32.xlu0 %v6421_v44, %s6754_s27 }
 0x5e0   : > { %6417 = vrot.lane.b32.xlu2 %v6406_v62, %s6754_s27  ;;  %5763 = vmatmul.msk.f32.gmra.mxu0 %vm375_vm2, %v7745_v40 }
 0x5e7   : > { %6412 = vrot.lane.b32.xlu1 %v6411_v31, %s6753_s22  ;;  %6437 = vrot.lane.b32.xlu0 %v6516_v8, %s6753_s22 }
 0x5e8   : > { %6432 = vrot.lane.b32.xlu2 %v6431_v33, %s6753_s22 }
 0x5ef   : > { %6427 = vrot.lane.b32.xlu1 %v6426_v61, %s6754_s27  ;;  %6447 = vrot.lane.b32.xlu0 %v6396_v34, %s6755_s28 }
 0x5f0   : > { %6442 = vrot.lane.b32.xlu2 %v6391_v17, %s6755_s28 }
 0x5f7   : > { %6452 = vrot.lane.b32.xlu1 %v6386_v48, %s6755_s28  ;;  %6472 = vrot.lane.b32.xlu0 %v6471_v16, %s6756_s29  ;;  %v3699_v16 = vld [vmem:[#allocation4 + $0x1d8] sm:$0xff] }
 0x5f8   : > { %6462 = vrot.lane.b32.xlu2 %v6401_v50, %s6755_s28 }
 0x5ff   : > { %6457 = vrot.lane.b32.xlu1 %v6516_v8, %s6754_s27  ;;  %6477 = vrot.lane.b32.xlu0 %v6411_v31, %s6757_s30 }
 0x600   : > { %6467 = vrot.lane.b32.xlu2 %v6396_v34, %s6756_s29 }
 0x607   : > { %6482 = vrot.lane.b32.xlu1 %v6406_v62, %s6757_s30  ;;  %6497 = vrot.lane.b32.xlu0 %v6406_v62, %s6758_s4 }
 0x608   : > { %6492 = vrot.lane.b32.xlu2 %v6411_v31, %s6756_s29 }
 0x60f   : > { %6487 = vrot.lane.b32.xlu1 %v6406_v62, %s6756_s29  ;;  %6512 = vrot.lane.b32.xlu0 %v6431_v33, %s6757_s30 }
 0x610   : > { %6507 = vrot.lane.b32.xlu2 %v6426_v61, %s6758_s4 }
 0x617   : > { %6502 = vrot.lane.b32.xlu1 %v6421_v44, %s6758_s4  ;;  %6522 = vrot.lane.b32.xlu0 %v6391_v17, %s6759_s5 }
 0x618   : > { %6532 = vrot.lane.b32.xlu2 %v6386_v48, %s6759_s5 }
 0x61f   : > { %6517 = vrot.lane.b32.xlu1 %v6516_v8, %s6757_s30  ;;  %6542 = vrot.lane.b32.xlu0 %v6401_v50, %s6759_s5 }
 0x620   : > { %6537 = vrot.lane.b32.xlu2 %v6516_v8, %s6758_s4 }
 0x627   : > { %6527 = vrot.lane.b32.xlu1 %v6396_v34, %s6759_s5 }
 0x628   : > { %4486 = vperm.xlu2 %6224, %v5810_v36  }
 0x62a   : > { %v6388_v57 = vpop.permute.xlu2 %6387 }
 0x62b   : > { %v6390_v41 = vunpack.i.h.bf16 %v6388_v57  ;;  %v6389_v58 = vunpack.i.l.bf16 %v6388_v57 }
 0x62d   : > { %v3539_v23 = vsel %vm362_vm1, %v6389_v58, %v6390_v41 }
 0x62e   : > { %3590 = vmatpush.msra.mxu2 %v3539_v23 }
 0x62f   : > { %4491 = vperm.xlu1 %6223, %v5811_v63  }
 0x632   : > { %v6403_v20 = vpop.permute.xlu2 %6402 }
 0x633   : > { %v6404_v10 = vunpack.i.l.bf16 %v6403_v20  ;;  %v6405_v14 = vunpack.i.h.bf16 %v6403_v20 }
 0x635   : > { %v3538_v1 = vsel %vm362_vm1, %v6404_v10, %v6389_v58 }
 0x636   : > { %3567 = vmatpush.msra.mxu1 %v3538_v1 }
 0x63a   : > { %v7749_v51 = vpop.permute.xlu2 %6417 }
 0x63b   : > { %v6420_v28 = vunpack.i.h.bf16 %v7749_v51  ;;  %v6419_v22 = vunpack.i.l.bf16 %v7749_v51 }
 0x641   : > { %v6393_v52 = vpop.permute.xlu0 %6392 }
 0x642   : > { %v6395_v18 = vunpack.i.h.bf16 %v6393_v52  ;;  %v6394_v45 = vunpack.i.l.bf16 %v6393_v52  ;;  %v6433_v53 = vpop.permute.xlu2 %6432 }
 0x643   : > { %v6434_v4 = vunpack.i.l.bf16 %v6433_v53  ;;  %v6435_v12 = vunpack.i.h.bf16 %v6433_v53 }
 0x644   : > { %v3535_v42 = vsel %vm362_vm1, %v6405_v14, %v6395_v18  ;;  %v3540_v2 = vsel %vm362_vm1, %v6390_v41, %v6394_v45 }
 0x645   : > { %3568 = vmatpush.msra.mxu1 %v3535_v42  ;;  %3613 = vmatpush.msrb.mxu3 %v3540_v2 }
 0x646   : > { %5756 = vmatmul.msk.f32.vlgmr.msra.gmra.mxu1 %vm375_vm2, %v3501_v60 }
 0x647   : > { %3665 = vmatpush.msrb.mxu1 %v7682_v47 }
 0x649   : > { %3666 = vmatpush.msrb.mxu1 %v7675_v0  ;;  %v6408_v56 = vpop.permute.xlu0 %6407  ;;  %v3831_v0 = vsel %vm658_vm4, %v6419_v22, %v6420_v28 }
 0x64a   : > { %v6410_v59 = vunpack.i.h.bf16 %v6408_v56  ;;  %v7756_v26 = vpop.permute.xlu2 %6442  ;;  %v6409_v39 = vunpack.i.l.bf16 %v6408_v56 }
 0x64b   : > { %v6444_v57 = vunpack.i.l.bf16 %v7756_v26  ;;  %v6445_v51 = vunpack.i.h.bf16 %v7756_v26 }
 0x64c   : > { %v3720_v3 = vsel %vm545_vm3, %v6410_v59, %v6434_v4  ;;  %v3719_v46 = vsel %vm545_vm3, %v6409_v39, %v6410_v59 }
 0x64d   : > { %3771 = vmatpush.msra.mxu0 %v3720_v3  ;;  %v3810_v3 = vld [vmem:[#allocation4 + $0x1e0] sm:$0xff] }
 0x64e   : > { %5757 = vmatmul.msk.f32.gmra.mxu1 %vm375_vm2, %v3502_v15 }
 0x651   : > { %v6398_v37 = vpop.permute.xlu1 %6397  ;;  %v7760_v21 = vpop.permute.xlu0 %6422 }
 0x652   : > { %v6400_v43 = vunpack.i.h.bf16 %v6398_v37  ;;  %v6399_v6 = vunpack.i.l.bf16 %v6398_v37  ;;  %v7764_v7 = vpop.permute.xlu2 %6462  ;;  %v6424_v17 = vunpack.i.l.bf16 %v7760_v21  ;;  %v6425_v44 = vunpack.i.h.bf16 %v7760_v21 }
 0x653   : > { %v6465_v63 = vunpack.i.h.bf16 %v7764_v7  ;;  %v6464_v23 = vunpack.i.l.bf16 %v7764_v7 }
 0x654   : > { %v3536_v25 = vsel %vm362_vm1, %v6395_v18, %v6399_v6  ;;  %v3537_v29 = vsel %vm362_vm1, %v6399_v6, %v6400_v43  ;;  %v3832_v62 = vsel %vm658_vm4, %v6420_v28, %v6424_v17 }
 0x655   : > { %3591 = vmatpush.msra.mxu2 %v3536_v25  ;;  %3614 = vmatpush.msrb.mxu3 %v3537_v29  ;;  %v3940_v45 = vsel %vm771_vm5, %v6465_v63, %v6445_v51  ;;  %v3922_v25 = vld [vmem:[#allocation4 + $0x1f0] sm:$0xff] }
 0x656   : > { %5758 = vmatmul.msk.f32.vlgmr.msra.gmra.mxu2 %vm375_vm2, %v3501_v60  ;;  %5760 = vmatmul.msk.f32.vlgmr.msrb.gmra.mxu3 %vm375_vm2, %v3501_v60 }
 0x657   : > { %3688 = vmatpush.msrb.mxu2 %v7678_v38  ;;  %3748 = vmatpush.msra.mxu3 %v3719_v46 }
 0x658   : > { %5764 = vmatmul.msk.f32.vlgmr.msrb.gmra.mxu1 %vm375_vm2, %v7740_v30 }
 0x659   : > { %3689 = vmatpush.msrb.mxu2 %v7691_v35  ;;  %v6413_v9 = vpop.permute.xlu1 %6412  ;;  %v6438_v54 = vpop.permute.xlu0 %6437 }
 0x65a   : > { %v6415_v32 = vunpack.i.h.bf16 %v6413_v9  ;;  %v6414_v55 = vunpack.i.l.bf16 %v6413_v9  ;;  %v6439_v47 = vunpack.i.l.bf16 %v6438_v54  ;;  %v6440_v48 = vunpack.i.h.bf16 %v6438_v54  ;;  %v7781_v35 = vpop.permute.xlu2 %6467  ;;  %v3811_v54 = vld [vmem:[#allocation4 + $0x1e8] sm:$0xff] }
 0x65b   : > { %3860 = vmatpush.msra.mxu2 %v3831_v0  ;;  %v6469_v37 = vunpack.i.l.bf16 %v7781_v35 }
 0x65c   : > { %v3716_v38 = vsel %vm545_vm3, %v6414_v55, %v6415_v32  ;;  %v3717_v27 = vsel %vm545_vm3, %v6415_v32, %v6435_v12  ;;  %v3721_v49 = vsel %vm545_vm3, %v6434_v4, %v6439_v47  ;;  %v3718_v50 = vsel %vm545_vm3, %v6435_v12, %v6440_v48  ;;  %v3923_v55 = vld [vmem:[#allocation4 + $0x1f8] sm:$0xff] }
 0x65d   : > { %3749 = vmatpush.msra.mxu3 %v3716_v38  ;;  %3772 = vmatpush.msra.mxu0 %v3717_v27 }
 0x65e   : > { %3794 = vmatpush.msra.mxu1 %v3721_v49  ;;  %5759 = vmatmul.msk.f32.gmra.mxu2 %vm375_vm2, %v3502_v15 }
 0x65f   : > { %5761 = vmatmul.msk.f32.gmra.mxu3 %vm375_vm2, %v3502_v15  ;;  %5770 = vmatmul.msk.f32.vlgmr.msra.gmra.mxu0 %vm375_vm2, %v3698_v11  ;;  %v6470_v15 = vunpack.i.h.bf16 %v7781_v35 }
 0x660   : > { %3883 = vmatpush.msrb.mxu3 %v3832_v62  ;;  %3795 = vmatpush.msra.mxu1 %v3718_v50 }
 0x661   : > { %v6428_v19 = vpop.permute.xlu1 %6427  ;;  %v6448_v34 = vpop.permute.xlu0 %6447  ;;  %5765 = vmatmul.msk.f32.gmra.mxu1 %vm375_vm2, %v7745_v40  ;;  %v4054_v29 = vsel %vm8170_vm6, %v6469_v37, %v6470_v15 }
 0x662   : > { %v6430_v8 = vunpack.i.h.bf16 %v6428_v19  ;;  %v6429_v31 = vunpack.i.l.bf16 %v6428_v19  ;;  %v7798_v36 = vpop.permute.xlu2 %6492  ;;  %v6449_v1 = vunpack.i.l.bf16 %v6448_v34 }
 0x663   : > { %v6494_v35 = vunpack.i.l.bf16 %v7798_v36 }
 0x664   : > { %v3828_v33 = vsel %vm658_vm4, %v6425_v44, %v6429_v31  ;;  %v3829_v61 = vsel %vm658_vm4, %v6429_v31, %v6430_v8  ;;  %v3941_v53 = vsel %vm771_vm5, %v6445_v51, %v6449_v1  ;;  %v4034_v44 = vld [vmem:[#allocation4 + $0x200] sm:$0xff] }
 0x665   : > { %3861 = vmatpush.msra.mxu2 %v3828_v33  ;;  %3884 = vmatpush.msrb.mxu3 %v3829_v61 }
 0x666   : > { %5766 = vmatmul.msk.f32.vlgmr.msrb.gmra.mxu2 %vm375_vm2, %v7740_v30  ;;  %v6450_v30 = vunpack.i.h.bf16 %v6448_v34 }
 0x667   : > { %5768 = vmatmul.msk.f32.vlgmr.msra.gmra.mxu3 %vm375_vm2, %v3698_v11  ;;  %5771 = vmatmul.msk.f32.gmra.mxu0 %vm375_vm2, %v3699_v16 }
 0x668   : > { %v3942_v42 = vsel %vm771_vm5, %v6449_v1, %v6450_v30 }
 0x669   : > { %v6453_v41 = vpop.permute.xlu1 %6452  ;;  %v7801_v58 = vpop.permute.xlu0 %6472  ;;  %5772 = vmatmul.msk.f32.vlgmr.msra.gmra.mxu1 %vm375_vm2, %v3698_v11  ;;  %v6495_v11 = vunpack.i.h.bf16 %v7798_v36 }
 0x66a   : > { %v6455_v20 = vunpack.i.h.bf16 %v6453_v41  ;;  %v6454_v10 = vunpack.i.l.bf16 %v6453_v41  ;;  %v6475_v56 = vunpack.i.h.bf16 %v7801_v58  ;;  %v7821_v26 = vpop.permute.xlu2 %6507 }
 0x66b   : > { %v4052_v33 = vsel %vm8170_vm6, %v6494_v35, %v6495_v11  ;;  %v4053_v61 = vsel %vm8170_vm6, %v6495_v11, %v6469_v37  ;;  %v6509_v41 = vunpack.i.l.bf16 %v7821_v26 }
 0x66c   : > { %v3943_v52 = vsel %vm771_vm5, %v6464_v23, %v6454_v10  ;;  %v3944_v14 = vsel %vm771_vm5, %v6454_v10, %v6455_v20  ;;  %v3945_v18 = vsel %vm771_vm5, %v6455_v20, %v6444_v57  ;;  %v6510_v20 = vunpack.i.h.bf16 %v7821_v26 }
 0x66d   : > { %3972 = vmatpush.msrb.mxu1 %v3943_v52  ;;  %3995 = vmatpush.msrb.mxu2 %v3944_v14  ;;  %v4035_v14 = vld [vmem:[#allocation4 + $0x208] sm:$0xff] }
 0x66e   : > { %4018 = vmatpush.msra.mxu3 %v3945_v18  ;;  %5767 = vmatmul.msk.f32.gmra.mxu2 %vm375_vm2, %v7745_v40  ;;  %v6474_v40 = vunpack.i.l.bf16 %v7801_v58 }
 0x66f   : > { %5769 = vmatmul.msk.f32.gmra.mxu3 %vm375_vm2, %v3699_v16  ;;  %3973 = vmatpush.msrb.mxu1 %v3940_v45 }
 0x670   : > { %3996 = vmatpush.msrb.mxu2 %v3941_v53  ;;  %4019 = vmatpush.msra.mxu3 %v3942_v42  ;;  %v4057_v43 = vsel %vm8170_vm6, %v6474_v40, %v6475_v56 }
 0x671   : > { %v6458_v2 = vpop.permute.xlu1 %6457  ;;  %v7816_v60 = vpop.permute.xlu0 %6477  ;;  %5773 = vmatmul.msk.f32.gmra.mxu1 %vm375_vm2, %v3699_v16 }
 0x672   : > { %v6459_v59 = vunpack.i.l.bf16 %v6458_v2  ;;  %v6460_v4 = vunpack.i.h.bf16 %v6458_v2  ;;  %v6480_v46 = vunpack.i.h.bf16 %v7816_v60  ;;  %v6479_v9 = vunpack.i.l.bf16 %v7816_v60  ;;  %v7838_v12 = vpop.permute.xlu2 %6532 }
 0x673   : > { %v6535_v2 = vunpack.i.h.bf16 %v7838_v12  ;;  %v6534_v60 = vunpack.i.l.bf16 %v7838_v12  ;;  %v4259_v12 = vld [vmem:[#allocation4 + $0x228] sm:$0xff] }
 0x674   : > { %v3833_v39 = vsel %vm658_vm4, %v6424_v17, %v6459_v59  ;;  %v3830_v6 = vsel %vm658_vm4, %v6430_v8, %v6460_v4  ;;  %v4164_v32 = vsel %vm8219_vm14, %v6479_v9, %v6480_v46  ;;  %vm8223_vm14 = vmmov %vm8215_vm7  ;;  %v4147_v9 = vld [vmem:[#allocation4 + $0x218] sm:$0xff] }
 0x675   : > { %3906 = vmatpush.msrb.mxu0 %v3833_v39 }
 0x676   : > { %5774 = vmatmul.msk.f32.vlgmr.msra.gmra.mxu2 %vm375_vm2, %v3810_v3 }
 0x677   : > { %5776 = vmatmul.msk.f32.vlgmr.msrb.gmra.mxu3 %vm375_vm2, %v3810_v3  ;;  %4130 = vmatpush.msra.mxu2 %v4057_v43 }
 0x678   : > { %3907 = vmatpush.msrb.mxu0 %v3830_v6 }
 0x679   : > { %5778 = vmatmul.msk.f32.vlgmr.msrb.gmra.mxu0 %vm375_vm2, %v3810_v3  ;;  %4131 = vmatpush.msra.mxu2 %v4054_v29  ;;  %v6483_v21 = vpop.permute.xlu1 %6482  ;;  %v6498_v7 = vpop.permute.xlu0 %6497  ;;  %v4146_v3 = vld [vmem:[#allocation4 + $0x210] sm:$0xff] }
 0x67a   : > { %v6485_v28 = vunpack.i.h.bf16 %v6483_v21  ;;  %v6484_v22 = vunpack.i.l.bf16 %v6483_v21  ;;  %5780 = vmatmul.msk.f32.vlgmr.msrb.gmra.mxu1 %vm375_vm2, %v3922_v25  ;;  %v6500_v48 = vunpack.i.h.bf16 %v6498_v7  ;;  %v6499_v38 = vunpack.i.l.bf16 %v6498_v7  ;;  %v6538_v31 = vpop.permute.xlu2 %6537 }
 0x67b   : > { %v6539_v58 = vunpack.i.l.bf16 %v6538_v31  ;;  %v6540_v10 = vunpack.i.h.bf16 %v6538_v31 }
 0x67c   : > { %v4167_v0 = vsel %vm8218_vm15, %v6484_v22, %v6485_v28  ;;  %v4279_v34 = vsel %vm8215_vm7, %v6499_v38, %v6500_v48  ;;  %vm8222_vm15 = vmmov %vm8215_vm7 }
 0x67d   : > { %4196 = vmatpush.msrb.mxu3 %v4167_v0  ;;  %v4370_v0 = vld [vmem:[#allocation4 + $0x230] sm:$0xff] }
 0x67e   : > { %5775 = vmatmul.msk.f32.gmra.mxu2 %vm375_vm2, %v3811_v54 }
 0x67f   : > { %5777 = vmatmul.msk.f32.gmra.mxu3 %vm375_vm2, %v3811_v54 }
 0x680   : > { %4197 = vmatpush.msrb.mxu3 %v4164_v32  ;;  %v4371_v32 = vld [vmem:[#allocation4 + $0x238] sm:$0xff] }
 0x681   : > { %5779 = vmatmul.msk.f32.gmra.mxu0 %vm375_vm2, %v3811_v54  ;;  %v6488_v47 = vpop.permute.xlu1 %6487  ;;  %v7844_v17 = vpop.permute.xlu0 %6512  ;;  %v4258_v54 = vld [vmem:[#allocation4 + $0x220] sm:$0xff] }
 0x682   : > { %v6490_v27 = vunpack.i.h.bf16 %v6488_v47  ;;  %v6489_v49 = vunpack.i.l.bf16 %v6488_v47  ;;  %5781 = vmatmul.msk.f32.gmra.mxu1 %vm375_vm2, %v3923_v55  ;;  %v6514_v19 = vunpack.i.l.bf16 %v7844_v17  ;;  %v6515_v8 = vunpack.i.h.bf16 %v7844_v17  ;;  %v3645_v17 = vpop.f32.mrf.mxu0 }
 0x684   : > { %v4055_v62 = vsel %vm8170_vm6, %v6489_v49, %v6490_v27  ;;  %v4056_v50 = vsel %vm8170_vm6, %v6490_v27, %v6474_v40  ;;  %v4168_v16 = vsel %vm8220_vm8, %v6485_v28, %v6514_v19  ;;  %v4165_v30 = vsel %vm8221_vm9, %v6480_v46, %v6515_v8  ;;  %vm8224_vm8 = vmmov %vm8215_vm7 }
 0x685   : > { %4084 = vmatpush.msra.mxu0 %v4055_v62  ;;  %4107 = vmatpush.msra.mxu1 %v4056_v50  ;;  %v4277_v18 = vsel %vm8224_vm8, %v6509_v41, %v6510_v20  ;;  %vm8225_vm6 = vmmov %vm8215_vm7 }
 0x686   : > { %5782 = vmatmul.msk.f32.vlgmr.msrb.gmra.mxu2 %vm375_vm2, %v3922_v25  ;;  %v4278_v45 = vsel %vm8225_vm6, %v6510_v20, %v6540_v10  ;;  %vm8226_vm6 = vcmask 736256  }
 0x687   : > { %5784 = vmatmul.msk.f32.vlgmr.msra.gmra.mxu3 %vm375_vm2, %v3922_v25  ;;  %4308 = vmatpush.msrb.mxu2 %v4279_v34  ;;  %v4392_v37 = vsel %vm8226_vm6, %v6534_v60, %v6535_v2  ;;  %vm8230_vm8 = vmmov %vm8226_vm6 }
 0x688   : > { %4085 = vmatpush.msra.mxu0 %v4052_v33  ;;  %4108 = vmatpush.msra.mxu1 %v4053_v61 }
 0x689   : > { %5786 = vmatmul.msk.f32.vlgmr.msra.gmra.mxu0 %vm375_vm2, %v4034_v44  ;;  %v6503_v36 = vpop.permute.xlu1 %6502  ;;  %v6523_v57 = vpop.permute.xlu0 %6522 }
 0x68a   : > { %4219 = vmatpush.msrb.mxu0 %v4168_v16  ;;  %v6505_v63 = vunpack.i.h.bf16 %v6503_v36  ;;  %v6504_v23 = vunpack.i.l.bf16 %v6503_v36  ;;  %5788 = vmatmul.msk.f32.vlgmr.msra.gmra.mxu1 %vm375_vm2, %v4034_v44  ;;  %v6524_v40 = vunpack.i.l.bf16 %v6523_v57  ;;  %v6525_v6 = vunpack.i.h.bf16 %v6523_v57  ;;  %v3648_v49 = vpop.f32.mrf.mxu0 }
 0x68c   : > { %4220 = vmatpush.msrb.mxu0 %v4165_v30  ;;  %v4276_v1 = vsel %vm8222_vm15, %v6505_v63, %v6509_v41  ;;  %v4280_v51 = vsel %vm8223_vm14, %v6500_v48, %v6504_v23  ;;  %v4281_v52 = vsel %vm8215_vm7, %v6504_v23, %v6539_v58  ;;  %vm8227_vm15 = vmmov %vm8226_vm6 }
 0x68d   : > { %4309 = vmatpush.msrb.mxu2 %v4276_v1  ;;  %4331 = vmatpush.msra.mxu3 %v4280_v51  ;;  %v4393_v39 = vsel %vm8227_vm15, %v6535_v2, %v6524_v40  ;;  %vm8228_vm14 = vmmov %vm8221_vm9 }
 0x68e   : > { %4354 = vmatpush.msra.mxu0 %v4281_v52  ;;  %5783 = vmatmul.msk.f32.gmra.mxu2 %vm375_vm2, %v3923_v55  ;;  %vm8229_vm7 = vmmov %vm8226_vm6 }
 0x68f   : > { %5785 = vmatmul.msk.f32.gmra.mxu3 %vm375_vm2, %v3923_v55 }
 0x690   : > { %4332 = vmatpush.msra.mxu3 %v4277_v18  ;;  %4355 = vmatpush.msra.mxu0 %v4278_v45 }
 0x691   : > { %5787 = vmatmul.msk.f32.gmra.mxu0 %vm375_vm2, %v4035_v14  ;;  %v6518_v53 = vpop.permute.xlu1 %6517  ;;  %v6543_v42 = vpop.permute.xlu0 %6542 }
 0x692   : > { %v6519_v56 = vunpack.i.l.bf16 %v6518_v53  ;;  %5789 = vmatmul.msk.f32.gmra.mxu1 %vm375_vm2, %v4035_v14  ;;  %v6520_v59 = vunpack.i.h.bf16 %v6518_v53  ;;  %v6544_v4 = vunpack.i.l.bf16 %v6543_v42  ;;  %v6545_v15 = vunpack.i.h.bf16 %v6543_v42 }
 0x694   : > { %v4169_v26 = vsel %vm8221_vm9, %v6514_v19, %v6519_v56  ;;  %v4166_v43 = vsel %vm8228_vm14, %v6515_v8, %v6520_v59  ;;  %v4391_v25 = vsel %vm8229_vm7, %v6544_v4, %v6534_v60  ;;  %v4388_v28 = vsel %vm8230_vm8, %v6545_v15, %v6525_v6  ;;  %vm8231_vm9 = vmmov %vm8226_vm6 }
 0x695   : > { %4242 = vmatpush.msrb.mxu1 %v4169_v26 }
 0x696   : > { %5790 = vmatmul.msk.f32.vlgmr.msra.gmra.mxu2 %vm375_vm2, %v4034_v44 }
 0x697   : > { %5792 = vmatmul.msk.f32.vlgmr.msrb.gmra.mxu3 %vm375_vm2, %v4146_v3  ;;  %4443 = vmatpush.msra.mxu2 %v4392_v37 }
 0x698   : > { %4466 = vmatpush.msrb.mxu3 %v4393_v39  ;;  %4243 = vmatpush.msrb.mxu1 %v4166_v43 }
 0x699   : > { %5794 = vmatmul.msk.f32.vlgmr.msrb.gmra.mxu0 %vm375_vm2, %v4146_v3  ;;  %v6528_v29 = vpop.permute.xlu1 %6527 }
 0x69a   : > { %4420 = vmatpush.msra.mxu1 %v4391_v25  ;;  %v6530_v21 = vunpack.i.h.bf16 %v6528_v29  ;;  %v6529_v7 = vunpack.i.l.bf16 %v6528_v29 }
 0x69b   : > { %5796 = vmatmul.msk.f32.vlgmr.msrb.gmra.mxu1 %vm375_vm2, %v4146_v3 }
 0x69c   : > { %4421 = vmatpush.msra.mxu1 %v4388_v28  ;;  %v4389_v22 = vsel %vm8231_vm9, %v6525_v6, %v6529_v7  ;;  %v4390_v46 = vsel %vm8226_vm6, %v6529_v7, %v6530_v21 }
 0x69d   : > { %4444 = vmatpush.msra.mxu2 %v4389_v22  ;;  %4467 = vmatpush.msrb.mxu3 %v4390_v46 }
 0x69e   : > { %5791 = vmatmul.msk.f32.gmra.mxu2 %vm375_vm2, %v4035_v14 }
 0x69f   : > { %5793 = vmatmul.msk.f32.gmra.mxu3 %vm375_vm2, %v4147_v9 }
 0x6a1   : > { %5795 = vmatmul.msk.f32.gmra.mxu0 %vm375_vm2, %v4147_v9 }
 0x6a3   : > { %5797 = vmatmul.msk.f32.gmra.mxu1 %vm375_vm2, %v4147_v9 }
 0x6a6   : > { %5798 = vmatmul.msk.f32.vlgmr.msrb.gmra.mxu2 %vm375_vm2, %v4258_v54 }
 0x6a7   : > { %5800 = vmatmul.msk.f32.vlgmr.msra.gmra.mxu3 %vm375_vm2, %v4258_v54 }
 0x6a9   : > { %5802 = vmatmul.msk.f32.vlgmr.msra.gmra.mxu0 %vm375_vm2, %v4258_v54 }
 0x6ab   : > { %5804 = vmatmul.msk.f32.vlgmr.msra.gmra.mxu1 %vm375_vm2, %v4370_v0 }
 0x6ae   : > { %5799 = vmatmul.msk.f32.gmra.mxu2 %vm375_vm2, %v4259_v12 }
 0x6af   : > { %5801 = vmatmul.msk.f32.gmra.mxu3 %vm375_vm2, %v4259_v12 }
 0x6b1   : > { %5803 = vmatmul.msk.f32.gmra.mxu0 %vm375_vm2, %v4259_v12 }
 0x6b3   : > { %5805 = vmatmul.msk.f32.gmra.mxu1 %vm375_vm2, %v4371_v32 }
 0x6b6   : > { %5806 = vmatmul.msk.f32.vlgmr.msra.gmra.mxu2 %vm375_vm2, %v4370_v0 }
 0x6b7   : > { %5808 = vmatmul.msk.f32.vlgmr.msrb.gmra.mxu3 %vm375_vm2, %v4370_v0 }
 0x6be   : > { %5807 = vmatmul.msk.f32.gmra.mxu2 %vm375_vm2, %v4371_v32 }
 0x6bf   : > { %5809 = vmatmul.msk.f32.gmra.mxu3 %vm375_vm2, %v4371_v32 }
 0x6c3   : > { %v3570_v55 = vpop.f32.mrf.mxu1 }
 0x6c4   : > { %v3646_v59 = vadd.f32 %v3645_v17, %v3570_v55 }
 0x6cb   : > { %v3573_v47 = vpop.f32.mrf.mxu1 }
 0x6cc   : > { %v3649_v7 = vadd.f32 %v3648_v49, %v3573_v47 }
 0x6d5   : > { %v3668_v48 = vpop.f32.mrf.mxu1 }
 0x6d9   : > { %v3593_v38 = vpop.f32.mrf.mxu2  ;;  %v3616_v27 = vpop.f32.mrf.mxu3 }
 0x6da   : > { %v3669_v4 = vadd.f32 %v3668_v48, %v3593_v38 }
 0x6dc   : > { %v3774_v50 = vpop.f32.mrf.mxu0 }
 0x6dd   : > { %v3804_v37 = vadd.f32 %v3774_v50, %v3669_v4 }
 0x6de   : > { %v3671_v11 = vpop.f32.mrf.mxu1 }
 0x6e1   : > { %v3596_v35 = vpop.f32.mrf.mxu2 }
 0x6e2   : > { %v3619_v62 = vpop.f32.mrf.mxu3  ;;  %v3672_v29 = vadd.f32 %v3671_v11, %v3596_v35 }
 0x6e4   : > { %v3777_v8 = vpop.f32.mrf.mxu0 }
 0x6e5   : > { %v3807_v0 = vadd.f32 %v3777_v8, %v3672_v29 }
 0x6e6   : > { %v3797_v19 = vpop.f32.mrf.mxu1 }
 0x6e9   : > { %v3691_v34 = vpop.f32.mrf.mxu2 }
 0x6ea   : > { %v3751_v44 = vpop.f32.mrf.mxu3  ;;  %v3692_v46 = vadd.f32 %v3691_v34, %v3616_v27 }
 0x6eb   : > { %v3803_v39 = vadd.f32 %v3751_v44, %v3646_v59 }
 0x6ec   : > { %v3805_v38 = vadd.f32 %v3797_v19, %v3692_v46 }
 0x6ee   : > { %v3800_v61 = vpop.f32.mrf.mxu1 }
 0x6f1   : > { %v3694_v31 = vpop.f32.mrf.mxu2 }
 0x6f2   : > { %v3754_v33 = vpop.f32.mrf.mxu3  ;;  %v3695_v28 = vadd.f32 %v3694_v31, %v3619_v62 }
 0x6f3   : > { %v3806_v17 = vadd.f32 %v3754_v33, %v3649_v7 }
 0x6f4   : > { %v3808_v48 = vadd.f32 %v3800_v61, %v3695_v28 }
 0x6f6   : > { %v3909_v16 = vpop.f32.mrf.mxu0 }
 0x6f7   : > { %v3975_v41 = vpop.f32.mrf.mxu1  ;;  %v3917_v11 = vadd.f32 %v3909_v16, %v3805_v38 }
 0x6f9   : > { %v3863_v36 = vpop.f32.mrf.mxu2 }
 0x6fa   : > { %v3886_v57 = vpop.f32.mrf.mxu3  ;;  %v3915_v43 = vadd.f32 %v3863_v36, %v3803_v39 }
 0x6fb   : > { %v3916_v6 = vadd.f32 %v3886_v57, %v3804_v37 }
 0x6fc   : > { %v4027_v9 = vadd.f32 %v3975_v41, %v3915_v43 }
 0x6fe   : > { %v3912_v63 = vpop.f32.mrf.mxu0 }
 0x6ff   : > { %v3978_v20 = vpop.f32.mrf.mxu1  ;;  %v3920_v57 = vadd.f32 %v3912_v63, %v3808_v48 }
 0x701   : > { %v3866_v58 = vpop.f32.mrf.mxu2 }
 0x702   : > { %v3889_v23 = vpop.f32.mrf.mxu3  ;;  %v3918_v59 = vadd.f32 %v3866_v58, %v3806_v17 }
 0x703   : > { %v3919_v50 = vadd.f32 %v3889_v23, %v3807_v0 }
 0x706   : > { %v4087_v1 = vpop.f32.mrf.mxu0 }
 0x707   : > { %v4110_v51 = vpop.f32.mrf.mxu1  ;;  %v4139_v12 = vadd.f32 %v4087_v1, %v4027_v9  ;;  %v4030_v1 = vadd.f32 %v3978_v20, %v3918_v59 }
 0x709   : > { %v3998_v10 = vpop.f32.mrf.mxu2 }
 0x70a   : > { %v4021_v30 = vpop.f32.mrf.mxu3  ;;  %v4028_v21 = vadd.f32 %v3998_v10, %v3916_v6  ;;  %v4487_v10 = vpop.permute.xlu2 %4486 }
 0x70b   : > { %v4029_v31 = vadd.f32 %v4021_v30, %v3917_v11 }
 0x70c   : > { %v4140_v32 = vadd.f32 %v4110_v51, %v4028_v21 }
 0x70e   : > { %v4090_v18 = vpop.f32.mrf.mxu0 }
 0x70f   : > { %v4113_v53 = vpop.f32.mrf.mxu1 }
 0x711   : > { %v4001_v52 = vpop.f32.mrf.mxu2 }
 0x712   : > { %v4024_v14 = vpop.f32.mrf.mxu3  ;;  %v4031_v35 = vadd.f32 %v4001_v52, %v3919_v50 }
 0x713   : > { %v4032_v27 = vadd.f32 %v4024_v14, %v3920_v57 }
 0x714   : > { %v4143_v61 = vadd.f32 %v4113_v53, %v4031_v35 }
 0x716   : > { %v4222_v2 = vpop.f32.mrf.mxu0 }
 0x717   : > { %v4252_v44 = vadd.f32 %v4222_v2, %v4140_v32 }
 0x718   : > { %v4245_v40 = vpop.f32.mrf.mxu1 }
 0x719   : > { %v4133_v45 = vpop.f32.mrf.mxu2 }
 0x71a   : > { %v4199_v42 = vpop.f32.mrf.mxu3  ;;  %v4141_v19 = vadd.f32 %v4133_v45, %v4029_v31 }
 0x71b   : > { %v4251_v36 = vadd.f32 %v4199_v42, %v4139_v12  ;;  %v4142_v42 = vadd.f32 %v4090_v18, %v4030_v1 }
 0x71c   : > { %v4253_v4 = vadd.f32 %v4245_v40, %v4141_v19 }
 0x71e   : > { %v4225_v3 = vpop.f32.mrf.mxu0 }
 0x71f   : > { %v4255_v63 = vadd.f32 %v4225_v3, %v4143_v61  ;;  %v4492_v3 = vpop.permute.xlu1 %4491  ;;  %v7983_v61 = vld [vmem:[#allocation4 + $0x240] sm:$0xff] }
 0x720   : > { %v4248_v25 = vpop.f32.mrf.mxu1 }
 0x721   : > { %v4136_v60 = vpop.f32.mrf.mxu2 }
 0x722   : > { %v4202_v56 = vpop.f32.mrf.mxu3  ;;  %v4144_v33 = vadd.f32 %v4136_v60, %v4032_v27 }
 0x723   : > { %v4254_v52 = vadd.f32 %v4202_v56, %v4142_v42 }
 0x724   : > { %v4256_v2 = vadd.f32 %v4248_v25, %v4144_v33 }
 0x726   : > { %v4357_v55 = vpop.f32.mrf.mxu0 }
 0x727   : > { %v4365_v45 = vadd.f32 %v4357_v55, %v4253_v4 }
 0x728   : > { %v4423_v62 = vpop.f32.mrf.mxu1 }
 0x729   : > { %v4311_v26 = vpop.f32.mrf.mxu2 }
 0x72a   : > { %v4334_v15 = vpop.f32.mrf.mxu3  ;;  %v4363_v47 = vadd.f32 %v4311_v26, %v4251_v36 }
 0x72b   : > { %v4364_v49 = vadd.f32 %v4334_v15, %v4252_v44 }
 0x72c   : > { %v4475_v23 = vadd.f32 %v4423_v62, %v4363_v47 }
 0x72e   : > { %v4360_v58 = vpop.f32.mrf.mxu0  ;;  %v4494_v26 = vadd.f32 %v4487_v10, %v4475_v23  ;;  %v7987_v23 = vld [vmem:[#allocation4 + $0x248] sm:$0xff] }
 0x72f   : > { %v4368_v15 = vadd.f32 %v4360_v58, %v4256_v2 }
 0x730   : > { %v4426_v53 = vpop.f32.mrf.mxu1  ;;  %v4500_v43 = vmax.f32 %v4494_v26, 0.0 }
 0x731   : > { %v4314_v22 = vpop.f32.mrf.mxu2 }
 0x732   : > { %v4337_v54 = vpop.f32.mrf.mxu3  ;;  %v4366_v37 = vadd.f32 %v4314_v22, %v4254_v52  ;;  %v4506_v22 = vsel %vm7141_vm13, %v4500_v43, 0.0 }
 0x733   : > { %v4367_v14 = vadd.f32 %v4337_v54, %v4255_v63 }
 0x734   : > { %v4478_v40 = vadd.f32 %v4426_v53, %v4366_v37 }
 0x736   : > { %v4497_v46 = vadd.f32 %v4492_v3, %v4478_v40 }
 0x738   : > { %v4503_v0 = vmax.f32 %v4497_v46, 0.0 }
 0x739   : > { %v4446_v34 = vpop.f32.mrf.mxu2 }
 0x73a   : > { %v4476_v8 = vadd.f32 %v4446_v34, %v4364_v49  ;;  %v4469_v41 = vpop.f32.mrf.mxu3  ;;  %v4509_v5 = vsel %vm7141_vm13, %v4503_v0, 0.0  ;;  %v8019_v0 = vld [vmem:[#allocation4 + $0x260] sm:$0xff] }
 0x73b   : > { %v4477_v56 = vadd.f32 %v4469_v41, %v4365_v45 }
 0x73c   : > { %v4495_v51 = vadd.f32 %v4487_v10, %v4476_v8 }
 0x73d   : > { %v4496_v7 = vadd.f32 %v4487_v10, %v4477_v56 }
 0x73e   : > { %v4501_v16 = vmax.f32 %v4495_v51, 0.0 }
 0x73f   : > { %v4502_v54 = vmax.f32 %v4496_v7, 0.0  ;;  %v4561_v7 = vld [vmem:[#allocation4 + $0x258] sm:$0xff] }
 0x740   : > { %v4507_v30 = vsel %vm7166_vm11, %v4501_v16, 0.0 }
 0x741   : > { %v4449_v20 = vpop.f32.mrf.mxu2  ;;  %4520 = vrot.lane.b32.xlu2 %v4507_v30, %s6761_s6  ;;  %v4508_v12 = vsel %vm7170_vm12, %v4502_v54, 0.0 }
 0x742   : > { %v4479_v60 = vadd.f32 %v4449_v20, %v4367_v14  ;;  %v4472_v18 = vpop.f32.mrf.mxu3  ;;  %v4560_v20 = vld [vmem:[#allocation4 + $0x250] sm:$0xff] }
 0x743   : > { %v4480_v39 = vadd.f32 %v4472_v18, %v4368_v15 }
 0x744   : > { %v4498_v6 = vadd.f32 %v4492_v3, %v4479_v60 }
 0x745   : > { %v4499_v25 = vadd.f32 %v4492_v3, %v4480_v39 }
 0x746   : > { %v4504_v29 = vmax.f32 %v4498_v6, 0.0 }
 0x747   : > { %v4505_v21 = vmax.f32 %v4499_v25, 0.0 }
 0x748   : > { %v4510_v28 = vsel %vm7166_vm11, %v4504_v29, 0.0 }
 0x749   : > { %v4511_v9 = vsel %vm7170_vm12, %v4505_v21, 0.0  ;;  %4526 = vrot.lane.b32.xlu0 %v4510_v28, %s6761_s6  ;;  %4518 = vrot.lane.b32.xlu2 %v4506_v22, %s6761_s6 }
 0x74a   : > { %4528 = vrot.lane.b32.xlu1 %v4511_v9, %s6761_s6 }
 0x751   : > { %4522 = vrot.lane.b32.xlu0 %v4508_v12, %s6761_s6 }
 0x752   : > { %4524 = vrot.lane.b32.xlu1 %v4509_v5, %s6761_s6 }
 0x79b   : > { %v4521_v32 = vpop.permute.xlu2 %4520 }
 0x7a3   : > { %v4519_v55 = vpop.permute.xlu2 %4518 }
 0x7a4   : > { %v7922_v17 = vsel %vm198_vm0, %v4519_v55, %v4521_v32  ;;  %4542 = vst.msk [vmem:[#allocation2] sm:$0xff] %vm201_vm10, %v4519_v55 }
 0x7a5   : > { %4543 = vst [vmem:[#allocation2 + $0x8] sm:$0xff] %v7922_v17 }
 0x7ab   : > { %v4553_v47 = vld [vmem:[#allocation2] sm:$0xff] }
 0x7ac   : > { %v6571_v31 = vpack.i.bf16 %v7922_v17, %v4553_v47 }
 0x7bb   : > { %v4527_v48 = vpop.permute.xlu0 %4526 }
 0x7bc   : > { %v4529_v38 = vpop.permute.xlu1 %4528 }
 0x7bd   : > { %4549 = vst.msk [vmem:[#allocation2 + $0x38] sm:$0xff] %vm198_vm0, %v4529_v38  ;;  %v7928_v24 = vsel %vm198_vm0, %v4527_v48, %v4529_v38 }
 0x7c3   : > { %v4523_v13 = vpop.permute.xlu0 %4522 }
 0x7c4   : > { %v7931_v50 = vsel %vm198_vm0, %v4521_v32, %v4523_v13  ;;  %4545 = vst.msk [vmem:[#allocation2 + $0x18] sm:$0xff] %vm198_vm0, %v4523_v13  ;;  %v4525_v44 = vpop.permute.xlu1 %4524  ;;  %v4569_v36 = vld [vmem:[#allocation2 + $0x38] sm:$0xff] }
 0x7c5   : > { %4544 = vst [vmem:[#allocation2 + $0x10] sm:$0xff] %v7931_v50  ;;  %v7936_v57 = vsel %vm198_vm0, %v4525_v44, %v4527_v48  ;;  %v6551_v59 = vpack.i.bf16 %v4569_v36, %v7928_v24  ;;  %v6581_v41 = vpack.i.bf16 %v7931_v50, %v7928_v24  ;;  %v6576_v10 = vpack.i.bf16 %v7931_v50, %v7922_v17 }
 0x7c6   : > { %4546 = vst.msk [vmem:[#allocation2 + $0x20] sm:$0xff] %vm201_vm10, %v4525_v44  ;;  %v6556_v11 = vpack.i.bf16 %v7922_v17, %v7936_v57  ;;  %v6591_v1 = vpack.i.bf16 %v7928_v24, %v7936_v57  ;;  %vm8235_vm10 = vmmov %vm8228_vm14  ;;  %vm8240_vm14 = vcmask 744448  }
 0x7c7   : > { %6552 = vrot.lane.b32.xlu0 %v6551_v59, %s6752_s21  ;;  %vm8237_vm11 = vmmov %vm8235_vm10 }
 0x7c8   : > { %6557 = vrot.lane.b32.xlu2 %v6556_v11, %s6752_s21  ;;  %vm8241_vm7 = vmmov %vm8235_vm10 }
 0x7c9   : > { %vm8242_vm8 = vmmov %vm8241_vm7 }
 0x7ca   : > { %vm8243_vm9 = vmmov %vm8240_vm14 }
 0x7cb   : > { %v4565_v35 = vld [vmem:[#allocation2 + $0x18] sm:$0xff]  ;;  %vm8244_vm6 = vmmov %vm8241_vm7 }
 0x7cc   : > { %v6546_v49 = vpack.i.bf16 %v4565_v35, %v7931_v50  ;;  %v6681_v62 = vpack.i.bf16 %v4565_v35, %v4569_v36 }
 0x7cd   : > { %v4556_v27 = vld [vmem:[#allocation2 + $0x20] sm:$0xff] }
 0x7ce   : > { %4698 = vmatpush.msra.mxu3 %v4556_v27  ;;  %6547 = vrot.lane.b32.xlu1 %v6546_v49, %s6752_s21  ;;  %v6561_v34 = vpack.i.bf16 %v4553_v47, %v4556_v27  ;;  %v6566_v8 = vpack.i.bf16 %v7936_v57, %v4556_v27 }
 0x7d0   : > { %4699 = vmatpush.msra.mxu3 %v4553_v47  ;;  %6562 = vrot.lane.b32.xlu0 %v6561_v34, %s6752_s21  ;;  %s5870_s21 = smul.u32 3, %s8258_s16 }
 0x7d1   : > { %6572 = vrot.lane.b32.xlu2 %v6571_v31, %s6753_s22  ;;  %5818 = vmatmul.msk.f32.vlgmr.msra.gmra.mxu3 %vm375_vm2, %v7983_v61 }
 0x7d2   : > { %s182_s24 = scalar_lea.vmem %s8159_s3, %s5870_s21 }
 0x7d6   : > { %6567 = vrot.lane.b32.xlu1 %v6566_v8, %s6753_s22 }
 0x7d8   : > { %6582 = vrot.lane.b32.xlu0 %v6581_v41, %s6753_s22 }
 0x7d9   : > { %6577 = vrot.lane.b32.xlu2 %v6576_v10, %s6754_s27  ;;  %5819 = vmatmul.msk.f32.gmra.mxu3 %vm375_vm2, %v7987_v23 }
 0x7de   : > { %6592 = vrot.lane.b32.xlu1 %v6591_v1, %s6754_s27 }
 0x7e0   : > { %6587 = vrot.lane.b32.xlu0 %v6561_v34, %s6754_s27 }
 0x7e1   : > { %6602 = vrot.lane.b32.xlu2 %v6681_v62, %s6754_s27 }
 0x7e6   : > { %6597 = vrot.lane.b32.xlu1 %v6681_v62, %s6753_s22 }
 0x7e8   : > { %6612 = vrot.lane.b32.xlu0 %v6551_v59, %s6755_s28 }
 0x7e9   : > { %6622 = vrot.lane.b32.xlu2 %v6556_v11, %s6755_s28 }
 0x7ee   : > { %6607 = vrot.lane.b32.xlu1 %v6546_v49, %s6755_s28 }
 0x7f0   : > { %6617 = vrot.lane.b32.xlu0 %v6561_v34, %s6755_s28 }
 0x7f1   : > { %6627 = vrot.lane.b32.xlu2 %v6571_v31, %s6756_s29 }
 0x7f6   : > { %6632 = vrot.lane.b32.xlu1 %v6566_v8, %s6756_s29 }
 0x7f8   : > { %6642 = vrot.lane.b32.xlu0 %v6566_v8, %s6757_s30 }
 0x7f9   : > { %6647 = vrot.lane.b32.xlu2 %v6551_v59, %s6756_s29 }
 0x7fe   : > { %6637 = vrot.lane.b32.xlu1 %v6571_v31, %s6757_s30 }
 0x800   : > { %6652 = vrot.lane.b32.xlu0 %v6546_v49, %s6756_s29 }
 0x801   : > { %6672 = vrot.lane.b32.xlu2 %v6591_v1, %s6758_s4 }
 0x806   : > { %6662 = vrot.lane.b32.xlu1 %v6581_v41, %s6757_s30 }
 0x808   : > { %6657 = vrot.lane.b32.xlu0 %v6576_v10, %s6758_s4 }
 0x809   : > { %6677 = vrot.lane.b32.xlu2 %v6681_v62, %s6757_s30 }
 0x80e   : > { %6667 = vrot.lane.b32.xlu1 %v6561_v34, %s6758_s4 }
 0x810   : > { %6682 = vrot.lane.b32.xlu0 %v6681_v62, %s6758_s4 }
 0x811   : > { %6687 = vrot.lane.b32.xlu2 %v6546_v49, %s6759_s5  ;;  %v8040_v49 = vld [vmem:[#allocation4 + $0x268] sm:$0xff] }
 0x816   : > { %6692 = vrot.lane.b32.xlu1 %v6551_v59, %s6759_s5 }
 0x818   : > { %6697 = vrot.lane.b32.xlu0 %v6556_v11, %s6759_s5 }
 0x81e   : > { %6702 = vrot.lane.b32.xlu1 %v6561_v34, %s6759_s5 }
 0x822   : > { %v6558_v33 = vpop.permute.xlu2 %6557 }
 0x823   : > { %v6559_v63 = vunpack.i.l.bf16 %v6558_v33  ;;  %v6560_v14 = vunpack.i.h.bf16 %v6558_v33 }
 0x82b   : > { %v6573_v19 = vpop.permute.xlu2 %6572 }
 0x82c   : > { %v6575_v56 = vunpack.i.h.bf16 %v6573_v19  ;;  %v6574_v6 = vunpack.i.l.bf16 %v6573_v19 }
 0x82e   : > { %v4769_v54 = vsel %vm545_vm3, %v6574_v6, %v6575_v56 }
 0x833   : > { %v7991_v51 = vpop.permute.xlu2 %6577 }
 0x834   : > { %v6580_v5 = vunpack.i.h.bf16 %v7991_v51  ;;  %v6579_v55 = vunpack.i.l.bf16 %v7991_v51 }
 0x836   : > { %v4876_v35 = vsel %vm658_vm4, %v6579_v55, %v6580_v5 }
 0x839   : > { %v6553_v42 = vpop.permute.xlu0 %6552 }
 0x83a   : > { %v6555_v58 = vunpack.i.h.bf16 %v6553_v42  ;;  %v6554_v16 = vunpack.i.l.bf16 %v6553_v42 }
 0x83b   : > { %v7995_v4 = vpop.permute.xlu2 %6602 }
 0x83c   : > { %v4598_v52 = vsel %vm362_vm1, %v6559_v63, %v6554_v16  ;;  %v4599_v2 = vsel %vm362_vm1, %v6554_v16, %v6555_v58 }
 0x83d   : > { %4648 = vmatpush.msrb.mxu1 %v4598_v52  ;;  %4670 = vmatpush.msrb.mxu2 %v4599_v2 }
 0x840   : > { %v6548_v26 = vpop.permute.xlu1 %6547 }
 0x841   : > { %v6550_v30 = vunpack.i.h.bf16 %v6548_v26  ;;  %v6549_v15 = vunpack.i.l.bf16 %v6548_v26 }
 0x842   : > { %v6563_v37 = vpop.permute.xlu0 %6562 }
 0x843   : > { %v6565_v45 = vunpack.i.h.bf16 %v6563_v37  ;;  %v6564_v53 = vunpack.i.l.bf16 %v6563_v37  ;;  %v4595_v60 = vsel %vm362_vm1, %v6560_v14, %v6549_v15  ;;  %v4596_v18 = vsel %vm362_vm1, %v6549_v15, %v6550_v30  ;;  %v8009_v21 = vpop.permute.xlu2 %6622 }
 0x844   : > { %4649 = vmatpush.msrb.mxu1 %v4595_v60  ;;  %4671 = vmatpush.msrb.mxu2 %v4596_v18  ;;  %v6624_v41 = vunpack.i.l.bf16 %v8009_v21  ;;  %v6625_v58 = vunpack.i.h.bf16 %v8009_v21 }
 0x845   : > { %v4597_v3 = vsel %vm362_vm1, %v6564_v53, %v6559_v63  ;;  %5814 = vmatmul.msk.f32.vlgmr.msrb.gmra.mxu1 %vm375_vm2, %v4560_v20  ;;  %5816 = vmatmul.msk.f32.vlgmr.msrb.gmra.mxu2 %vm375_vm2, %v4560_v20  ;;  %v4594_v39 = vsel %vm362_vm1, %v6565_v45, %v6560_v14  ;;  %v4857_v63 = vld [vmem:[#allocation4 + $0x270] sm:$0xff]  ;;  %vm8232_vm1 = vcmask 883712   ;;  %v4858_v53 = vld [vmem:[#allocation4 + $0x278] sm:$0xff] }
 0x846   : > { %4626 = vmatpush.msrb.mxu0 %v4597_v3  ;;  %4742 = vmatpush.msra.mxu1 %v7928_v24  ;;  %v6605_v24 = vunpack.i.h.bf16 %v7995_v4  ;;  %vm8236_vm13 = vmmov %vm8232_vm1 }
 0x847   : > { %vm8238_vm12 = vmmov %vm8232_vm1 }
 0x848   : > { %4627 = vmatpush.msrb.mxu0 %v4594_v39  ;;  %4743 = vmatpush.msra.mxu1 %v7931_v50  ;;  %v6568_v43 = vpop.permute.xlu1 %6567  ;;  %v4877_v47 = vsel %vm658_vm4, %v6580_v5, %v6605_v24  ;;  %vm8239_vm15 = vmmov %vm8232_vm1 }
 0x849   : > { %5812 = vmatmul.msk.f32.vlgmr.msrb.gmra.mxu0 %vm375_vm2, %v4560_v20  ;;  %v6570_v40 = vunpack.i.h.bf16 %v6568_v43  ;;  %v6569_v25 = vunpack.i.l.bf16 %v6568_v43 }
 0x84a   : > { %4720 = vmatpush.msra.mxu0 %v7936_v57  ;;  %v8007_v29 = vpop.permute.xlu0 %6582 }
 0x84b   : > { %v6585_v28 = vunpack.i.h.bf16 %v8007_v29  ;;  %v6584_v22 = vunpack.i.l.bf16 %v8007_v29  ;;  %v4772_v46 = vsel %vm545_vm3, %v6569_v25, %v6570_v40  ;;  %v8031_v59 = vpop.permute.xlu2 %6627 }
 0x84c   : > { %4721 = vmatpush.msra.mxu0 %v7922_v17  ;;  %4801 = vmatpush.msra.mxu2 %v4772_v46  ;;  %v6604_v17 = vunpack.i.l.bf16 %v7995_v4  ;;  %v6630_v3 = vunpack.i.h.bf16 %v8031_v59  ;;  %v6629_v39 = vunpack.i.l.bf16 %v8031_v59  ;;  %v8080_v46 = vld [vmem:[#allocation4 + $0x290] sm:$0xff] }
 0x84d   : > { %v4773_v9 = vsel %vm545_vm3, %v6570_v40, %v6584_v22  ;;  %5815 = vmatmul.msk.f32.gmra.mxu1 %vm375_vm2, %v4561_v7  ;;  %5817 = vmatmul.msk.f32.gmra.mxu2 %vm375_vm2, %v4561_v7  ;;  %v4770_v12 = vsel %vm545_vm3, %v6575_v56, %v6585_v28 }
 0x84e   : > { %4823 = vmatpush.msrb.mxu3 %v4773_v9  ;;  %4802 = vmatpush.msra.mxu2 %v4769_v54 }
 0x850   : > { %4824 = vmatpush.msrb.mxu3 %v4770_v12  ;;  %v6593_v32 = vpop.permute.xlu1 %6592 }
 0x851   : > { %5813 = vmatmul.msk.f32.gmra.mxu0 %vm375_vm2, %v4561_v7  ;;  %v6595_v48 = vunpack.i.h.bf16 %v6593_v32  ;;  %v6594_v38 = vunpack.i.l.bf16 %v6593_v32  ;;  %5826 = vmatmul.msk.f32.vlgmr.msrb.gmra.mxu3 %vm375_vm2, %v8019_v0 }
 0x852   : > { %v6588_v13 = vpop.permute.xlu0 %6587 }
 0x853   : > { %v6590_v50 = vunpack.i.h.bf16 %v6588_v13  ;;  %v6589_v44 = vunpack.i.l.bf16 %v6588_v13  ;;  %v4879_v36 = vsel %vm658_vm4, %v6594_v38, %v6595_v48  ;;  %v4880_v57 = vsel %vm658_vm4, %v6595_v48, %v6604_v17 }
 0x854   : > { %4929 = vmatpush.msrb.mxu2 %v4879_v36  ;;  %4951 = vmatpush.msra.mxu3 %v4880_v57  ;;  %v8094_v36 = vld [vmem:[#allocation4 + $0x298] sm:$0xff] }
 0x855   : > { %v4878_v11 = vsel %vm658_vm4, %v6589_v44, %v6594_v38  ;;  %5822 = vmatmul.msk.f32.vlgmr.msra.gmra.mxu1 %vm375_vm2, %v7983_v61  ;;  %5824 = vmatmul.msk.f32.vlgmr.msra.gmra.mxu2 %vm375_vm2, %v8019_v0  ;;  %v4875_v62 = vsel %vm658_vm4, %v6590_v50, %v6579_v55  ;;  %vm8234_vm4 = vmmov %vm8232_vm1  ;;  %v4963_v55 = vld [vmem:[#allocation4 + $0x280] sm:$0xff] }
 0x856   : > { %4907 = vmatpush.msrb.mxu1 %v4878_v11  ;;  %4930 = vmatpush.msrb.mxu2 %v4876_v35 }
 0x857   : > { %4952 = vmatpush.msra.mxu3 %v4877_v47 }
 0x858   : > { %4908 = vmatpush.msrb.mxu1 %v4875_v62  ;;  %v6598_v27 = vpop.permute.xlu1 %6597 }
 0x859   : > { %5820 = vmatmul.msk.f32.vlgmr.msra.gmra.mxu0 %vm375_vm2, %v7983_v61  ;;  %v6599_v34 = vunpack.i.l.bf16 %v6598_v27  ;;  %5827 = vmatmul.msk.f32.gmra.mxu3 %vm375_vm2, %v8040_v49  ;;  %v6600_v8 = vunpack.i.h.bf16 %v6598_v27  ;;  %v6648_v61 = vpop.permute.xlu2 %6647 }
 0x85a   : > { %v6613_v31 = vpop.permute.xlu0 %6612  ;;  %v6650_v52 = vunpack.i.h.bf16 %v6648_v61  ;;  %v6649_v2 = vunpack.i.l.bf16 %v6648_v61 }
 0x85b   : > { %v6615_v10 = vunpack.i.h.bf16 %v6613_v31  ;;  %v6614_v1 = vunpack.i.l.bf16 %v6613_v31  ;;  %v4774_v33 = vsel %vm545_vm3, %v6584_v22, %v6599_v34  ;;  %v4771_v42 = vsel %vm545_vm3, %v6585_v28, %v6600_v8  ;;  %vm8233_vm3 = vmmov %vm8232_vm1 }
 0x85c   : > { %4845 = vmatpush.msrb.mxu0 %v4774_v33  ;;  %v5087_v22 = vsel %vm8236_vm13, %v6629_v39, %v6630_v3  ;;  %v5175_v33 = vld [vmem:[#allocation4 + $0x2a0] sm:$0xff] }
 0x85d   : > { %v4985_v19 = vsel %vm771_vm5, %v6624_v41, %v6614_v1  ;;  %v4986_v51 = vsel %vm771_vm5, %v6614_v1, %v6615_v10  ;;  %5823 = vmatmul.msk.f32.gmra.mxu1 %vm375_vm2, %v7987_v23  ;;  %5825 = vmatmul.msk.f32.gmra.mxu2 %vm375_vm2, %v8040_v49 }
 0x85e   : > { %5035 = vmatpush.msra.mxu1 %v4985_v19  ;;  %5057 = vmatpush.msra.mxu2 %v4986_v51 }
 0x85f   : > { %4846 = vmatpush.msrb.mxu0 %v4771_v42 }
 0x860   : > { %v6608_v16 = vpop.permute.xlu1 %6607 }
 0x861   : > { %5821 = vmatmul.msk.f32.gmra.mxu0 %vm375_vm2, %v7987_v23  ;;  %v6610_v4 = vunpack.i.h.bf16 %v6608_v16  ;;  %v6609_v26 = vunpack.i.l.bf16 %v6608_v16  ;;  %5834 = vmatmul.msk.f32.vlgmr.msra.gmra.mxu3 %vm375_vm2, %v4857_v63  ;;  %v5092_v23 = vsel %vm8232_vm1, %v6649_v2, %v6650_v52  ;;  %v8074_v7 = vpop.permute.xlu2 %6672  ;;  %vm8245_vm1 = vmmov %vm8244_vm6 }
 0x862   : > { %v6618_v14 = vpop.permute.xlu0 %6617  ;;  %v6675_v12 = vunpack.i.h.bf16 %v8074_v7  ;;  %v6674_v5 = vunpack.i.l.bf16 %v8074_v7  ;;  %v5282_v7 = vld [vmem:[#allocation4 + $0x2b8] sm:$0xff] }
 0x863   : > { %v6620_v30 = vunpack.i.h.bf16 %v6618_v14  ;;  %v6619_v15 = vunpack.i.l.bf16 %v6618_v14  ;;  %v4982_v37 = vsel %vm771_vm5, %v6625_v58, %v6609_v26  ;;  %v4983_v20 = vsel %vm771_vm5, %v6609_v26, %v6610_v4  ;;  %v5176_v26 = vld [vmem:[#allocation4 + $0x2a8] sm:$0xff] }
 0x864   : > { %5036 = vmatpush.msra.mxu1 %v4982_v37  ;;  %5058 = vmatpush.msra.mxu2 %v4983_v20  ;;  %v5303_v44 = vsel %vm8240_vm14, %v6674_v5, %v6675_v12 }
 0x865   : > { %v4984_v45 = vsel %vm771_vm5, %v6619_v15, %v6624_v41  ;;  %5830 = vmatmul.msk.f32.vlgmr.msrb.gmra.mxu1 %vm375_vm2, %v4857_v63  ;;  %5832 = vmatmul.msk.f32.vlgmr.msrb.gmra.mxu2 %vm375_vm2, %v4857_v63  ;;  %v4981_v60 = vsel %vm771_vm5, %v6620_v30, %v6625_v58 }
 0x866   : > { %5013 = vmatpush.msra.mxu0 %v4984_v45  ;;  %5163 = vmatpush.msrb.mxu1 %v5092_v23 }
 0x868   : > { %5014 = vmatpush.msra.mxu0 %v4981_v60  ;;  %v6633_v18 = vpop.permute.xlu1 %6632 }
 0x869   : > { %5828 = vmatmul.msk.f32.vlgmr.msrb.gmra.mxu0 %vm375_vm2, %v8019_v0  ;;  %v6635_v43 = vunpack.i.h.bf16 %v6633_v18  ;;  %v6634_v56 = vunpack.i.l.bf16 %v6633_v18  ;;  %5835 = vmatmul.msk.f32.gmra.mxu3 %vm375_vm2, %v4858_v53  ;;  %v6678_v50 = vpop.permute.xlu2 %6677 }
 0x86a   : > { %v6643_v6 = vpop.permute.xlu0 %6642  ;;  %v6679_v59 = vunpack.i.l.bf16 %v6678_v50  ;;  %v6680_v8 = vunpack.i.h.bf16 %v6678_v50 }
 0x86b   : > { %v6645_v40 = vunpack.i.h.bf16 %v6643_v6  ;;  %v6644_v25 = vunpack.i.l.bf16 %v6643_v6  ;;  %v5090_v29 = vsel %vm8233_vm3, %v6634_v56, %v6635_v43  ;;  %v5091_v21 = vsel %vm8234_vm4, %v6635_v43, %v6649_v2  ;;  %vm8246_vm3 = vmmov %vm8243_vm9  ;;  %v5281_v43 = vld [vmem:[#allocation4 + $0x2b0] sm:$0xff] }
 0x86c   : > { %5119 = vmatpush.msrb.mxu3 %v5090_v29  ;;  %5141 = vmatpush.msrb.mxu0 %v5091_v21  ;;  %vm8247_vm4 = vmmov %vm8246_vm3 }
 0x86d   : > { %v5196_v28 = vsel %vm8235_vm10, %v6644_v25, %v6645_v40  ;;  %5831 = vmatmul.msk.f32.gmra.mxu1 %vm375_vm2, %v4858_v53  ;;  %5833 = vmatmul.msk.f32.gmra.mxu2 %vm375_vm2, %v4858_v53  ;;  %vm8248_vm10 = vmmov %vm8246_vm3 }
 0x86e   : > { %5225 = vmatpush.msrb.mxu2 %v5196_v28  ;;  %5120 = vmatpush.msrb.mxu3 %v5087_v22  ;;  %vm8249_vm13 = vmmov %vm8246_vm3  ;;  %v5387_v28 = vld [vmem:[#allocation4 + $0x2c0] sm:$0xff]  ;;  %v4701_v22 = vpop.f32.mrf.mxu3 }
 0x870   : > { %v6638_v9 = vpop.permute.xlu1 %6637 }
 0x871   : > { %5829 = vmatmul.msk.f32.gmra.mxu0 %vm375_vm2, %v8040_v49  ;;  %v6640_v54 = vunpack.i.h.bf16 %v6638_v9  ;;  %v6639_v0 = vunpack.i.l.bf16 %v6638_v9  ;;  %5842 = vmatmul.msk.f32.vlgmr.msrb.gmra.mxu3 %vm375_vm2, %v8080_v46  ;;  %v4964_v49 = vld [vmem:[#allocation4 + $0x288] sm:$0xff]  ;;  %v6688_v4 = vpop.permute.xlu2 %6687 }
 0x872   : > { %v6653_v32 = vpop.permute.xlu0 %6652  ;;  %v6690_v15 = vunpack.i.h.bf16 %v6688_v4  ;;  %v6689_v37 = vunpack.i.l.bf16 %v6688_v4 }
 0x873   : > { %v6655_v17 = vunpack.i.h.bf16 %v6653_v32  ;;  %v6654_v48 = vunpack.i.l.bf16 %v6653_v32  ;;  %v5193_v38 = vsel %vm8237_vm11, %v6639_v0, %v6640_v54  ;;  %vm8250_vm11 = vcmask 736256  }
 0x874   : > { %5226 = vmatpush.msrb.mxu2 %v5193_v38  ;;  %vm8253_vm14 = vmmov %vm8250_vm11 }
 0x875   : > { %v5088_v24 = vsel %vm8238_vm12, %v6630_v3, %v6654_v48  ;;  %v5089_v13 = vsel %vm8239_vm15, %v6654_v48, %v6655_v17  ;;  %5838 = vmatmul.msk.f32.vlgmr.msra.gmra.mxu1 %vm375_vm2, %v4963_v55  ;;  %5840 = vmatmul.msk.f32.vlgmr.msra.gmra.mxu2 %vm375_vm2, %v4963_v55  ;;  %vm8251_vm12 = vmmov %vm8250_vm11 }
 0x876   : > { %5142 = vmatpush.msrb.mxu0 %v5088_v24  ;;  %5164 = vmatpush.msrb.mxu1 %v5089_v13  ;;  %vm8252_vm15 = vmmov %vm8250_vm11 }
 0x877   : > { %5353 = vmatpush.msra.mxu2 %v5303_v44  ;;  %v5407_v39 = vsel %vm8252_vm15, %v6689_v37, %v6690_v15 }
 0x878   : > { %v6663_v57 = vpop.permute.xlu1 %6662 }
 0x879   : > { %5836 = vmatmul.msk.f32.vlgmr.msra.gmra.mxu0 %vm375_vm2, %v4963_v55  ;;  %v6665_v11 = vunpack.i.h.bf16 %v6663_v57  ;;  %v6664_v35 = vunpack.i.l.bf16 %v6663_v57  ;;  %5843 = vmatmul.msk.f32.gmra.mxu3 %vm375_vm2, %v8094_v36 }
 0x87a   : > { %v6658_v47 = vpop.permute.xlu0 %6657 }
 0x87b   : > { %v6660_v62 = vunpack.i.h.bf16 %v6658_v47  ;;  %v6659_v27 = vunpack.i.l.bf16 %v6658_v47  ;;  %v5197_v34 = vsel %vm8241_vm7, %v6645_v40, %v6664_v35  ;;  %v5198_v31 = vsel %vm8242_vm8, %v6664_v35, %v6679_v59  ;;  %vm8254_vm7 = vmmov %vm8250_vm11 }
 0x87c   : > { %5247 = vmatpush.msra.mxu3 %v5197_v34  ;;  %5269 = vmatpush.msra.mxu0 %v5198_v31  ;;  %v5194_v10 = vsel %vm8244_vm6, %v6640_v54, %v6665_v11  ;;  %v5195_v1 = vsel %vm8245_vm1, %v6665_v11, %v6680_v8  ;;  %vm8255_vm8 = vmmov %vm8254_vm7  ;;  %vm5500_vm6 = vcmask 1041408  }
 0x87d   : > { %v5300_v41 = vsel %vm8243_vm9, %v6659_v27, %v6660_v62  ;;  %5839 = vmatmul.msk.f32.gmra.mxu1 %vm375_vm2, %v4964_v49  ;;  %5841 = vmatmul.msk.f32.gmra.mxu2 %vm375_vm2, %v4964_v49  ;;  %vm5498_vm9 = vcmask 1040384  }
 0x87e   : > { %5354 = vmatpush.msra.mxu2 %v5300_v41  ;;  %5248 = vmatpush.msra.mxu3 %v5194_v10 }
 0x87f   : > { %5270 = vmatpush.msra.mxu0 %v5195_v1 }
 0x880   : > { %v6668_v19 = vpop.permute.xlu1 %6667 }
 0x881   : > { %5837 = vmatmul.msk.f32.gmra.mxu0 %vm375_vm2, %v4964_v49  ;;  %v6670_v51 = vunpack.i.h.bf16 %v6668_v19  ;;  %v6669_v61 = vunpack.i.l.bf16 %v6668_v19  ;;  %5850 = vmatmul.msk.f32.vlgmr.msra.gmra.mxu3 %vm375_vm2, %v5175_v33 }
 0x882   : > { %v6683_v42 = vpop.permute.xlu0 %6682 }
 0x883   : > { %v6685_v63 = vunpack.i.h.bf16 %v6683_v42  ;;  %v6684_v58 = vunpack.i.l.bf16 %v6683_v42  ;;  %v5302_v16 = vsel %vm8246_vm3, %v6669_v61, %v6674_v5  ;;  %v5299_v2 = vsel %vm8248_vm10, %v6670_v51, %v6659_v27 }
 0x884   : > { %5331 = vmatpush.msra.mxu1 %v5302_v16 }
 0x885   : > { %v5304_v52 = vsel %vm8247_vm4, %v6675_v12, %v6684_v58  ;;  %5846 = vmatmul.msk.f32.vlgmr.msrb.gmra.mxu1 %vm375_vm2, %v8080_v46  ;;  %5848 = vmatmul.msk.f32.vlgmr.msrb.gmra.mxu2 %vm375_vm2, %v5175_v33  ;;  %v5301_v14 = vsel %vm8249_vm13, %v6660_v62, %v6685_v63 }
 0x886   : > { %5375 = vmatpush.msrb.mxu3 %v5304_v52  ;;  %5332 = vmatpush.msra.mxu1 %v5299_v2 }
 0x888   : > { %5376 = vmatpush.msrb.mxu3 %v5301_v14  ;;  %v6693_v30 = vpop.permute.xlu1 %6692 }
 0x889   : > { %5844 = vmatmul.msk.f32.vlgmr.msrb.gmra.mxu0 %vm375_vm2, %v8080_v46  ;;  %v6695_v20 = vunpack.i.h.bf16 %v6693_v30  ;;  %v6694_v45 = vunpack.i.l.bf16 %v6693_v30  ;;  %5851 = vmatmul.msk.f32.gmra.mxu3 %vm375_vm2, %v5176_v26  ;;  %v4704_v46 = vpop.f32.mrf.mxu3 }
 0x88a   : > { %v6698_v23 = vpop.permute.xlu0 %6697 }
 0x88b   : > { %v6700_v53 = vunpack.i.h.bf16 %v6698_v23  ;;  %v6699_v60 = vunpack.i.l.bf16 %v6698_v23  ;;  %v5410_v18 = vsel %vm8250_vm11, %v6694_v45, %v6695_v20 }
 0x88c   : > { %5481 = vmatpush.msrb.mxu2 %v5410_v18 }
 0x88d   : > { %v5409_v3 = vsel %vm8251_vm12, %v6699_v60, %v6694_v45  ;;  %5847 = vmatmul.msk.f32.gmra.mxu1 %vm375_vm2, %v8094_v36  ;;  %5849 = vmatmul.msk.f32.gmra.mxu2 %vm375_vm2, %v5176_v26  ;;  %v5406_v56 = vsel %vm8253_vm14, %v6700_v53, %v6689_v37 }
 0x88e   : > { %5459 = vmatpush.msrb.mxu1 %v5409_v3  ;;  %5482 = vmatpush.msrb.mxu2 %v5407_v39 }
 0x890   : > { %5460 = vmatpush.msrb.mxu1 %v5406_v56  ;;  %v6703_v6 = vpop.permute.xlu1 %6702 }
 0x891   : > { %5845 = vmatmul.msk.f32.gmra.mxu0 %vm375_vm2, %v8094_v36  ;;  %v6705_v40 = vunpack.i.h.bf16 %v6703_v6  ;;  %v6704_v25 = vunpack.i.l.bf16 %v6703_v6  ;;  %5858 = vmatmul.msk.f32.vlgmr.msrb.gmra.mxu3 %vm375_vm2, %v5281_v43 }
 0x893   : > { %v5408_v29 = vsel %vm8254_vm7, %v6704_v25, %v6699_v60  ;;  %v5405_v21 = vsel %vm8255_vm8, %v6705_v40, %v6700_v53 }
 0x894   : > { %5437 = vmatpush.msrb.mxu0 %v5408_v29 }
 0x895   : > { %5854 = vmatmul.msk.f32.vlgmr.msra.gmra.mxu1 %vm375_vm2, %v5281_v43  ;;  %5856 = vmatmul.msk.f32.vlgmr.msra.gmra.mxu2 %vm375_vm2, %v5281_v43 }
 0x896   : > { %5438 = vmatpush.msrb.mxu0 %v5405_v21 }
 0x899   : > { %5852 = vmatmul.msk.f32.vlgmr.msra.gmra.mxu0 %vm375_vm2, %v5175_v33  ;;  %5859 = vmatmul.msk.f32.gmra.mxu3 %vm375_vm2, %v5282_v7 }
 0x89d   : > { %5855 = vmatmul.msk.f32.gmra.mxu1 %vm375_vm2, %v5282_v7  ;;  %5857 = vmatmul.msk.f32.gmra.mxu2 %vm375_vm2, %v5282_v7 }
 0x8a1   : > { %5853 = vmatmul.msk.f32.gmra.mxu0 %vm375_vm2, %v5176_v26 }
 0x8a5   : > { %5862 = vmatmul.msk.f32.vlgmr.msrb.gmra.mxu1 %vm375_vm2, %v5387_v28  ;;  %5864 = vmatmul.msk.f32.vlgmr.msrb.gmra.mxu2 %vm375_vm2, %v5387_v28 }
 0x8a9   : > { %5860 = vmatmul.msk.f32.vlgmr.msrb.gmra.mxu0 %vm375_vm2, %v5387_v28 }
 0x8c2   : > { %v4651_v9 = vpop.f32.mrf.mxu1 }
 0x8c6   : > { %v4629_v54 = vpop.f32.mrf.mxu0 }
 0x8c7   : > { %v4702_v0 = vadd.f32 %v4701_v22, %v4629_v54 }
 0x8c8   : > { %v4673_v12 = vpop.f32.mrf.mxu2 }
 0x8ca   : > { %v4654_v5 = vpop.f32.mrf.mxu1 }
 0x8ce   : > { %v4632_v32 = vpop.f32.mrf.mxu0 }
 0x8d0   : > { %v4676_v55 = vpop.f32.mrf.mxu2 }
 0x8d2   : > { %v4745_v17 = vpop.f32.mrf.mxu1 }
 0x8d3   : > { %v4746_v48 = vadd.f32 %v4745_v17, %v4673_v12 }
 0x8d4   : > { %v4826_v38 = vpop.f32.mrf.mxu3 }
 0x8d6   : > { %v4723_v24 = vpop.f32.mrf.mxu0 }
 0x8d7   : > { %v4724_v13 = vadd.f32 %v4723_v24, %v4651_v9 }
 0x8d8   : > { %v4804_v50 = vpop.f32.mrf.mxu2 }
 0x8d9   : > { %v4854_v44 = vadd.f32 %v4826_v38, %v4724_v13  ;;  %v4853_v36 = vadd.f32 %v4804_v50, %v4702_v0 }
 0x8da   : > { %v4748_v57 = vpop.f32.mrf.mxu1 }
 0x8db   : > { %v5492_v57 = vld [vmem:[%s6808_s26] sm:$0xf] }
 0x8dc   : > { %v4829_v59 = vpop.f32.mrf.mxu3 }
 0x8de   : > { %v4726_v11 = vpop.f32.mrf.mxu0 }
 0x8e0   : > { %v4807_v35 = vpop.f32.mrf.mxu2 }
 0x8e2   : > { %v4910_v47 = vpop.f32.mrf.mxu1 }
 0x8e3   : > { %v4959_v3 = vadd.f32 %v4910_v47, %v4853_v36 }
 0x8e4   : > { %v4954_v49 = vpop.f32.mrf.mxu3 }
 0x8e6   : > { %v4848_v62 = vpop.f32.mrf.mxu0 }
 0x8e7   : > { %v4855_v53 = vadd.f32 %v4848_v62, %v4746_v48 }
 0x8e8   : > { %v4932_v27 = vpop.f32.mrf.mxu2 }
 0x8e9   : > { %v4960_v45 = vadd.f32 %v4932_v27, %v4854_v44  ;;  %v4961_v56 = vadd.f32 %v4954_v49, %v4855_v53  ;;  %v5388_v44 = vld [vmem:[#allocation4 + $0x2c8] sm:$0xff] }
 0x8ea   : > { %v4913_v34 = vpop.f32.mrf.mxu1  ;;  %5865 = vmatmul.msk.f32.gmra.mxu2 %vm375_vm2, %v5388_v44  ;;  %5861 = vmatmul.msk.f32.gmra.mxu0 %vm375_vm2, %v5388_v44 }
 0x8eb   : > { %5863 = vmatmul.msk.f32.gmra.mxu1 %vm375_vm2, %v5388_v44  ;;  %v8256_v34 = vlaneseq }
 0x8ec   : > { %v4957_v31 = vpop.f32.mrf.mxu3 }
 0x8ed   : > { %vm5514_vm1 = vcmp.lt.s32.totalorder %v8256_v34, 384 }
 0x8ee   : > { %v4851_v8 = vpop.f32.mrf.mxu0 }
 0x8f0   : > { %v4935_v41 = vpop.f32.mrf.mxu2 }
 0x8f2   : > { %v5038_v10 = vpop.f32.mrf.mxu1 }
 0x8f3   : > { %v5066_v60 = vadd.f32 %v5038_v10, %v4960_v45 }
 0x8f4   : > { %v5122_v1 = vpop.f32.mrf.mxu3 }
 0x8f6   : > { %v5016_v33 = vpop.f32.mrf.mxu0 }
 0x8f7   : > { %v5065_v6 = vadd.f32 %v5016_v33, %v4959_v3 }
 0x8f8   : > { %v5060_v19 = vpop.f32.mrf.mxu2 }
 0x8f9   : > { %v5067_v25 = vadd.f32 %v5060_v19, %v4961_v56  ;;  %v5171_v7 = vadd.f32 %v5122_v1, %v5065_v6 }
 0x8fa   : > { %v5041_v51 = vpop.f32.mrf.mxu1 }
 0x8fc   : > { %v5125_v61 = vpop.f32.mrf.mxu3 }
 0x8fe   : > { %v5019_v42 = vpop.f32.mrf.mxu0 }
 0x900   : > { %v5063_v63 = vpop.f32.mrf.mxu2 }
 0x902   : > { %v5166_v58 = vpop.f32.mrf.mxu1 }
 0x903   : > { %v5173_v28 = vadd.f32 %v5166_v58, %v5067_v25 }
 0x904   : > { %v5250_v16 = vpop.f32.mrf.mxu3 }
 0x906   : > { %v5144_v52 = vpop.f32.mrf.mxu0 }
 0x907   : > { %v5172_v39 = vadd.f32 %v5144_v52, %v5066_v60 }
 0x908   : > { %v5228_v2 = vpop.f32.mrf.mxu2 }
 0x909   : > { %v5278_v29 = vadd.f32 %v5250_v16, %v5172_v39  ;;  %v5277_v9 = vadd.f32 %v5228_v2, %v5171_v7 }
 0x90a   : > { %v5169_v4 = vpop.f32.mrf.mxu1 }
 0x90c   : > { %v5253_v26 = vpop.f32.mrf.mxu3 }
 0x90e   : > { %v5147_v14 = vpop.f32.mrf.mxu0 }
 0x910   : > { %v5231_v30 = vpop.f32.mrf.mxu2 }
 0x912   : > { %v5334_v15 = vpop.f32.mrf.mxu1 }
 0x913   : > { %v5383_v12 = vadd.f32 %v5334_v15, %v5277_v9 }
 0x914   : > { %v5378_v37 = vpop.f32.mrf.mxu3 }
 0x916   : > { %v5272_v20 = vpop.f32.mrf.mxu0 }
 0x917   : > { %v5279_v54 = vadd.f32 %v5272_v20, %v5173_v28 }
 0x918   : > { %v5356_v23 = vpop.f32.mrf.mxu2 }
 0x919   : > { %v5384_v22 = vadd.f32 %v5356_v23, %v5278_v29  ;;  %v5385_v55 = vadd.f32 %v5378_v37, %v5279_v54 }
 0x91a   : > { %v5337_v18 = vpop.f32.mrf.mxu1 }
 0x91c   : > { %v5381_v43 = vpop.f32.mrf.mxu3 }
 0x91e   : > { %v5275_v40 = vpop.f32.mrf.mxu0 }
 0x920   : > { %v5359_v21 = vpop.f32.mrf.mxu2 }
 0x922   : > { %v5462_v46 = vpop.f32.mrf.mxu1 }
 0x923   : > { %v5490_v0 = vadd.f32 %v5462_v46, %v5384_v22 }
 0x925   : > { %v5496_v5 = vrot.slane %v5490_v0, 7 }
 0x926   : > { %v5440_v32 = vpop.f32.mrf.mxu0 }
 0x927   : > { %v5489_v17 = vadd.f32 %v5440_v32, %v5383_v12 }
 0x928   : > { %v5484_v48 = vpop.f32.mrf.mxu2 }
 0x929   : > { %v5499_v38 = vsel %vm5498_vm9, %v5489_v17, %v5496_v5  ;;  %v5491_v24 = vadd.f32 %v5484_v48, %v5385_v55 }
 0x92b   : > { %v5497_v13 = vrot.slane %v5491_v24, 6 }
 0x92d   : > { %v5501_v50 = vsel %vm5500_vm6, %v5499_v38, %v5497_v13 }
 0x92e   : > { %5502 = vrot.lane.b32.xlu2 %v5501_v50, %s6761_s6 }
 0x967   : > { %v5443_v47 = vpop.f32.mrf.mxu0 }
 0x968   : > { %v5465_v49 = vpop.f32.mrf.mxu1 }
 0x96d   : > { %v5487_v62 = vpop.f32.mrf.mxu2 }
 0x988   : > { %v5503_v36 = vpop.permute.xlu2 %5502 }
 0x989   : > { %v5504_v59 = vrot.slane %v5503_v36, 7 }
 0x98b   : > { %v5505_v11 = vsel %vm198_vm0, %v5504_v59, %v5503_v36 }
 0x98c   : > { %v5507_v35 = vsub.f32 %v5492_v57, %v5505_v11 }
 0x98e   : > { %5509 = vrot.lane.b32.xlu0 %v5507_v35, %s6755_s28 }
 0xa00   : > { %v5510_v27 = vpop.permute.xlu0 %5509 }
 0xa01   : > { %v5511_v31 = vrot.slane %v5510_v27, 1 }
 0xa03   : > { %v5512_v8 = vsel %vm771_vm5, %v5510_v27, %v5511_v31 }
 0xa04   : > { %5516 = vst.msk [vmem:[%s182_s24] sm:$0x7] %vm5514_vm1, %v5512_v8 }
 0xa05 PF: > { %s14_s12 = sadd.s32 1, %s6746_s12  }
 0xa06   : > { %p11_p7 = scmp.ge.s32.totalorder %s14_s12, 4  }
 0xa08   :  { %13 = sbr.rel (!%p11_p7) target bundleno = 1 (0x1), region = 114 }
 0xa0d   :  { %5536 = vsyncpa [#allocation5], 1 }
 0xa0e   :  { %5538 = vsyncpa [#allocation5 + $0x1], 1 }

</bundles_post_ra>
